<compile_context>
chip_gen: v5e
topology: v5e:2x2
jax: 0.10.0
libtpu: 0.0.40
codegen_flags: <defaults>
</compile_context>

<pallas_src>
import functools

import jax
import jax.numpy as jnp
from jax.experimental import pallas as pl
from jax.experimental.pallas import tpu as pltpu


# ----------------------------------------------------------------------------
# Fused Pallas kernel: one grid step = one batch element, whole down_block.
# ----------------------------------------------------------------------------

def _down_block_kernel(xp_ref,
                       s1_ref, t1_ref, w1_ref,
                       s2_ref, t2_ref, w2_ref,
                       ssc_ref, tsc_ref, wsc_ref,
                       sa_ref, ta_ref, wa_ref,
                       sb_ref, tb_ref, wb_ref,
                       o_ref,
                       pad_in_ref, pad_mid_ref,
                       *, hp, wp, cin, cout, nb_extra):
    hw = hp * wp
    bf16 = jnp.bfloat16

    # Only the 1-pixel borders of the padded scratch tiles must be zero; the interiors
    # are fully overwritten before every use.  Zeroing the whole (tiny) tiles is cheapest.
    pad_in_ref[...] = jnp.zeros_like(pad_in_ref)
    pad_mid_ref[...] = jnp.zeros_like(pad_mid_ref)

    def bn_relu(x2d, scale, shift):
        # folded inference BatchNorm + ReLU (f32 VPU math)
        return jnp.maximum(x2d * scale + shift, 0.0)

    def conv3x3(x2d, pad_ref, w_packed, c_in):
        # Write the activation into the zero-padded VMEM scratch, gather the 9 shifted
        # taps, lane-concat to an im2col slab (hw, 9*c_in) and do ONE bf16 MXU matmul
        # with f32 accumulation against the pre-packed (9*c_in, cout) weight.
        pad_ref[1:1 + hp, 1:1 + wp, :] = x2d.reshape(hp, wp, c_in)
        taps = [pad_ref[kh:kh + hp, kw:kw + wp, :].reshape(hw, c_in)
                for kh in range(3) for kw in range(3)]
        patches = jnp.concatenate(taps, axis=-1).astype(bf16)       # (hw, 9*c_in)
        return jnp.dot(patches, w_packed, preferred_element_type=jnp.float32)

    # ---- MaxPool2d(2): reduce the 4 pre-gathered taps (in-kernel VPU max) ---------------
    pooled = jnp.maximum(jnp.maximum(xp_ref[0], xp_ref[1]),
                         jnp.maximum(xp_ref[2], xp_ref[3]))          # (hp, wp, cin)
    pooled = pooled.reshape(hw, cin)

    # ---- ResConvBlock(in_ch, out_ch): projection shortcut -------------------------------
    a = bn_relu(pooled, s1_ref[...], t1_ref[...])
    y = conv3x3(a, pad_in_ref, w1_ref[...], cin)
    a = bn_relu(y, s2_ref[...], t2_ref[...])
    y = conv3x3(a, pad_mid_ref, w2_ref[...], cout)
    sc = bn_relu(pooled, ssc_ref[...], tsc_ref[...])
    sc = jnp.dot(sc.astype(bf16), wsc_ref[...], preferred_element_type=jnp.float32)
    x = y + sc                                                       # fused residual add

    # ---- (num_block - 1) x ResConvBlock(out_ch, out_ch): identity shortcut --------------
    for i in range(nb_extra):
        a = bn_relu(x, sa_ref[i], ta_ref[i])
        y = conv3x3(a, pad_mid_ref, wa_ref[i], cout)
        a = bn_relu(y, sb_ref[i], tb_ref[i])
        y = conv3x3(a, pad_mid_ref, wb_ref[i], cout)
        x = x + y                                                    # fused residual add

    o_ref[...] = x


# ----------------------------------------------------------------------------
# Wrapper: NCHW in / NCHW out, single pallas_call.
# ----------------------------------------------------------------------------

def _bn_fold(bn, eps=1e-5):
    scale = bn["gamma"] / jnp.sqrt(bn["var"] + eps)
    shift = bn["beta"] - bn["mean"] * scale
    return (scale.reshape(1, -1).astype(jnp.float32),
            shift.reshape(1, -1).astype(jnp.float32))


def _pack_w3(w9):
    # (9, Cin, Cout) -> (9*Cin, Cout) bf16, tap-major / channel-minor, matching the
    # lane order of the in-kernel im2col concat.
    return w9.reshape(-1, w9.shape[-1]).astype(jnp.bfloat16)


def down_block_forward(x_nchw, params):
    B, Cin, H, W = x_nchw.shape
    Hp, Wp = H // 2, W // 2
    Cout = params["w1"].shape[-1]
    blocks = params["blocks"]
    nb_extra = len(blocks)

    # One XLA transpose: move channels to lanes AND group the 2x2 pooling taps on a leading
    # axis, so the kernel reads each input element exactly once.
    x = x_nchw.astype(jnp.float32).reshape(B, Cin, Hp, 2, Wp, 2)
    xp = x.transpose(0, 3, 5, 2, 4, 1).reshape(B, 4, Hp, Wp, Cin)

    s1, t1 = _bn_fold(params["bn1"])
    s2, t2 = _bn_fold(params["bn2"])
    ssc, tsc = _bn_fold(params["bn_sc"])

    if nb_extra:
        sa, ta = zip(*[_bn_fold(b["bn1"]) for b in blocks])
        sb, tb = zip(*[_bn_fold(b["bn2"]) for b in blocks])
        sa, ta, sb, tb = (jnp.stack(v) for v in (sa, ta, sb, tb))     # (nb, 1, Cout)
        wa = jnp.stack([_pack_w3(b["w1"]) for b in blocks])           # (nb, 9*Cout, Cout)
        wb = jnp.stack([_pack_w3(b["w2"]) for b in blocks])
    else:  # dummies; the in-kernel python loop runs zero times
        sa = ta = sb = tb = jnp.zeros((1, 1, Cout), jnp.float32)
        wa = wb = jnp.zeros((1, 9 * Cout, Cout), jnp.bfloat16)

    args = (xp,
            s1, t1, _pack_w3(params["w1"]),
            s2, t2, _pack_w3(params["w2"]),
            ssc, tsc, params["w_sc"].astype(jnp.bfloat16),
            sa, ta, wa, sb, tb, wb)

    def const_spec(a):
        nd = a.ndim
        return pl.BlockSpec(a.shape, lambda b, nd=nd: (0,) * nd)

    in_specs = [pl.BlockSpec((None, 4, Hp, Wp, Cin), lambda b: (b, 0, 0, 0, 0))]
    in_specs += [const_spec(a) for a in args[1:]]

    kernel = functools.partial(_down_block_kernel, hp=Hp, wp=Wp,
                               cin=Cin, cout=Cout, nb_extra=nb_extra)

    out = pl.pallas_call(
        kernel,
        out_shape=jax.ShapeDtypeStruct((B, Hp * Wp, Cout), jnp.float32),
        grid=(B,),
        in_specs=in_specs,
        out_specs=pl.BlockSpec((None, Hp * Wp, Cout), lambda b: (b, 0, 0)),
        scratch_shapes=[pltpu.VMEM((Hp + 2, Wp + 2, Cin), jnp.float32),
                        pltpu.VMEM((Hp + 2, Wp + 2, Cout), jnp.float32)],
        compiler_params=pltpu.CompilerParams(
            dimension_semantics=("parallel",)),
    )(*args)

    return out.reshape(B, Hp, Wp, Cout).transpose(0, 3, 1, 2)        # back to NCHW


# ----------------------------------------------------------------------------
# Pure-JAX reference (for a sanity check in __main__).
# ----------------------------------------------------------------------------

def _ref_forward(x_nchw, params, eps=1e-5):
    def bn_relu(x, bn):
        s = bn["gamma"] / jnp.sqrt(bn["var"] + eps)
        t = bn["beta"] - bn["mean"] * s
        return jnp.maximum(x * s + t, 0.0)                           # NHWC, C broadcast

    def conv3(x, w9):
        w = w9.reshape(3, 3, w9.shape[1], w9.shape[2])               # HWIO
        return jax.lax.conv_general_dilated(
            x, w, (1, 1), 'SAME', dimension_numbers=('NHWC', 'HWIO', 'NHWC'))

    x = x_nchw.transpose(0, 2, 3, 1)
    B, H, W, C = x.shape
    x = x.reshape(B, H // 2, 2, W // 2, 2, C).max(axis=(2, 4))       # MaxPool2d(2)

    a = bn_relu(x, params["bn1"]); y = conv3(a, params["w1"])
    a = bn_relu(y, params["bn2"]); y = conv3(a, params["w2"])
    sc = bn_relu(x, params["bn_sc"]) @ params["w_sc"]
    x = y + sc
    for blk in params["blocks"]:
        a = bn_relu(x, blk["bn1"]); y = conv3(a, blk["w1"])
        a = bn_relu(y, blk["bn2"]); y = conv3(a, blk["w2"])
        x = x + y
    return x.transpose(0, 3, 1, 2)


# ----------------------------------------------------------------------------
# Deterministic parameter construction (inference-mode BN stats).
# ----------------------------------------------------------------------------

def _bn_params(key, c):
    k1, k2, k3, k4 = jax.random.split(key, 4)
    return dict(
        gamma=1.0 + 0.1 * jax.random.normal(k1, (c,), jnp.float32),
        beta=0.1 * jax.random.normal(k2, (c,), jnp.float32),
        mean=0.1 * jax.random.normal(k3, (c,), jnp.float32),
        var=jax.random.uniform(k4, (c,), jnp.float32, 0.5, 1.5),
    )


def init_params(key, in_ch, out_ch, num_block):
    # Conv weights are stored as (9, Cin, Cout); a PyTorch (Cout, Cin, 3, 3) weight maps via
    # w.permute(2, 3, 1, 0).reshape(9, Cin, Cout).  conv1x1 weight is (Cin, Cout).
    keys = iter(jax.random.split(key, 16 + 8 * num_block))
    nxt = lambda: next(keys)
    w3 = lambda ci, co: 0.1 * jax.random.normal(nxt(), (9, ci, co), jnp.float32)

    p = dict(
        bn1=_bn_params(nxt(), in_ch), w1=w3(in_ch, out_ch),
        bn2=_bn_params(nxt(), out_ch), w2=w3(out_ch, out_ch),
        bn_sc=_bn_params(nxt(), in_ch),
        w_sc=0.1 * jax.random.normal(nxt(), (in_ch, out_ch), jnp.float32),
        blocks=[],
    )
    for _ in range(num_block - 1):
        p["blocks"].append(dict(
            bn1=_bn_params(nxt(), out_ch), w1=w3(out_ch, out_ch),
            bn2=_bn_params(nxt(), out_ch), w2=w3(out_ch, out_ch),
        ))
    return p


# ----------------------------------------------------------------------------
# Main
# ----------------------------------------------------------------------------

if __name__ == "__main__":
    B, in_ch, out_ch = 2, 4, 32
    H = W = 16                # MaxPool2d(2) -> 8x8
    num_block = 2             # ResConvBlock(4, 32) then ResConvBlock(32, 32)

    key = jax.random.PRNGKey(0)
    kx, kp = jax.random.split(key)
    x_nchw = jax.random.normal(kx, (B, in_ch, H, W), jnp.float32)
    params = init_params(kp, in_ch, out_ch, num_block)

    out = jax.jit(down_block_forward)(x_nchw, params)
    out = jax.block_until_ready(out)

    assert out.shape == (B, out_ch, H // 2, W // 2), out.shape
    assert bool(jnp.all(jnp.isfinite(out)))

    # Sanity check against a pure-JAX/XLA reference (bf16 MXU => loose tolerance).
    ref = _ref_forward(x_nchw, params)
    assert bool(jnp.allclose(out, ref, rtol=1e-1, atol=1e-1)), float(
        jnp.max(jnp.abs(out - ref)))

    print("KERNEL_OK")
</pallas_src>

<mosaic_0001>
module attributes {stable_mosaic.version = 11 : i64} {
  func.func @_down_block_kernel(%arg0: i32, %arg1: memref<1x4x8x8x4xf32, #tpu.memory_space<vmem>>, %arg2: memref<1x4xf32, #tpu.memory_space<vmem>>, %arg3: memref<1x4xf32, #tpu.memory_space<vmem>>, %arg4: memref<36x32xbf16, #tpu.memory_space<vmem>>, %arg5: memref<1x32xf32, #tpu.memory_space<vmem>>, %arg6: memref<1x32xf32, #tpu.memory_space<vmem>>, %arg7: memref<288x32xbf16, #tpu.memory_space<vmem>>, %arg8: memref<1x4xf32, #tpu.memory_space<vmem>>, %arg9: memref<1x4xf32, #tpu.memory_space<vmem>>, %arg10: memref<4x32xbf16, #tpu.memory_space<vmem>>, %arg11: memref<1x1x32xf32, #tpu.memory_space<vmem>>, %arg12: memref<1x1x32xf32, #tpu.memory_space<vmem>>, %arg13: memref<1x288x32xbf16, #tpu.memory_space<vmem>>, %arg14: memref<1x1x32xf32, #tpu.memory_space<vmem>>, %arg15: memref<1x1x32xf32, #tpu.memory_space<vmem>>, %arg16: memref<1x288x32xbf16, #tpu.memory_space<vmem>>, %arg17: memref<1x64x32xf32, #tpu.memory_space<vmem>>, %arg18: memref<10x10x4xf32, #tpu.memory_space<vmem>>, %arg19: memref<10x10x32xf32, #tpu.memory_space<vmem>>) attributes {dimension_semantics = [#tpu.dimension_semantics<parallel>], iteration_bounds = array<i64: 2>, scalar_prefetch = 0 : i64, scratch_operands = 2 : i64, tpu.core_type = #tpu.core_type<tc>, window_params = [{transform_indices = @transform_0, window_bounds = array<i64: 1, 4, 8, 8, 4>}, {pipeline_mode = #tpu.pipeline_mode<synchronous>, transform_indices = @transform_1, window_bounds = array<i64: 1, 4>}, {pipeline_mode = #tpu.pipeline_mode<synchronous>, transform_indices = @transform_2, window_bounds = array<i64: 1, 4>}, {pipeline_mode = #tpu.pipeline_mode<synchronous>, transform_indices = @transform_3, window_bounds = array<i64: 36, 32>}, {pipeline_mode = #tpu.pipeline_mode<synchronous>, transform_indices = @transform_4, window_bounds = array<i64: 1, 32>}, {pipeline_mode = #tpu.pipeline_mode<synchronous>, transform_indices = @transform_5, window_bounds = array<i64: 1, 32>}, {pipeline_mode = #tpu.pipeline_mode<synchronous>, transform_indices = @transform_6, window_bounds = array<i64: 288, 32>}, {pipeline_mode = #tpu.pipeline_mode<synchronous>, transform_indices = @transform_7, window_bounds = array<i64: 1, 4>}, {pipeline_mode = #tpu.pipeline_mode<synchronous>, transform_indices = @transform_8, window_bounds = array<i64: 1, 4>}, {pipeline_mode = #tpu.pipeline_mode<synchronous>, transform_indices = @transform_9, window_bounds = array<i64: 4, 32>}, {pipeline_mode = #tpu.pipeline_mode<synchronous>, transform_indices = @transform_10, window_bounds = array<i64: 1, 1, 32>}, {pipeline_mode = #tpu.pipeline_mode<synchronous>, transform_indices = @transform_11, window_bounds = array<i64: 1, 1, 32>}, {pipeline_mode = #tpu.pipeline_mode<synchronous>, transform_indices = @transform_12, window_bounds = array<i64: 1, 288, 32>}, {pipeline_mode = #tpu.pipeline_mode<synchronous>, transform_indices = @transform_13, window_bounds = array<i64: 1, 1, 32>}, {pipeline_mode = #tpu.pipeline_mode<synchronous>, transform_indices = @transform_14, window_bounds = array<i64: 1, 1, 32>}, {pipeline_mode = #tpu.pipeline_mode<synchronous>, transform_indices = @transform_15, window_bounds = array<i64: 1, 288, 32>}, {transform_indices = @transform_16, window_bounds = array<i64: 1, 64, 32>}]} {
    %cst = arith.constant 0.000000e+00 : f32
    %0 = vector.broadcast %cst : f32 to vector<10x10x4xf32>
    %c0 = arith.constant 0 : index
    %c0_0 = arith.constant 0 : index
    %c0_1 = arith.constant 0 : index
    %1 = vector.load %arg18[%c0, %c0_0, %c0_1] : memref<10x10x4xf32, #tpu.memory_space<vmem>>, vector<10x10x4xf32>
    tpu.vector_store %arg18[%c0, %c0_0, %c0_1], %0 {strides = array<i32>} : memref<10x10x4xf32, #tpu.memory_space<vmem>>, vector<10x10x4xf32>,
    %cst_2 = arith.constant 0.000000e+00 : f32
    %2 = vector.broadcast %cst_2 : f32 to vector<10x10x32xf32>
    %c0_3 = arith.constant 0 : index
    %c0_4 = arith.constant 0 : index
    %c0_5 = arith.constant 0 : index
    %3 = vector.load %arg19[%c0_3, %c0_4, %c0_5] : memref<10x10x32xf32, #tpu.memory_space<vmem>>, vector<10x10x32xf32>
    tpu.vector_store %arg19[%c0_3, %c0_4, %c0_5], %2 {strides = array<i32>} : memref<10x10x32xf32, #tpu.memory_space<vmem>>, vector<10x10x32xf32>,
    %c0_6 = arith.constant 0 : index
    %c0_7 = arith.constant 0 : index
    %c0_8 = arith.constant 0 : index
    %c0_9 = arith.constant 0 : index
    %c0_10 = arith.constant 0 : index
    %4 = vector.load %arg1[%c0_6, %c0_7, %c0_8, %c0_9, %c0_10] : memref<1x4x8x8x4xf32, #tpu.memory_space<vmem>>, vector<1x1x8x8x4xf32>
    %5 = vector.shape_cast %4 : vector<1x1x8x8x4xf32> to vector<8x8x4xf32>
    %c0_11 = arith.constant 0 : index
    %c1 = arith.constant 1 : index
    %c0_12 = arith.constant 0 : index
    %c0_13 = arith.constant 0 : index
    %c0_14 = arith.constant 0 : index
    %6 = vector.load %arg1[%c0_11, %c1, %c0_12, %c0_13, %c0_14] : memref<1x4x8x8x4xf32, #tpu.memory_space<vmem>>, vector<1x1x8x8x4xf32>
    %7 = vector.shape_cast %6 : vector<1x1x8x8x4xf32> to vector<8x8x4xf32>
    %8 = arith.maximumf %5, %7 : vector<8x8x4xf32>
    %c0_15 = arith.constant 0 : index
    %c2 = arith.constant 2 : index
    %c0_16 = arith.constant 0 : index
    %c0_17 = arith.constant 0 : index
    %c0_18 = arith.constant 0 : index
    %9 = vector.load %arg1[%c0_15, %c2, %c0_16, %c0_17, %c0_18] : memref<1x4x8x8x4xf32, #tpu.memory_space<vmem>>, vector<1x1x8x8x4xf32>
    %10 = vector.shape_cast %9 : vector<1x1x8x8x4xf32> to vector<8x8x4xf32>
    %c0_19 = arith.constant 0 : index
    %c3 = arith.constant 3 : index
    %c0_20 = arith.constant 0 : index
    %c0_21 = arith.constant 0 : index
    %c0_22 = arith.constant 0 : index
    %11 = vector.load %arg1[%c0_19, %c3, %c0_20, %c0_21, %c0_22] : memref<1x4x8x8x4xf32, #tpu.memory_space<vmem>>, vector<1x1x8x8x4xf32>
    %12 = vector.shape_cast %11 : vector<1x1x8x8x4xf32> to vector<8x8x4xf32>
    %13 = arith.maximumf %10, %12 : vector<8x8x4xf32>
    %14 = arith.maximumf %8, %13 : vector<8x8x4xf32>
    %15 = vector.shape_cast %14 : vector<8x8x4xf32> to vector<64x4xf32>
    %c0_23 = arith.constant 0 : index
    %c0_24 = arith.constant 0 : index
    %16 = vector.load %arg2[%c0_23, %c0_24] : memref<1x4xf32, #tpu.memory_space<vmem>>, vector<1x4xf32>
    %c0_25 = arith.constant 0 : index
    %c0_26 = arith.constant 0 : index
    %17 = vector.load %arg3[%c0_25, %c0_26] : memref<1x4xf32, #tpu.memory_space<vmem>>, vector<1x4xf32>
    %18 = vector.broadcast %16 : vector<1x4xf32> to vector<64x4xf32>
    %19 = arith.mulf %15, %18 : vector<64x4xf32>
    %20 = vector.broadcast %17 : vector<1x4xf32> to vector<64x4xf32>
    %21 = arith.addf %19, %20 : vector<64x4xf32>
    %cst_27 = arith.constant 0.000000e+00 : f32
    %22 = vector.broadcast %cst_27 : f32 to vector<64x4xf32>
    %23 = arith.maximumf %21, %22 : vector<64x4xf32>
    %c0_28 = arith.constant 0 : index
    %c0_29 = arith.constant 0 : index
    %24 = vector.load %arg4[%c0_28, %c0_29] : memref<36x32xbf16, #tpu.memory_space<vmem>>, vector<36x32xbf16>
    %25 = vector.shape_cast %23 : vector<64x4xf32> to vector<8x8x4xf32>
    %c1_30 = arith.constant 1 : index
    %c1_31 = arith.constant 1 : index
    %c0_32 = arith.constant 0 : index
    %26 = vector.load %arg18[%c1_30, %c1_31, %c0_32] : memref<10x10x4xf32, #tpu.memory_space<vmem>>, vector<8x8x4xf32>
    tpu.vector_store %arg18[%c1_30, %c1_31, %c0_32], %25 {strides = array<i32>} : memref<10x10x4xf32, #tpu.memory_space<vmem>>, vector<8x8x4xf32>,
    %c0_33 = arith.constant 0 : index
    %c0_34 = arith.constant 0 : index
    %c0_35 = arith.constant 0 : index
    %27 = vector.load %arg18[%c0_33, %c0_34, %c0_35] : memref<10x10x4xf32, #tpu.memory_space<vmem>>, vector<8x8x4xf32>
    %28 = vector.shape_cast %27 : vector<8x8x4xf32> to vector<64x4xf32>
    %c0_36 = arith.constant 0 : index
    %c1_37 = arith.constant 1 : index
    %c0_38 = arith.constant 0 : index
    %29 = vector.load %arg18[%c0_36, %c1_37, %c0_38] : memref<10x10x4xf32, #tpu.memory_space<vmem>>, vector<8x8x4xf32>
    %30 = vector.shape_cast %29 : vector<8x8x4xf32> to vector<64x4xf32>
    %c0_39 = arith.constant 0 : index
    %c2_40 = arith.constant 2 : index
    %c0_41 = arith.constant 0 : index
    %31 = vector.load %arg18[%c0_39, %c2_40, %c0_41] : memref<10x10x4xf32, #tpu.memory_space<vmem>>, vector<8x8x4xf32>
    %32 = vector.shape_cast %31 : vector<8x8x4xf32> to vector<64x4xf32>
    %c1_42 = arith.constant 1 : index
    %c0_43 = arith.constant 0 : index
    %c0_44 = arith.constant 0 : index
    %33 = vector.load %arg18[%c1_42, %c0_43, %c0_44] : memref<10x10x4xf32, #tpu.memory_space<vmem>>, vector<8x8x4xf32>
    %34 = vector.shape_cast %33 : vector<8x8x4xf32> to vector<64x4xf32>
    %c1_45 = arith.constant 1 : index
    %c1_46 = arith.constant 1 : index
    %c0_47 = arith.constant 0 : index
    %35 = vector.load %arg18[%c1_45, %c1_46, %c0_47] : memref<10x10x4xf32, #tpu.memory_space<vmem>>, vector<8x8x4xf32>
    %36 = vector.shape_cast %35 : vector<8x8x4xf32> to vector<64x4xf32>
    %c1_48 = arith.constant 1 : index
    %c2_49 = arith.constant 2 : index
    %c0_50 = arith.constant 0 : index
    %37 = vector.load %arg18[%c1_48, %c2_49, %c0_50] : memref<10x10x4xf32, #tpu.memory_space<vmem>>, vector<8x8x4xf32>
    %38 = vector.shape_cast %37 : vector<8x8x4xf32> to vector<64x4xf32>
    %c2_51 = arith.constant 2 : index
    %c0_52 = arith.constant 0 : index
    %c0_53 = arith.constant 0 : index
    %39 = vector.load %arg18[%c2_51, %c0_52, %c0_53] : memref<10x10x4xf32, #tpu.memory_space<vmem>>, vector<8x8x4xf32>
    %40 = vector.shape_cast %39 : vector<8x8x4xf32> to vector<64x4xf32>
    %c2_54 = arith.constant 2 : index
    %c1_55 = arith.constant 1 : index
    %c0_56 = arith.constant 0 : index
    %41 = vector.load %arg18[%c2_54, %c1_55, %c0_56] : memref<10x10x4xf32, #tpu.memory_space<vmem>>, vector<8x8x4xf32>
    %42 = vector.shape_cast %41 : vector<8x8x4xf32> to vector<64x4xf32>
    %c2_57 = arith.constant 2 : index
    %c2_58 = arith.constant 2 : index
    %c0_59 = arith.constant 0 : index
    %43 = vector.load %arg18[%c2_57, %c2_58, %c0_59] : memref<10x10x4xf32, #tpu.memory_space<vmem>>, vector<8x8x4xf32>
    %44 = vector.shape_cast %43 : vector<8x8x4xf32> to vector<64x4xf32>
    %45 = tpu.concatenate %28, %30, %32, %34, %36, %38, %40, %42, %44 in 1 : vector<64x4xf32>, vector<64x4xf32>, vector<64x4xf32>, vector<64x4xf32>, vector<64x4xf32>, vector<64x4xf32>, vector<64x4xf32>, vector<64x4xf32>, vector<64x4xf32> -> vector<64x36xf32>
    %46 = arith.truncf %45 : vector<64x36xf32> to vector<64x36xbf16>
    %cst_60 = arith.constant dense<0.000000e+00> : vector<64x32xf32>
    %47 = tpu.matmul %46, %24, %cst_60 {dimension_numbers = #tpu.dot_dimension_numbers<[1], [0], [0], [1], [0, 0, 1, 1], [], []>} : vector<64x36xbf16>, vector<36x32xbf16>, vector<64x32xf32> -> vector<64x32xf32>
    %c0_61 = arith.constant 0 : index
    %c0_62 = arith.constant 0 : index
    %48 = vector.load %arg5[%c0_61, %c0_62] : memref<1x32xf32, #tpu.memory_space<vmem>>, vector<1x32xf32>
    %c0_63 = arith.constant 0 : index
    %c0_64 = arith.constant 0 : index
    %49 = vector.load %arg6[%c0_63, %c0_64] : memref<1x32xf32, #tpu.memory_space<vmem>>, vector<1x32xf32>
    %50 = vector.broadcast %48 : vector<1x32xf32> to vector<64x32xf32>
    %51 = arith.mulf %47, %50 : vector<64x32xf32>
    %52 = vector.broadcast %49 : vector<1x32xf32> to vector<64x32xf32>
    %53 = arith.addf %51, %52 : vector<64x32xf32>
    %cst_65 = arith.constant 0.000000e+00 : f32
    %54 = vector.broadcast %cst_65 : f32 to vector<64x32xf32>
    %55 = arith.maximumf %53, %54 : vector<64x32xf32>
    %c0_66 = arith.constant 0 : index
    %c0_67 = arith.constant 0 : index
    %56 = vector.load %arg7[%c0_66, %c0_67] : memref<288x32xbf16, #tpu.memory_space<vmem>>, vector<288x32xbf16>
    %57 = vector.shape_cast %55 : vector<64x32xf32> to vector<8x8x32xf32>
    %c1_68 = arith.constant 1 : index
    %c1_69 = arith.constant 1 : index
    %c0_70 = arith.constant 0 : index
    %58 = vector.load %arg19[%c1_68, %c1_69, %c0_70] : memref<10x10x32xf32, #tpu.memory_space<vmem>>, vector<8x8x32xf32>
    tpu.vector_store %arg19[%c1_68, %c1_69, %c0_70], %57 {strides = array<i32>} : memref<10x10x32xf32, #tpu.memory_space<vmem>>, vector<8x8x32xf32>,
    %c0_71 = arith.constant 0 : index
    %c0_72 = arith.constant 0 : index
    %c0_73 = arith.constant 0 : index
    %59 = vector.load %arg19[%c0_71, %c0_72, %c0_73] : memref<10x10x32xf32, #tpu.memory_space<vmem>>, vector<8x8x32xf32>
    %60 = vector.shape_cast %59 : vector<8x8x32xf32> to vector<64x32xf32>
    %c0_74 = arith.constant 0 : index
    %c1_75 = arith.constant 1 : index
    %c0_76 = arith.constant 0 : index
    %61 = vector.load %arg19[%c0_74, %c1_75, %c0_76] : memref<10x10x32xf32, #tpu.memory_space<vmem>>, vector<8x8x32xf32>
    %62 = vector.shape_cast %61 : vector<8x8x32xf32> to vector<64x32xf32>
    %c0_77 = arith.constant 0 : index
    %c2_78 = arith.constant 2 : index
    %c0_79 = arith.constant 0 : index
    %63 = vector.load %arg19[%c0_77, %c2_78, %c0_79] : memref<10x10x32xf32, #tpu.memory_space<vmem>>, vector<8x8x32xf32>
    %64 = vector.shape_cast %63 : vector<8x8x32xf32> to vector<64x32xf32>
    %c1_80 = arith.constant 1 : index
    %c0_81 = arith.constant 0 : index
    %c0_82 = arith.constant 0 : index
    %65 = vector.load %arg19[%c1_80, %c0_81, %c0_82] : memref<10x10x32xf32, #tpu.memory_space<vmem>>, vector<8x8x32xf32>
    %66 = vector.shape_cast %65 : vector<8x8x32xf32> to vector<64x32xf32>
    %c1_83 = arith.constant 1 : index
    %c1_84 = arith.constant 1 : index
    %c0_85 = arith.constant 0 : index
    %67 = vector.load %arg19[%c1_83, %c1_84, %c0_85] : memref<10x10x32xf32, #tpu.memory_space<vmem>>, vector<8x8x32xf32>
    %68 = vector.shape_cast %67 : vector<8x8x32xf32> to vector<64x32xf32>
    %c1_86 = arith.constant 1 : index
    %c2_87 = arith.constant 2 : index
    %c0_88 = arith.constant 0 : index
    %69 = vector.load %arg19[%c1_86, %c2_87, %c0_88] : memref<10x10x32xf32, #tpu.memory_space<vmem>>, vector<8x8x32xf32>
    %70 = vector.shape_cast %69 : vector<8x8x32xf32> to vector<64x32xf32>
    %c2_89 = arith.constant 2 : index
    %c0_90 = arith.constant 0 : index
    %c0_91 = arith.constant 0 : index
    %71 = vector.load %arg19[%c2_89, %c0_90, %c0_91] : memref<10x10x32xf32, #tpu.memory_space<vmem>>, vector<8x8x32xf32>
    %72 = vector.shape_cast %71 : vector<8x8x32xf32> to vector<64x32xf32>
    %c2_92 = arith.constant 2 : index
    %c1_93 = arith.constant 1 : index
    %c0_94 = arith.constant 0 : index
    %73 = vector.load %arg19[%c2_92, %c1_93, %c0_94] : memref<10x10x32xf32, #tpu.memory_space<vmem>>, vector<8x8x32xf32>
    %74 = vector.shape_cast %73 : vector<8x8x32xf32> to vector<64x32xf32>
    %c2_95 = arith.constant 2 : index
    %c2_96 = arith.constant 2 : index
    %c0_97 = arith.constant 0 : index
    %75 = vector.load %arg19[%c2_95, %c2_96, %c0_97] : memref<10x10x32xf32, #tpu.memory_space<vmem>>, vector<8x8x32xf32>
    %76 = vector.shape_cast %75 : vector<8x8x32xf32> to vector<64x32xf32>
    %77 = tpu.concatenate %60, %62, %64, %66, %68, %70, %72, %74, %76 in 1 : vector<64x32xf32>, vector<64x32xf32>, vector<64x32xf32>, vector<64x32xf32>, vector<64x32xf32>, vector<64x32xf32>, vector<64x32xf32>, vector<64x32xf32>, vector<64x32xf32> -> vector<64x288xf32>
    %78 = arith.truncf %77 : vector<64x288xf32> to vector<64x288xbf16>
    %cst_98 = arith.constant dense<0.000000e+00> : vector<64x32xf32>
    %79 = tpu.matmul %78, %56, %cst_98 {dimension_numbers = #tpu.dot_dimension_numbers<[1], [0], [0], [1], [0, 0, 1, 1], [], []>} : vector<64x288xbf16>, vector<288x32xbf16>, vector<64x32xf32> -> vector<64x32xf32>
    %c0_99 = arith.constant 0 : index
    %c0_100 = arith.constant 0 : index
    %80 = vector.load %arg8[%c0_99, %c0_100] : memref<1x4xf32, #tpu.memory_space<vmem>>, vector<1x4xf32>
    %c0_101 = arith.constant 0 : index
    %c0_102 = arith.constant 0 : index
    %81 = vector.load %arg9[%c0_101, %c0_102] : memref<1x4xf32, #tpu.memory_space<vmem>>, vector<1x4xf32>
    %82 = vector.broadcast %80 : vector<1x4xf32> to vector<64x4xf32>
    %83 = arith.mulf %15, %82 : vector<64x4xf32>
    %84 = vector.broadcast %81 : vector<1x4xf32> to vector<64x4xf32>
    %85 = arith.addf %83, %84 : vector<64x4xf32>
    %cst_103 = arith.constant 0.000000e+00 : f32
    %86 = vector.broadcast %cst_103 : f32 to vector<64x4xf32>
    %87 = arith.maximumf %85, %86 : vector<64x4xf32>
    %88 = arith.truncf %87 : vector<64x4xf32> to vector<64x4xbf16>
    %c0_104 = arith.constant 0 : index
    %c0_105 = arith.constant 0 : index
    %89 = vector.load %arg10[%c0_104, %c0_105] : memref<4x32xbf16, #tpu.memory_space<vmem>>, vector<4x32xbf16>
    %cst_106 = arith.constant dense<0.000000e+00> : vector<64x32xf32>
    %90 = tpu.matmul %88, %89, %cst_106 {dimension_numbers = #tpu.dot_dimension_numbers<[1], [0], [0], [1], [0, 0, 1, 1], [], []>} : vector<64x4xbf16>, vector<4x32xbf16>, vector<64x32xf32> -> vector<64x32xf32>
    %91 = arith.addf %79, %90 : vector<64x32xf32>
    %c0_107 = arith.constant 0 : index
    %c0_108 = arith.constant 0 : index
    %c0_109 = arith.constant 0 : index
    %92 = vector.load %arg11[%c0_107, %c0_108, %c0_109] : memref<1x1x32xf32, #tpu.memory_space<vmem>>, vector<1x1x32xf32>
    %93 = vector.shape_cast %92 : vector<1x1x32xf32> to vector<1x32xf32>
    %c0_110 = arith.constant 0 : index
    %c0_111 = arith.constant 0 : index
    %c0_112 = arith.constant 0 : index
    %94 = vector.load %arg12[%c0_110, %c0_111, %c0_112] : memref<1x1x32xf32, #tpu.memory_space<vmem>>, vector<1x1x32xf32>
    %95 = vector.shape_cast %94 : vector<1x1x32xf32> to vector<1x32xf32>
    %96 = vector.broadcast %93 : vector<1x32xf32> to vector<64x32xf32>
    %97 = arith.mulf %91, %96 : vector<64x32xf32>
    %98 = vector.broadcast %95 : vector<1x32xf32> to vector<64x32xf32>
    %99 = arith.addf %97, %98 : vector<64x32xf32>
    %cst_113 = arith.constant 0.000000e+00 : f32
    %100 = vector.broadcast %cst_113 : f32 to vector<64x32xf32>
    %101 = arith.maximumf %99, %100 : vector<64x32xf32>
    %c0_114 = arith.constant 0 : index
    %c0_115 = arith.constant 0 : index
    %c0_116 = arith.constant 0 : index
    %102 = vector.load %arg13[%c0_114, %c0_115, %c0_116] : memref<1x288x32xbf16, #tpu.memory_space<vmem>>, vector<1x288x32xbf16>
    %103 = vector.shape_cast %102 : vector<1x288x32xbf16> to vector<288x32xbf16>
    %104 = vector.shape_cast %101 : vector<64x32xf32> to vector<8x8x32xf32>
    %c1_117 = arith.constant 1 : index
    %c1_118 = arith.constant 1 : index
    %c0_119 = arith.constant 0 : index
    %105 = vector.load %arg19[%c1_117, %c1_118, %c0_119] : memref<10x10x32xf32, #tpu.memory_space<vmem>>, vector<8x8x32xf32>
    tpu.vector_store %arg19[%c1_117, %c1_118, %c0_119], %104 {strides = array<i32>} : memref<10x10x32xf32, #tpu.memory_space<vmem>>, vector<8x8x32xf32>,
    %c0_120 = arith.constant 0 : index
    %c0_121 = arith.constant 0 : index
    %c0_122 = arith.constant 0 : index
    %106 = vector.load %arg19[%c0_120, %c0_121, %c0_122] : memref<10x10x32xf32, #tpu.memory_space<vmem>>, vector<8x8x32xf32>
    %107 = vector.shape_cast %106 : vector<8x8x32xf32> to vector<64x32xf32>
    %c0_123 = arith.constant 0 : index
    %c1_124 = arith.constant 1 : index
    %c0_125 = arith.constant 0 : index
    %108 = vector.load %arg19[%c0_123, %c1_124, %c0_125] : memref<10x10x32xf32, #tpu.memory_space<vmem>>, vector<8x8x32xf32>
    %109 = vector.shape_cast %108 : vector<8x8x32xf32> to vector<64x32xf32>
    %c0_126 = arith.constant 0 : index
    %c2_127 = arith.constant 2 : index
    %c0_128 = arith.constant 0 : index
    %110 = vector.load %arg19[%c0_126, %c2_127, %c0_128] : memref<10x10x32xf32, #tpu.memory_space<vmem>>, vector<8x8x32xf32>
    %111 = vector.shape_cast %110 : vector<8x8x32xf32> to vector<64x32xf32>
    %c1_129 = arith.constant 1 : index
    %c0_130 = arith.constant 0 : index
    %c0_131 = arith.constant 0 : index
    %112 = vector.load %arg19[%c1_129, %c0_130, %c0_131] : memref<10x10x32xf32, #tpu.memory_space<vmem>>, vector<8x8x32xf32>
    %113 = vector.shape_cast %112 : vector<8x8x32xf32> to vector<64x32xf32>
    %c1_132 = arith.constant 1 : index
    %c1_133 = arith.constant 1 : index
    %c0_134 = arith.constant 0 : index
    %114 = vector.load %arg19[%c1_132, %c1_133, %c0_134] : memref<10x10x32xf32, #tpu.memory_space<vmem>>, vector<8x8x32xf32>
    %115 = vector.shape_cast %114 : vector<8x8x32xf32> to vector<64x32xf32>
    %c1_135 = arith.constant 1 : index
    %c2_136 = arith.constant 2 : index
    %c0_137 = arith.constant 0 : index
    %116 = vector.load %arg19[%c1_135, %c2_136, %c0_137] : memref<10x10x32xf32, #tpu.memory_space<vmem>>, vector<8x8x32xf32>
    %117 = vector.shape_cast %116 : vector<8x8x32xf32> to vector<64x32xf32>
    %c2_138 = arith.constant 2 : index
    %c0_139 = arith.constant 0 : index
    %c0_140 = arith.constant 0 : index
    %118 = vector.load %arg19[%c2_138, %c0_139, %c0_140] : memref<10x10x32xf32, #tpu.memory_space<vmem>>, vector<8x8x32xf32>
    %119 = vector.shape_cast %118 : vector<8x8x32xf32> to vector<64x32xf32>
    %c2_141 = arith.constant 2 : index
    %c1_142 = arith.constant 1 : index
    %c0_143 = arith.constant 0 : index
    %120 = vector.load %arg19[%c2_141, %c1_142, %c0_143] : memref<10x10x32xf32, #tpu.memory_space<vmem>>, vector<8x8x32xf32>
    %121 = vector.shape_cast %120 : vector<8x8x32xf32> to vector<64x32xf32>
    %c2_144 = arith.constant 2 : index
    %c2_145 = arith.constant 2 : index
    %c0_146 = arith.constant 0 : index
    %122 = vector.load %arg19[%c2_144, %c2_145, %c0_146] : memref<10x10x32xf32, #tpu.memory_space<vmem>>, vector<8x8x32xf32>
    %123 = vector.shape_cast %122 : vector<8x8x32xf32> to vector<64x32xf32>
    %124 = tpu.concatenate %107, %109, %111, %113, %115, %117, %119, %121, %123 in 1 : vector<64x32xf32>, vector<64x32xf32>, vector<64x32xf32>, vector<64x32xf32>, vector<64x32xf32>, vector<64x32xf32>, vector<64x32xf32>, vector<64x32xf32>, vector<64x32xf32> -> vector<64x288xf32>
    %125 = arith.truncf %124 : vector<64x288xf32> to vector<64x288xbf16>
    %cst_147 = arith.constant dense<0.000000e+00> : vector<64x32xf32>
    %126 = tpu.matmul %125, %103, %cst_147 {dimension_numbers = #tpu.dot_dimension_numbers<[1], [0], [0], [1], [0, 0, 1, 1], [], []>} : vector<64x288xbf16>, vector<288x32xbf16>, vector<64x32xf32> -> vector<64x32xf32>
    %c0_148 = arith.constant 0 : index
    %c0_149 = arith.constant 0 : index
    %c0_150 = arith.constant 0 : index
    %127 = vector.load %arg14[%c0_148, %c0_149, %c0_150] : memref<1x1x32xf32, #tpu.memory_space<vmem>>, vector<1x1x32xf32>
    %128 = vector.shape_cast %127 : vector<1x1x32xf32> to vector<1x32xf32>
    %c0_151 = arith.constant 0 : index
    %c0_152 = arith.constant 0 : index
    %c0_153 = arith.constant 0 : index
    %129 = vector.load %arg15[%c0_151, %c0_152, %c0_153] : memref<1x1x32xf32, #tpu.memory_space<vmem>>, vector<1x1x32xf32>
    %130 = vector.shape_cast %129 : vector<1x1x32xf32> to vector<1x32xf32>
    %131 = vector.broadcast %128 : vector<1x32xf32> to vector<64x32xf32>
    %132 = arith.mulf %126, %131 : vector<64x32xf32>
    %133 = vector.broadcast %130 : vector<1x32xf32> to vector<64x32xf32>
    %134 = arith.addf %132, %133 : vector<64x32xf32>
    %cst_154 = arith.constant 0.000000e+00 : f32
    %135 = vector.broadcast %cst_154 : f32 to vector<64x32xf32>
    %136 = arith.maximumf %134, %135 : vector<64x32xf32>
    %c0_155 = arith.constant 0 : index
    %c0_156 = arith.constant 0 : index
    %c0_157 = arith.constant 0 : index
    %137 = vector.load %arg16[%c0_155, %c0_156, %c0_157] : memref<1x288x32xbf16, #tpu.memory_space<vmem>>, vector<1x288x32xbf16>
    %138 = vector.shape_cast %137 : vector<1x288x32xbf16> to vector<288x32xbf16>
    %139 = vector.shape_cast %136 : vector<64x32xf32> to vector<8x8x32xf32>
    %c1_158 = arith.constant 1 : index
    %c1_159 = arith.constant 1 : index
    %c0_160 = arith.constant 0 : index
    %140 = vector.load %arg19[%c1_158, %c1_159, %c0_160] : memref<10x10x32xf32, #tpu.memory_space<vmem>>, vector<8x8x32xf32>
    tpu.vector_store %arg19[%c1_158, %c1_159, %c0_160], %139 {strides = array<i32>} : memref<10x10x32xf32, #tpu.memory_space<vmem>>, vector<8x8x32xf32>,
    %c0_161 = arith.constant 0 : index
    %c0_162 = arith.constant 0 : index
    %c0_163 = arith.constant 0 : index
    %141 = vector.load %arg19[%c0_161, %c0_162, %c0_163] : memref<10x10x32xf32, #tpu.memory_space<vmem>>, vector<8x8x32xf32>
    %142 = vector.shape_cast %141 : vector<8x8x32xf32> to vector<64x32xf32>
    %c0_164 = arith.constant 0 : index
    %c1_165 = arith.constant 1 : index
    %c0_166 = arith.constant 0 : index
    %143 = vector.load %arg19[%c0_164, %c1_165, %c0_166] : memref<10x10x32xf32, #tpu.memory_space<vmem>>, vector<8x8x32xf32>
    %144 = vector.shape_cast %143 : vector<8x8x32xf32> to vector<64x32xf32>
    %c0_167 = arith.constant 0 : index
    %c2_168 = arith.constant 2 : index
    %c0_169 = arith.constant 0 : index
    %145 = vector.load %arg19[%c0_167, %c2_168, %c0_169] : memref<10x10x32xf32, #tpu.memory_space<vmem>>, vector<8x8x32xf32>
    %146 = vector.shape_cast %145 : vector<8x8x32xf32> to vector<64x32xf32>
    %c1_170 = arith.constant 1 : index
    %c0_171 = arith.constant 0 : index
    %c0_172 = arith.constant 0 : index
    %147 = vector.load %arg19[%c1_170, %c0_171, %c0_172] : memref<10x10x32xf32, #tpu.memory_space<vmem>>, vector<8x8x32xf32>
    %148 = vector.shape_cast %147 : vector<8x8x32xf32> to vector<64x32xf32>
    %c1_173 = arith.constant 1 : index
    %c1_174 = arith.constant 1 : index
    %c0_175 = arith.constant 0 : index
    %149 = vector.load %arg19[%c1_173, %c1_174, %c0_175] : memref<10x10x32xf32, #tpu.memory_space<vmem>>, vector<8x8x32xf32>
    %150 = vector.shape_cast %149 : vector<8x8x32xf32> to vector<64x32xf32>
    %c1_176 = arith.constant 1 : index
    %c2_177 = arith.constant 2 : index
    %c0_178 = arith.constant 0 : index
    %151 = vector.load %arg19[%c1_176, %c2_177, %c0_178] : memref<10x10x32xf32, #tpu.memory_space<vmem>>, vector<8x8x32xf32>
    %152 = vector.shape_cast %151 : vector<8x8x32xf32> to vector<64x32xf32>
    %c2_179 = arith.constant 2 : index
    %c0_180 = arith.constant 0 : index
    %c0_181 = arith.constant 0 : index
    %153 = vector.load %arg19[%c2_179, %c0_180, %c0_181] : memref<10x10x32xf32, #tpu.memory_space<vmem>>, vector<8x8x32xf32>
    %154 = vector.shape_cast %153 : vector<8x8x32xf32> to vector<64x32xf32>
    %c2_182 = arith.constant 2 : index
    %c1_183 = arith.constant 1 : index
    %c0_184 = arith.constant 0 : index
    %155 = vector.load %arg19[%c2_182, %c1_183, %c0_184] : memref<10x10x32xf32, #tpu.memory_space<vmem>>, vector<8x8x32xf32>
    %156 = vector.shape_cast %155 : vector<8x8x32xf32> to vector<64x32xf32>
    %c2_185 = arith.constant 2 : index
    %c2_186 = arith.constant 2 : index
    %c0_187 = arith.constant 0 : index
    %157 = vector.load %arg19[%c2_185, %c2_186, %c0_187] : memref<10x10x32xf32, #tpu.memory_space<vmem>>, vector<8x8x32xf32>
    %158 = vector.shape_cast %157 : vector<8x8x32xf32> to vector<64x32xf32>
    %159 = tpu.concatenate %142, %144, %146, %148, %150, %152, %154, %156, %158 in 1 : vector<64x32xf32>, vector<64x32xf32>, vector<64x32xf32>, vector<64x32xf32>, vector<64x32xf32>, vector<64x32xf32>, vector<64x32xf32>, vector<64x32xf32>, vector<64x32xf32> -> vector<64x288xf32>
    %160 = arith.truncf %159 : vector<64x288xf32> to vector<64x288xbf16>
    %cst_188 = arith.constant dense<0.000000e+00> : vector<64x32xf32>
    %161 = tpu.matmul %160, %138, %cst_188 {dimension_numbers = #tpu.dot_dimension_numbers<[1], [0], [0], [1], [0, 0, 1, 1], [], []>} : vector<64x288xbf16>, vector<288x32xbf16>, vector<64x32xf32> -> vector<64x32xf32>
    %162 = arith.addf %91, %161 : vector<64x32xf32>
    %c0_189 = arith.constant 0 : index
    %c0_190 = arith.constant 0 : index
    %c0_191 = arith.constant 0 : index
    %163 = vector.load %arg17[%c0_189, %c0_190, %c0_191] : memref<1x64x32xf32, #tpu.memory_space<vmem>>, vector<1x64x32xf32>
    %164 = vector.shape_cast %163 : vector<1x64x32xf32> to vector<64x32xf32>
    %165 = vector.shape_cast %162 : vector<64x32xf32> to vector<1x64x32xf32>
    tpu.vector_store %arg17[%c0_189, %c0_190, %c0_191], %165 {strides = array<i32>} : memref<1x64x32xf32, #tpu.memory_space<vmem>>, vector<1x64x32xf32>,
    return
  }
  func.func @transform_0(%arg0: i32) -> (i32, i32, i32, i32, i32) {
    %c0_i32 = arith.constant 0 : i32
    %c0_i32_0 = arith.constant 0 : i32
    %c0_i32_1 = arith.constant 0 : i32
    %c0_i32_2 = arith.constant 0 : i32
    %c0_i32_3 = arith.constant 0 : i32
    return %arg0, %c0_i32, %c0_i32_0, %c0_i32_1, %c0_i32_2 : i32, i32, i32, i32, i32
  }
  func.func @transform_1(%arg0: i32) -> (i32, i32) {
    %c0_i32 = arith.constant 0 : i32
    %c0_i32_0 = arith.constant 0 : i32
    %c0_i32_1 = arith.constant 0 : i32
    return %c0_i32, %c0_i32_0 : i32, i32
  }
  func.func @transform_2(%arg0: i32) -> (i32, i32) {
    %c0_i32 = arith.constant 0 : i32
    %c0_i32_0 = arith.constant 0 : i32
    %c0_i32_1 = arith.constant 0 : i32
    return %c0_i32, %c0_i32_0 : i32, i32
  }
  func.func @transform_3(%arg0: i32) -> (i32, i32) {
    %c0_i32 = arith.constant 0 : i32
    %c0_i32_0 = arith.constant 0 : i32
    %c0_i32_1 = arith.constant 0 : i32
    return %c0_i32, %c0_i32_0 : i32, i32
  }
  func.func @transform_4(%arg0: i32) -> (i32, i32) {
    %c0_i32 = arith.constant 0 : i32
    %c0_i32_0 = arith.constant 0 : i32
    %c0_i32_1 = arith.constant 0 : i32
    return %c0_i32, %c0_i32_0 : i32, i32
  }
  func.func @transform_5(%arg0: i32) -> (i32, i32) {
    %c0_i32 = arith.constant 0 : i32
    %c0_i32_0 = arith.constant 0 : i32
    %c0_i32_1 = arith.constant 0 : i32
    return %c0_i32, %c0_i32_0 : i32, i32
  }
  func.func @transform_6(%arg0: i32) -> (i32, i32) {
    %c0_i32 = arith.constant 0 : i32
    %c0_i32_0 = arith.constant 0 : i32
    %c0_i32_1 = arith.constant 0 : i32
    return %c0_i32, %c0_i32_0 : i32, i32
  }
  func.func @transform_7(%arg0: i32) -> (i32, i32) {
    %c0_i32 = arith.constant 0 : i32
    %c0_i32_0 = arith.constant 0 : i32
    %c0_i32_1 = arith.constant 0 : i32
    return %c0_i32, %c0_i32_0 : i32, i32
  }
  func.func @transform_8(%arg0: i32) -> (i32, i32) {
    %c0_i32 = arith.constant 0 : i32
    %c0_i32_0 = arith.constant 0 : i32
    %c0_i32_1 = arith.constant 0 : i32
    return %c0_i32, %c0_i32_0 : i32, i32
  }
  func.func @transform_9(%arg0: i32) -> (i32, i32) {
    %c0_i32 = arith.constant 0 : i32
    %c0_i32_0 = arith.constant 0 : i32
    %c0_i32_1 = arith.constant 0 : i32
    return %c0_i32, %c0_i32_0 : i32, i32
  }
  func.func @transform_10(%arg0: i32) -> (i32, i32, i32) {
    %c0_i32 = arith.constant 0 : i32
    %c0_i32_0 = arith.constant 0 : i32
    %c0_i32_1 = arith.constant 0 : i32
    %c0_i32_2 = arith.constant 0 : i32
    return %c0_i32, %c0_i32_0, %c0_i32_1 : i32, i32, i32
  }
  func.func @transform_11(%arg0: i32) -> (i32, i32, i32) {
    %c0_i32 = arith.constant 0 : i32
    %c0_i32_0 = arith.constant 0 : i32
    %c0_i32_1 = arith.constant 0 : i32
    %c0_i32_2 = arith.constant 0 : i32
    return %c0_i32, %c0_i32_0, %c0_i32_1 : i32, i32, i32
  }
  func.func @transform_12(%arg0: i32) -> (i32, i32, i32) {
    %c0_i32 = arith.constant 0 : i32
    %c0_i32_0 = arith.constant 0 : i32
    %c0_i32_1 = arith.constant 0 : i32
    %c0_i32_2 = arith.constant 0 : i32
    return %c0_i32, %c0_i32_0, %c0_i32_1 : i32, i32, i32
  }
  func.func @transform_13(%arg0: i32) -> (i32, i32, i32) {
    %c0_i32 = arith.constant 0 : i32
    %c0_i32_0 = arith.constant 0 : i32
    %c0_i32_1 = arith.constant 0 : i32
    %c0_i32_2 = arith.constant 0 : i32
    return %c0_i32, %c0_i32_0, %c0_i32_1 : i32, i32, i32
  }
  func.func @transform_14(%arg0: i32) -> (i32, i32, i32) {
    %c0_i32 = arith.constant 0 : i32
    %c0_i32_0 = arith.constant 0 : i32
    %c0_i32_1 = arith.constant 0 : i32
    %c0_i32_2 = arith.constant 0 : i32
    return %c0_i32, %c0_i32_0, %c0_i32_1 : i32, i32, i32
  }
  func.func @transform_15(%arg0: i32) -> (i32, i32, i32) {
    %c0_i32 = arith.constant 0 : i32
    %c0_i32_0 = arith.constant 0 : i32
    %c0_i32_1 = arith.constant 0 : i32
    %c0_i32_2 = arith.constant 0 : i32
    return %c0_i32, %c0_i32_0, %c0_i32_1 : i32, i32, i32
  }
  func.func @transform_16(%arg0: i32) -> (i32, i32, i32) {
    %c0_i32 = arith.constant 0 : i32
    %c0_i32_0 = arith.constant 0 : i32
    %c0_i32_1 = arith.constant 0 : i32
    return %arg0, %c0_i32, %c0_i32_0 : i32, i32, i32
  }
}

</mosaic_0001>

<bundles_post_ra>
// kernel: down_block_forward.1
= control target key start
LH: loop header
LB: loop body
LE: loop exit
PB: predicated region body
PF: predicated region fallthrough
CT: control target
= control target key end

     0   :  { %s5477_s0 = inlined_call_operand.vmem [shape: f32[2,4,8,8,4], index: 0, kind: input, shape index: {}]   ;;  %s5478_s1 = inlined_call_operand.vmem [shape: f32[1,4], index: 1, kind: input, shape index: {}]   ;;  %s5479_s2 = inlined_call_operand.vmem [shape: f32[1,4], index: 2, kind: input, shape index: {}]   ;;  %s5480_s3 = inlined_call_operand.vmem [shape: bf16[36,32], index: 3, kind: input, shape index: {}]   ;;  %s5481_s4 = inlined_call_operand.vmem [shape: f32[1,32], index: 4, kind: input, shape index: {}]   ;;  %s5482_s5 = inlined_call_operand.vmem [shape: f32[1,32], index: 5, kind: input, shape index: {}]   ;;  %s5483_s6 = inlined_call_operand.vmem [shape: bf16[288,32], index: 6, kind: input, shape index: {}]   ;;  %s5484_s7 = inlined_call_operand.vmem [shape: f32[1,4], index: 7, kind: input, shape index: {}]   ;;  %s5485_s8 = inlined_call_operand.vmem [shape: f32[1,4], index: 8, kind: input, shape index: {}]   ;;  %s5486_s9 = inlined_call_operand.vmem [shape: bf16[4,32], index: 9, kind: input, shape index: {}]   ;;  %s5487_s10 = inlined_call_operand.vmem [shape: f32[1,1,32], index: 10, kind: input, shape index: {}]   ;;  %s5488_s11 = inlined_call_operand.vmem [shape: f32[1,1,32], index: 11, kind: input, shape index: {}]   ;;  %s5489_s12 = inlined_call_operand.vmem [shape: bf16[1,288,32], index: 12, kind: input, shape index: {}]   ;;  %s5490_s13 = inlined_call_operand.vmem [shape: f32[1,1,32], index: 13, kind: input, shape index: {}]   ;;  %s5491_s14 = inlined_call_operand.vmem [shape: f32[1,1,32], index: 14, kind: input, shape index: {}]   ;;  %s5492_s15 = inlined_call_operand.vmem [shape: bf16[1,288,32], index: 15, kind: input, shape index: {}]   ;;  %s5493_s16 = inlined_call_operand.hbm [shape: f32[2,64,32], index: 16, kind: output, shape index: {}]  }
   0x1   :  { %5509 = sst [smem:[#allocation8_spill]] %s5477_s0 }
   0x2   :  { %5510 = sst [smem:[#allocation9_spill]] %s5478_s1 }
   0x3   :  { %5511 = sst [smem:[#allocation10_spill]] %s5479_s2 }
   0x4   :  { %5512 = sst [smem:[#allocation11_spill]] %s5480_s3 }
   0x5   :  { %5513 = sst [smem:[#allocation12_spill]] %s5481_s4 }
   0x6   :  { %5514 = sst [smem:[#allocation13_spill]] %s5482_s5 }
   0x7   :  { %5515 = sst [smem:[#allocation14_spill]] %s5483_s6 }
   0x8   :  { %21 = vsyncpa [#allocation5], 0 }
   0x9   :  { %23 = vsyncpa [#allocation5 + $0x1], 0  ;;  %s4222_s21 = smov 0   ;;  %s4224_s22 = smov 0  }
   0xa   :  { %s4226_s23 = smov 0   ;;  %s4228_s24 = smov 0  }
   0xb LB: > { %s4243_s25 = sadd.s32 4294967295, %s4123_s24   ;;  %s3134_s26 = sadd.s32 4294967294, %s4123_s24   ;;  %s4123_s24 = sphi %s4228_s24, %s5538_s24   ;;  %s4119_s23 = sphi %s4226_s23, %s5537_s23   ;;  %s4115_s22 = sphi %s4224_s22, %s5536_s22   ;;  %s4111_s21 = sphi %s4222_s21, %s5535_s21  }
   0xc   : > { %s4247_s27 = sadd.s32 1, %s4123_s24   ;;  %s377_s28 = sadd.s32 1, %s4119_s23 }
   0xd   : > { %s374_s29 = ssub.s32 %s4123_s24, %s4247_s27  ;;  %p387_p0 = scmp.ne.s32.totalorder %s4119_s23, %s4115_s22 }
   0xe   : > { %p375_p1 = scmp.eq.s32.totalorder %s374_s29, 0  ;;  %p388_p2 = scmp.eq.s32.totalorder %s4243_s25, 1 }
   0xf   : > { %p393_p3 = scmp.ne.s32.totalorder %s4115_s22, %s4111_s21  ;;  %p394_p4 = scmp.eq.s32.totalorder %s3134_s26, 1 }
  0x10   : > { %s4258_s30 = scalar_select %p375_p1, %s4119_s23, %s377_s28  }
  0x11   : > { %p4260_p5 = por %p388_p2, %p387_p0  ;;  %p4264_p6 = por %p394_p4, %p393_p3 }
  0x12   : > { %5516 = sst [smem:[#allocation7_spill]] %s4258_s30  ;;  %p3137_p7 = scmp.ge.s32.totalorder %s4123_s24, 1 }
  0x13   : > { %p465_p8 = scmp.lt.s32.totalorder %s4123_s24, 3 }
  0x15   : > { %p466_p9 = pnand %p3137_p7, %p465_p8 }
  0x16   : > { %p515_p10 = scmp.lt.s32.totalorder (!%p466_p9), %s4243_s25, 1  ;;  %s5519_s28 = sld [smem:[#allocation8_spill]] (!%p466_p9) }
  0x17   : > { %469 = sbr.rel (%p466_p9) target bundleno = 1321 (0x529), region = 84  ;;  %s5520_s1 = sld [smem:[#allocation9_spill]] (!%p466_p9) }
  0x18   : > { %s5521_s2 = sld [smem:[#allocation10_spill]] (!%p466_p9)  ;;  %s5498_s20 = smov (!%p466_p9), 4  }
  0x19   : > { %s5500_s26 = smov (!%p466_p9), 12   ;;  %s5496_s30 = smov (!%p466_p9), 16  }
  0x1a   : > { %s5526_s3 = sld [smem:[#allocation11_spill]] (!%p466_p9) }
  0x1b   : > { %s5527_s4 = sld [smem:[#allocation12_spill]] (!%p466_p9) }
  0x1c   : > { %vm521_vm0 = vcmask 31744   ;;  %vm523_vm1 = vcmask 25600   ;;  %v4125_v0 = vmov 0.0   ;;  %s516_s18 = scalar_select %p515_p10, %s4243_s25, 1  ;;  %vm1101_vm2 = vcmask 1041408  }
  0x1d   : > { %522 = vst.msk [vmem:[#allocation2] sm:$0xff] %vm521_vm0, %v4125_v0  ;;  %v4293_v4 = vld [vmem:[%s5520_s1] ss:$0 sm:$0xff]  ;;  %s5525_s1 = smov 12   ;;  %vm543_vm3 = vcmask 261120   ;;  %vm1007_vm4 = vcmask 64512  }
  0x1e   : > { %524 = vst.msk [vmem:[#allocation2 + $0x8] sm:$0x3] %vm523_vm1, %v4125_v0  ;;  %s3414_s19 = sshll.u32 %s516_s18, 8  ;;  %v4310_v14 = vld [vmem:[%s5521_s2] ss:$0 sm:$0xff]  ;;  %s5502_s18 = smov 8  }
  0x1f   : > { %525 = vst.msk [vmem:[#allocation2 + $0x10] sm:$0xff] %vm521_vm0, %v4125_v0  ;;  %s4283_s29 = scalar_lea.vmem %s5519_s28, %s3414_s19  ;;  %s5494_s28 = smov 20   ;;  %vm1016_vm5 = vcmask 97280   ;;  %vm1025_vm6 = vcmask 130048   ;;  %vm1034_vm7 = vcmask 162816   ;;  %vm1043_vm8 = vcmask 195584  }
  0x20   : > { %526 = vst.msk [vmem:[#allocation2 + $0x18] sm:$0x3] %vm523_vm1, %v4125_v0  ;;  %v565_v1 = vld [vmem:[%s4283_s29] sm:$0xff]  ;;  %v566_v7 = vld [vmem:[%s4283_s29 + $0x8] sm:$0xff]  ;;  %v567_v13 = vld [vmem:[%s4283_s29 + $0x10] sm:$0xff]  ;;  %s4131_s19 = smov 24  }
  0x21   : > { %527 = vst.msk [vmem:[#allocation2 + $0x20] sm:$0xff] %vm521_vm0, %v4125_v0  ;;  %v3141_v2 = vld [vmem:[%s4283_s29 + $0x40] sm:$0xff]  ;;  %v3142_v8 = vld [vmem:[%s4283_s29 + $0x48] sm:$0xff]  ;;  %v3143_v16 = vld [vmem:[%s4283_s29 + $0x50] sm:$0xff]  ;;  %vm1052_vm9 = vcmask 228352   ;;  %vm1088_vm10 = vcmask 293888  }
  0x22   : > { %v3149_v3 = vld [vmem:[%s4283_s29 + $0x80] sm:$0xff]  ;;  %528 = vst.msk [vmem:[#allocation2 + $0x28] sm:$0x3] %vm523_vm1, %v4125_v0  ;;  %v582_v5 = vmax.f32 %v565_v1, %v3141_v2  ;;  %v583_v10 = vmax.f32 %v566_v7, %v3142_v8  ;;  %v3150_v11 = vld [vmem:[%s4283_s29 + $0x88] sm:$0xff]  ;;  %v584_v18 = vmax.f32 %v567_v13, %v3143_v16  ;;  %v3151_v19 = vld [vmem:[%s4283_s29 + $0x90] sm:$0xff]  ;;  %vm545_vm11 = vcmask 254976  }
  0x23   : > { %v3157_v6 = vld [vmem:[%s4283_s29 + $0xc0] sm:$0xff]  ;;  %529 = vst.msk [vmem:[#allocation2 + $0x30] sm:$0xff] %vm521_vm0, %v4125_v0  ;;  %v3158_v12 = vld [vmem:[%s4283_s29 + $0xc8] sm:$0xff]  ;;  %v3159_v20 = vld [vmem:[%s4283_s29 + $0xd0] sm:$0xff]  ;;  %s5528_s5 = sld [smem:[#allocation13_spill]]  ;;  %vm1484_vm12 = vcmask 523264  }
  0x24   : > { %v608_v9 = vmax.f32 %v3149_v3, %v3157_v6  ;;  %530 = vst.msk [vmem:[#allocation2 + $0x38] sm:$0x3] %vm523_vm1, %v4125_v0  ;;  %v609_v15 = vmax.f32 %v3150_v11, %v3158_v12  ;;  %v568_v21 = vld [vmem:[%s4283_s29 + $0x18] sm:$0xff]  ;;  %v610_v23 = vmax.f32 %v3151_v19, %v3159_v20  ;;  %v569_v30 = vld [vmem:[%s4283_s29 + $0x20] sm:$0xff]  ;;  %v570_v56 = vld [vmem:[%s4283_s29 + $0x28] sm:$0xff]  ;;  %s5529_s6 = sld [smem:[#allocation14_spill]] }
  0x25   : > { %531 = vst.msk [vmem:[#allocation2 + $0x40] sm:$0xff] %vm521_vm0, %v4125_v0  ;;  %v3144_v24 = vld [vmem:[%s4283_s29 + $0x58] sm:$0xff]  ;;  %v3145_v31 = vld [vmem:[%s4283_s29 + $0x60] sm:$0xff]  ;;  %v3146_v57 = vld [vmem:[%s4283_s29 + $0x68] sm:$0xff]  ;;  %vm1493_vm13 = vcmask 785408  }
  0x26   : > { %v4315_v17 = vmax.f32 %v582_v5, %v608_v9  ;;  %532 = vst.msk [vmem:[#allocation2 + $0x48] sm:$0x3] %vm523_vm1, %v4125_v0  ;;  %v4324_v22 = vmax.f32 %v583_v10, %v609_v15  ;;  %v3152_v25 = vld [vmem:[%s4283_s29 + $0x98] sm:$0xff]  ;;  %v585_v28 = vmax.f32 %v568_v21, %v3144_v24  ;;  %v3153_v32 = vld [vmem:[%s4283_s29 + $0xa0] sm:$0xff]  ;;  %v4340_v34 = vmax.f32 %v584_v18, %v610_v23  ;;  %v3154_v58 = vld [vmem:[%s4283_s29 + $0xa8] sm:$0xff] }
  0x27   : > { %533 = vst.msk [vmem:[#allocation2 + $0x50] sm:$0xff] %vm521_vm0, %v4125_v0  ;;  %v3160_v26 = vld [vmem:[%s4283_s29 + $0xd8] sm:$0xff]  ;;  %v586_v35 = vmax.f32 %v569_v30, %v3145_v31  ;;  %v3161_v36 = vld [vmem:[%s4283_s29 + $0xe0] sm:$0xff]  ;;  %v587_v60 = vmax.f32 %v570_v56, %v3146_v57  ;;  %v3162_v61 = vld [vmem:[%s4283_s29 + $0xe8] sm:$0xff] }
  0x28   : > { %v629_v27 = vmul.f32 %v4293_v4, %v4315_v17  ;;  %534 = vst.msk [vmem:[#allocation2 + $0x58] sm:$0x3] %vm523_vm1, %v4125_v0  ;;  %v611_v29 = vmax.f32 %v3152_v25, %v3160_v26  ;;  %v630_v33 = vmul.f32 %v4293_v4, %v4324_v22  ;;  %v612_v39 = vmax.f32 %v3153_v32, %v3161_v36  ;;  %v678_v53 = vld [vmem:[#allocation2 + $0x1] sm:$0xff]  ;;  %v571_v12 = vld [vmem:[%s4283_s29 + $0x30] sm:$0xff]  ;;  %v3148_v36 = vld [vmem:[%s4283_s29 + $0x78] sm:$0xff] }
  0x29   : > { %535 = vst.msk [vmem:[#allocation2 + $0x60] sm:$0xff] %vm521_vm0, %v4125_v0  ;;  %v631_v41 = vmul.f32 %v4293_v4, %v4340_v34  ;;  %v686_v62 = vld [vmem:[#allocation2 + $0x2] sm:$0xff]  ;;  %v613_v63 = vmax.f32 %v3154_v58, %v3162_v61  ;;  %v3147_v13 = vld [vmem:[%s4283_s29 + $0x70] sm:$0xff] }
  0x2a   : > { %v640_v37 = vadd.f32 %v4310_v14, %v629_v27  ;;  %536 = vst.msk [vmem:[#allocation2 + $0x68] sm:$0x3] %vm523_vm1, %v4125_v0  ;;  %v4346_v38 = vmax.f32 %v585_v28, %v611_v29  ;;  %v641_v40 = vadd.f32 %v4310_v14, %v630_v33  ;;  %v4357_v44 = vmax.f32 %v586_v35, %v612_v39  ;;  %v3155_v15 = vld [vmem:[%s4283_s29 + $0xb0] sm:$0xff]  ;;  %v572_v35 = vld [vmem:[%s4283_s29 + $0x38] sm:$0xff] }
  0x2b   : > { %537 = vst.msk [vmem:[#allocation2 + $0x70] sm:$0xff] %vm521_vm0, %v4125_v0  ;;  %v642_v45 = vadd.f32 %v4310_v14, %v631_v41  ;;  %v4388_v7 = vmax.f32 %v587_v60, %v613_v63  ;;  %v588_v18 = vmax.f32 %v571_v12, %v3147_v13  ;;  %v3163_v19 = vld [vmem:[%s4283_s29 + $0xf0] sm:$0xff]  ;;  %v3164_v41 = vld [vmem:[%s4283_s29 + $0xf8] sm:$0xff] }
  0x2c   : > { %v648_v42 = vmax.f32 %v640_v37, 0.0  ;;  %538 = vst.msk [vmem:[#allocation2 + $0x78] sm:$0x3] %vm523_vm1, %v4125_v0  ;;  %v632_v43 = vmul.f32 %v4293_v4, %v4346_v38  ;;  %v649_v46 = vmax.f32 %v641_v40, 0.0  ;;  %v633_v48 = vmul.f32 %v4293_v4, %v4357_v44  ;;  %v3156_v37 = vld [vmem:[%s4283_s29 + $0xb8] sm:$0xff]  ;;  %s5523_s29 = smov 20  }
  0x2d   : > { %539 = vst.msk [vmem:[#allocation2 + $0x80] sm:$0xff] %vm521_vm0, %v4125_v0  ;;  %v650_v49 = vmax.f32 %v642_v45, 0.0  ;;  %v634_v9 = vmul.f32 %v4293_v4, %v4388_v7  ;;  %v614_v24 = vmax.f32 %v3155_v15, %v3163_v19  ;;  %v589_v40 = vmax.f32 %v572_v35, %v3148_v36 }
  0x2e   : > { %662 = vst.msk [vmem:[#allocation2 + $0x11] sm:$0xff] %vm521_vm0, %v648_v42  ;;  %v643_v47 = vadd.f32 %v4310_v14, %v632_v43  ;;  %v644_v51 = vadd.f32 %v4310_v14, %v633_v48  ;;  %v615_v45 = vmax.f32 %v3156_v37, %v3164_v41 }
  0x2f   : > { %540 = vst.msk [vmem:[#allocation2 + $0x88] sm:$0x3] %vm523_vm1, %v4125_v0  ;;  %v645_v11 = vadd.f32 %v4310_v14, %v634_v9  ;;  %v4405_v26 = vmax.f32 %v588_v18, %v614_v24 }
  0x30   : > { %541 = vst.msk [vmem:[#allocation2 + $0x90] sm:$0xff] %vm521_vm0, %v4125_v0  ;;  %v651_v50 = vmax.f32 %v643_v47, 0.0  ;;  %v652_v52 = vmax.f32 %v644_v51, 0.0  ;;  %v4425_v47 = vmax.f32 %v589_v40, %v615_v45 }
  0x31   : > { %542 = vst.msk [vmem:[#allocation2 + $0x98] sm:$0x3] %vm523_vm1, %v4125_v0  ;;  %v653_v23 = vmax.f32 %v645_v11, 0.0  ;;  %v635_v28 = vmul.f32 %v4293_v4, %v4405_v26 }
  0x32   : > { %663 = vst.msk [vmem:[#allocation2 + $0x21] sm:$0xff] %vm521_vm0, %v649_v46 }
  0x33   : > { %664 = vst.msk [vmem:[#allocation2 + $0x31] sm:$0xff] %vm521_vm0, %v650_v49  ;;  %v646_v30 = vadd.f32 %v4310_v14, %v635_v28  ;;  %v636_v49 = vmul.f32 %v4293_v4, %v4425_v47 }
  0x34   : > { %665 = vst.msk [vmem:[#allocation2 + $0x41] sm:$0xff] %vm521_vm0, %v651_v50 }
  0x35   : > { %v679_v54 = vld [vmem:[#allocation2 + $0x11] sm:$0xff]  ;;  %666 = vst.msk [vmem:[#allocation2 + $0x51] sm:$0xff] %vm521_vm0, %v652_v52  ;;  %v654_v32 = vmax.f32 %v646_v30, 0.0  ;;  %v647_v51 = vadd.f32 %v4310_v14, %v636_v49 }
  0x36   : > { %v3531_v55 = vpack.i.bf16 %v679_v54, %v678_v53  ;;  %v4380_v59 = vld [vmem:[#allocation2 + $0x10] sm:$0xff]  ;;  %667 = vst.msk [vmem:[#allocation2 + $0x61] sm:$0xff] %vm521_vm0, %v653_v23 }
  0x37   : > { %v687_v2 = vld [vmem:[#allocation2 + $0x12] sm:$0xff]  ;;  %668 = vst.msk [vmem:[#allocation2 + $0x71] sm:$0xff] %vm521_vm0, %v654_v32  ;;  %v3415_v32 = vld [vmem:[%s5526_s3] sm:$0xff] }
  0x38   : > { %3532 = vrot.lane.b32.xlu0 %v3531_v55, %s5498_s20  ;;  %v3536_v8 = vpack.i.bf16 %v687_v2, %v686_v62  ;;  %v726_v15 = vld [vmem:[#allocation2 + $0x90] sm:$0xff]  ;;  %544 = vst.msk [vmem:[#allocation3] sm:$0xff] %vm543_vm3, %v4125_v0 }
  0x39   : > { %v4384_v1 = vld [vmem:[#allocation2 + $0x20] sm:$0xff]  ;;  %v742_v23 = vld [vmem:[#allocation2 + $0x92] sm:$0xff]  ;;  %547 = vst.msk [vmem:[#allocation3 + $0x10] sm:$0xff] %vm543_vm3, %v4125_v0 }
  0x3a   : > { %v735_v3 = vld [vmem:[#allocation2 + $0x22] sm:$0xff]  ;;  %v3541_v5 = vpack.i.bf16 %v4384_v1, %v4380_v59  ;;  %v4398_v16 = vld [vmem:[#allocation2 + $0x30] sm:$0xff]  ;;  %549 = vst.msk [vmem:[#allocation3 + $0x20] sm:$0xff] %vm543_vm3, %v4125_v0 }
  0x3b   : > { %v3551_v6 = vpack.i.bf16 %v735_v3, %v687_v2  ;;  %v703_v10 = vld [vmem:[#allocation2 + $0x21] sm:$0xff]  ;;  %v3556_v21 = vpack.i.bf16 %v4398_v16, %v4384_v1  ;;  %v728_v25 = vld [vmem:[#allocation2 + $0x31] sm:$0xff]  ;;  %551 = vst.msk [vmem:[#allocation3 + $0x30] sm:$0xff] %vm543_vm3, %v4125_v0 }
  0x3c   : > { %3542 = vrot.lane.b32.xlu1 %v3541_v5, %s5500_s26  ;;  %v3546_v20 = vpack.i.bf16 %v703_v10, %v679_v54  ;;  %v3561_v27 = vpack.i.bf16 %v728_v25, %v703_v10  ;;  %v736_v29 = vld [vmem:[#allocation2 + $0x32] sm:$0xff]  ;;  %v4416_v33 = vld [vmem:[#allocation2 + $0x40] sm:$0xff]  ;;  %v655_v54 = vmax.f32 %v647_v51, 0.0  ;;  %553 = vst.msk [vmem:[#allocation3 + $0x40] sm:$0xff] %vm543_vm3, %v4125_v0 }
  0x3d   : > { %3552 = vrot.lane.b32.xlu2 %v3551_v6, %s5494_s28  ;;  %s4132_s28 = smov 28   ;;  %v3566_v31 = vpack.i.bf16 %v736_v29, %v735_v3  ;;  %v682_v39 = vld [vmem:[#allocation2 + $0x41] sm:$0xff]  ;;  %v3581_v42 = vpack.i.bf16 %v4416_v33, %v4398_v16  ;;  %v4431_v50 = vld [vmem:[#allocation2 + $0x50] sm:$0xff]  ;;  %555 = vst.msk [vmem:[#allocation3 + $0x50] sm:$0xff] %vm543_vm3, %v4125_v0 }
  0x3e   : > { %v3586_v43 = vpack.i.bf16 %v682_v39, %v728_v25  ;;  %v713_v46 = vld [vmem:[#allocation2 + $0x42] sm:$0xff]  ;;  %v683_v52 = vld [vmem:[#allocation2 + $0x51] sm:$0xff]  ;;  %v3596_v53 = vpack.i.bf16 %v4431_v50, %v4416_v33  ;;  %669 = vst.msk [vmem:[#allocation2 + $0x81] sm:$0xff] %vm521_vm0, %v655_v54 }
  0x3f   : > { %v3591_v48 = vpack.i.bf16 %v713_v46, %v736_v29  ;;  %v738_v55 = vld [vmem:[#allocation2 + $0x52] sm:$0xff]  ;;  %v3611_v56 = vpack.i.bf16 %v683_v52, %v682_v39  ;;  %v4441_v4 = vld [vmem:[#allocation2 + $0x60] sm:$0xff]  ;;  %v660_v25 = vld [vmem:[%s5526_s3 + $0x10] sm:$0x3]  ;;  %557 = vst.msk [vmem:[#allocation3 + $0x60] sm:$0xff] %vm543_vm3, %v4125_v0 }
  0x40   : > { %3537 = vrot.lane.b32.xlu0 %v3536_v8, %s5502_s18  ;;  %v3606_v57 = vpack.i.bf16 %v738_v55, %v713_v46  ;;  %v3621_v14 = vpack.i.bf16 %v4441_v4, %v4431_v50  ;;  %v707_v58 = vld [vmem:[#allocation2 + $0x61] sm:$0xff]  ;;  %v4448_v63 = vld [vmem:[#allocation2 + $0x70] sm:$0xff]  ;;  %559 = vst.msk [vmem:[#allocation3 + $0x70] sm:$0xff] %vm543_vm3, %v4125_v0 }
  0x41   : > { %v692_v60 = vld [vmem:[#allocation2 + $0x62] sm:$0xff]  ;;  %v3626_v61 = vpack.i.bf16 %v707_v58, %v683_v52  ;;  %v3636_v2 = vpack.i.bf16 %v4448_v63, %v4441_v4  ;;  %v732_v3 = vld [vmem:[#allocation2 + $0x71] sm:$0xff]  ;;  %561 = vst.msk [vmem:[#allocation3 + $0x80] sm:$0xff] %vm543_vm3, %v4125_v0 }
  0x42   : > { %v3631_v62 = vpack.i.bf16 %v692_v60, %v738_v55  ;;  %v693_v5 = vld [vmem:[#allocation2 + $0x72] sm:$0xff]  ;;  %v3641_v6 = vpack.i.bf16 %v732_v3, %v707_v58  ;;  %563 = vst.msk [vmem:[#allocation3 + $0x90] sm:$0xff] %vm543_vm3, %v4125_v0 }
  0x43   : > { %v3656_v8 = vpack.i.bf16 %v693_v5, %v692_v60  ;;  %548 = vst.msk [vmem:[#allocation3 + $0x18] sm:$0x3] %vm545_vm11, %v4125_v0 }
  0x44   : > { %3547 = vrot.lane.b32.xlu1 %v3546_v20, %s5496_s30  ;;  %s5503_s30 = smov 32   ;;  %v734_v20 = vld [vmem:[#allocation2 + $0x91] sm:$0xff]  ;;  %546 = vst.msk [vmem:[#allocation3 + $0x8] sm:$0x3] %vm545_vm11, %v4125_v0 }
  0x45   : > { %3557 = vrot.lane.b32.xlu2 %v3556_v21, %s4131_s19  ;;  %v701_v9 = vld [vmem:[#allocation2 + $0x80] sm:$0xff]  ;;  %550 = vst.msk [vmem:[#allocation3 + $0x28] sm:$0x3] %vm545_vm11, %v4125_v0 }
  0x46   : > { %v3661_v10 = vpack.i.bf16 %v701_v9, %v4448_v63  ;;  %v709_v11 = vld [vmem:[#allocation2 + $0x81] sm:$0xff]  ;;  %v3676_v19 = vpack.i.bf16 %v726_v15, %v701_v9  ;;  %552 = vst.msk [vmem:[#allocation3 + $0x38] sm:$0x3] %vm545_vm11, %v4125_v0 }
  0x47   : > { %v3666_v12 = vpack.i.bf16 %v709_v11, %v732_v3  ;;  %v717_v13 = vld [vmem:[#allocation2 + $0x82] sm:$0xff]  ;;  %v3681_v21 = vpack.i.bf16 %v734_v20, %v709_v11  ;;  %554 = vst.msk [vmem:[#allocation3 + $0x48] sm:$0x3] %vm545_vm11, %v4125_v0 }
  0x48   : > { %3562 = vrot.lane.b32.xlu0 %v3561_v27, %s4132_s28  ;;  %v3671_v18 = vpack.i.bf16 %v717_v13, %v693_v5  ;;  %v3686_v24 = vpack.i.bf16 %v742_v23, %v717_v13  ;;  %556 = vst.msk [vmem:[#allocation3 + $0x58] sm:$0x3] %vm545_vm11, %v4125_v0 }
  0x49   : > { %558 = vst.msk [vmem:[#allocation3 + $0x68] sm:$0x3] %vm545_vm11, %v4125_v0 }
  0x4a   : > { %560 = vst.msk [vmem:[#allocation3 + $0x78] sm:$0x3] %vm545_vm11, %v4125_v0 }
  0x4b   : > { %562 = vst.msk [vmem:[#allocation3 + $0x88] sm:$0x3] %vm545_vm11, %v4125_v0 }
  0x4c   : > { %3567 = vrot.lane.b32.xlu1 %v3566_v31, %s5503_s30  ;;  %564 = vst.msk [vmem:[#allocation3 + $0x98] sm:$0x3] %vm545_vm11, %v4125_v0 }
  0x4d   : > { %3572 = vrot.lane.b32.xlu2 %v3561_v27, %s5498_s20  ;;  %s5522_s20 = smov 16   ;;  %v1082_v27 = vunpack.c.l.b16 %v660_v25 }
  0x4f   : > { %v1085_v28 = vpack.c.b16 %v1082_v27, %v1082_v27 }
  0x50   : > { %3577 = vrot.lane.b32.xlu0 %v3566_v31, %s5502_s18  ;;  %v3416_v31 = vld [vmem:[%s5526_s3 + $0x8] sm:$0xff] }
  0x51   : > { %v1103_v29 = vsel %vm1101_vm2, %v1085_v28, 0 }
  0x52   : > { %1110 = vmatpush.bf16.msra.mxu0 %v1103_v29 }
  0x54   : > { %3582 = vrot.lane.b32.xlu1 %v3581_v42, %s5500_s26  ;;  %s5524_s26 = smov 4   ;;  %v670_v42 = vld [vmem:[#allocation2] sm:$0xff] }
  0x55   : > { %3587 = vrot.lane.b32.xlu2 %v3586_v43, %s5522_s20 }
  0x56   : > { %1111 = vmatpush.bf16.msra.mxu0 %v3416_v31 }
  0x58   : > { %3592 = vrot.lane.b32.xlu0 %v3591_v48, %s5523_s29 }
  0x5a   : > { %1112 = vmatpush.bf16.msra.mxu0 %v3415_v32 }
  0x5c   : > { %3597 = vrot.lane.b32.xlu1 %v3596_v53, %s4131_s19 }
  0x5d   : > { %3602 = vrot.lane.b32.xlu2 %v3611_v56, %s4132_s28 }
  0x60   : > { %3607 = vrot.lane.b32.xlu0 %v3606_v57, %s5503_s30 }
  0x64   : > { %3612 = vrot.lane.b32.xlu1 %v3611_v56, %s5524_s26 }
  0x65   : > { %3617 = vrot.lane.b32.xlu2 %v3606_v57, %s5502_s18 }
  0x68   : > { %3622 = vrot.lane.b32.xlu0 %v3621_v14, %s5525_s1 }
  0x6c   : > { %3627 = vrot.lane.b32.xlu1 %v3626_v61, %s5522_s20 }
  0x6d   : > { %3632 = vrot.lane.b32.xlu2 %v3631_v62, %s5523_s29 }
  0x70   : > { %3637 = vrot.lane.b32.xlu0 %v3636_v2, %s4131_s19 }
  0x74   : > { %3642 = vrot.lane.b32.xlu1 %v3641_v6, %s4132_s28 }
  0x75   : > { %3647 = vrot.lane.b32.xlu2 %v3656_v8, %s5503_s30 }
  0x78   : > { %3652 = vrot.lane.b32.xlu0 %v3641_v6, %s5524_s26  ;;  %s5507_s26 = smov 96  }
  0x7c   : > { %3657 = vrot.lane.b32.xlu1 %v3656_v8, %s5502_s18  ;;  %s5505_s18 = smov 64  }
  0x7d   : > { %3662 = vrot.lane.b32.xlu2 %v3661_v10, %s5525_s1  ;;  %s3471_s1 = sshll.u32 %s4243_s25, 6 }
  0x7e   : > { %s3068_s2 = scalar_lea.hbm %s5493_s16, %s3471_s1 }
  0x80   : > { %3667 = vrot.lane.b32.xlu0 %v3666_v12, %s5522_s20 }
  0x84   : > { %3672 = vrot.lane.b32.xlu1 %v3671_v18, %s5523_s29  ;;  %s5531_s29 = smov 96  }
  0x85   : > { %3677 = vrot.lane.b32.xlu2 %v3676_v19, %s4131_s19 }
  0x88   : > { %3682 = vrot.lane.b32.xlu0 %v3681_v21, %s4132_s28  ;;  %s5532_s28 = smov 64  }
  0x8c   : > { %3687 = vrot.lane.b32.xlu1 %v3686_v24, %s5503_s30  ;;  %s5530_s30 = smov 32  }
  0x97   : > { %v3553_v30 = vpop.permute.xlu2 %3552 }
  0x98   : > { %v3555_v61 = vunpack.i.h.bf16 %v3553_v30  ;;  %v3554_v62 = vunpack.i.l.bf16 %v3553_v30 }
  0x9f   : > { %v3558_v35 = vpop.permute.xlu2 %3557 }
  0xa0   : > { %v3560_v3 = vunpack.i.h.bf16 %v3558_v35  ;;  %v3559_v5 = vunpack.i.l.bf16 %v3558_v35 }
  0xa7   : > { %v3573_v37 = vpop.permute.xlu2 %3572 }
  0xa8   : > { %v3575_v23 = vunpack.i.h.bf16 %v3573_v37  ;;  %v3574_v24 = vunpack.i.l.bf16 %v3573_v37 }
  0xaa   : > { %v3533_v36 = vpop.permute.xlu0 %3532  ;;  %v1002_v35 = vsel %vm521_vm0, %v4398_v16, %v3575_v23 }
  0xab   : > { %v3535_v40 = vunpack.i.h.bf16 %v3533_v36  ;;  %v3534_v41 = vunpack.i.l.bf16 %v3533_v36  ;;  %v1001_v36 = vsel %vm521_vm0, %v4384_v1, %v3574_v24 }
  0xad   : > { %v999_v48 = vsel %vm521_vm0, %v670_v42, %v3534_v41  ;;  %v1000_v49 = vsel %vm521_vm0, %v4380_v59, %v3535_v40 }
  0xae   : > { %v3543_v39 = vpop.permute.xlu1 %3542 }
  0xaf   : > { %v3545_v51 = vunpack.i.h.bf16 %v3543_v39  ;;  %v3544_v52 = vunpack.i.l.bf16 %v3543_v39  ;;  %v3588_v60 = vpop.permute.xlu2 %3587 }
  0xb2   : > { %v3538_v43 = vpop.permute.xlu0 %3537 }
  0xb3   : > { %v3540_v45 = vunpack.i.h.bf16 %v3538_v43  ;;  %v3539_v46 = vunpack.i.l.bf16 %v3538_v43  ;;  %v3590_v43 = vunpack.i.h.bf16 %v3588_v60 }
  0xb5   : > { %v1008_v53 = vsel %vm1007_vm4, %v999_v48, %v3539_v46  ;;  %v1009_v54 = vsel %vm1007_vm4, %v1000_v49, %v3540_v45  ;;  %v3589_v45 = vunpack.i.l.bf16 %v3588_v60 }
  0xb6   : > { %v3548_v55 = vpop.permute.xlu1 %3547  ;;  %v1017_v56 = vsel %vm1016_vm5, %v1008_v53, %v3544_v52  ;;  %v1018_v57 = vsel %vm1016_vm5, %v1009_v54, %v3545_v51 }
  0xb7   : > { %v3550_v14 = vunpack.i.h.bf16 %v3548_v55  ;;  %v3549_v58 = vunpack.i.l.bf16 %v3548_v55  ;;  %v3603_v28 = vpop.permute.xlu2 %3602 }
  0xb8   : > { %v3604_v60 = vunpack.i.l.bf16 %v3603_v28 }
  0xb9   : > { %v1026_v59 = vsel %vm1025_vm6, %v1017_v56, %v3549_v58  ;;  %v1027_v2 = vsel %vm1025_vm6, %v1018_v57, %v3550_v14  ;;  %v3605_v58 = vunpack.i.h.bf16 %v3603_v28 }
  0xba   : > { %v1035_v6 = vsel %vm1034_vm7, %v1026_v59, %v3554_v62  ;;  %v1036_v8 = vsel %vm1034_vm7, %v1027_v2, %v3555_v61  ;;  %v3563_v9 = vpop.permute.xlu0 %3562 }
  0xbb   : > { %v3565_v10 = vunpack.i.h.bf16 %v3563_v9  ;;  %v3564_v11 = vunpack.i.l.bf16 %v3563_v9  ;;  %v1044_v12 = vsel %vm1043_vm8, %v1035_v6, %v3559_v5  ;;  %v1045_v13 = vsel %vm1043_vm8, %v1036_v8, %v3560_v3 }
  0xbd   : > { %v1053_v15 = vsel %vm1052_vm9, %v1044_v12, %v3564_v11  ;;  %v1054_v18 = vsel %vm1052_vm9, %v1045_v13, %v3565_v10 }
  0xbe   : > { %v3568_v19 = vpop.permute.xlu1 %3567 }
  0xbf   : > { %v3570_v20 = vunpack.i.h.bf16 %v3568_v19  ;;  %v3569_v21 = vunpack.i.l.bf16 %v3568_v19  ;;  %v3618_v52 = vpop.permute.xlu2 %3617 }
  0xc0   : > { %v3619_v19 = vunpack.i.l.bf16 %v3618_v52 }
  0xc1   : > { %v1061_v25 = vsel %vm543_vm3, %v1053_v15, %v3569_v21  ;;  %v1062_v27 = vsel %vm543_vm3, %v1054_v18, %v3570_v20  ;;  %v3620_v18 = vunpack.i.h.bf16 %v3618_v52 }
  0xc2   : > { %v1069_v29 = vpack.c.bf16 %v1062_v27, %v1061_v25  ;;  %v3578_v30 = vpop.permute.xlu0 %3577 }
  0xc3   : > { %v3580_v31 = vunpack.i.h.bf16 %v3578_v30  ;;  %v3579_v32 = vunpack.i.l.bf16 %v3578_v30 }
  0xc4   : > { %3173 = vmatmul.msk.bf16.vlgmr.msra.gmra.mxu0 %vm1088_vm10, %v1069_v29 }
  0xc5   : > { %v1011_v37 = vsel %vm1007_vm4, %v1002_v35, %v3580_v31  ;;  %v1010_v40 = vsel %vm1007_vm4, %v1001_v36, %v3579_v32 }
  0xc6   : > { %v3583_v39 = vpop.permute.xlu1 %3582 }
  0xc7   : > { %v3585_v41 = vunpack.i.h.bf16 %v3583_v39  ;;  %v3584_v42 = vunpack.i.l.bf16 %v3583_v39  ;;  %v3633_v10 = vpop.permute.xlu2 %3632 }
  0xc8   : > { %v3635_v39 = vunpack.i.h.bf16 %v3633_v10 }
  0xc9   : > { %v1019_v46 = vsel %vm1016_vm5, %v1010_v40, %v3584_v42  ;;  %v1020_v48 = vsel %vm1016_vm5, %v1011_v37, %v3585_v41  ;;  %v3634_v37 = vunpack.i.l.bf16 %v3633_v10 }
  0xca   : > { %v3593_v49 = vpop.permute.xlu0 %3592  ;;  %v1028_v1 = vsel %vm1025_vm6, %v1019_v46, %v3589_v45  ;;  %v1029_v53 = vsel %vm1025_vm6, %v1020_v48, %v3590_v43  ;;  %v1574_v46 = vld [vmem:[%s5486_s9] sm:$0x3] }
  0xcb   : > { %v3595_v16 = vunpack.i.h.bf16 %v3593_v49  ;;  %v3594_v51 = vunpack.i.l.bf16 %v3593_v49  ;;  %v4549_v48 = vld [vmem:[%s5484_s7] ss:$0 sm:$0xff]  ;;  %v1588_v52 = vsel %vm1101_vm2, %v1574_v46, 0 }
  0xcc   : > { %v4554_v49 = vld [vmem:[%s5485_s8] ss:$0 sm:$0xff]  ;;  %1597 = vmatpush.bf16.msra.mxu1 %v1588_v52 }
  0xcd   : > { %v1037_v54 = vsel %vm1034_vm7, %v1028_v1, %v3594_v51  ;;  %v1038_v55 = vsel %vm1034_vm7, %v1029_v53, %v3595_v16 }
  0xce   : > { %v3598_v56 = vpop.permute.xlu1 %3597 }
  0xcf   : > { %v3600_v57 = vunpack.i.h.bf16 %v3598_v56  ;;  %v3599_v14 = vunpack.i.l.bf16 %v3598_v56  ;;  %v3648_v36 = vpop.permute.xlu2 %3647  ;;  %v1544_v56 = vmul.f32 %v4549_v48, %v4324_v22 }
  0xd0   : > { %v3650_v43 = vunpack.i.h.bf16 %v3648_v36  ;;  %v3649_v45 = vunpack.i.l.bf16 %v3648_v36 }
  0xd1   : > { %v1046_v61 = vsel %vm1043_vm8, %v1037_v54, %v3599_v14  ;;  %v1047_v62 = vsel %vm1043_vm8, %v1038_v55, %v3600_v57  ;;  %v1543_v55 = vmul.f32 %v4549_v48, %v4315_v17 }
  0xd2   : > { %v3608_v59 = vpop.permute.xlu0 %3607  ;;  %v1055_v5 = vsel %vm1052_vm9, %v1046_v61, %v3604_v60  ;;  %v1056_v6 = vsel %vm1052_vm9, %v1047_v62, %v3605_v58  ;;  %v1555_v60 = vadd.f32 %v4554_v49, %v1544_v56 }
  0xd3   : > { %v3610_v2 = vunpack.i.h.bf16 %v3608_v59  ;;  %v3609_v3 = vunpack.i.l.bf16 %v3608_v59  ;;  %v1554_v58 = vadd.f32 %v4554_v49, %v1543_v55 }
  0xd5   : > { %v1063_v8 = vsel %vm543_vm3, %v1055_v5, %v3609_v3  ;;  %v1064_v9 = vsel %vm543_vm3, %v1056_v6, %v3610_v2  ;;  %v1562_v3 = vmax.f32 %v1554_v58, 0.0  ;;  %v1563_v5 = vmax.f32 %v1555_v60, 0.0 }
  0xd6   : > { %v3613_v11 = vpop.permute.xlu1 %3612  ;;  %v1070_v12 = vpack.c.bf16 %v1064_v9, %v1063_v8  ;;  %v1547_v58 = vmul.f32 %v4549_v48, %v4357_v44  ;;  %v1548_v60 = vmul.f32 %v4549_v48, %v4388_v7 }
  0xd7   : > { %v3615_v13 = vunpack.i.h.bf16 %v3613_v11  ;;  %v3614_v15 = vunpack.i.l.bf16 %v3613_v11  ;;  %v3663_v17 = vpop.permute.xlu2 %3662  ;;  %v1570_v10 = vpack.c.bf16 %v1563_v5, %v1562_v3  ;;  %v1550_v3 = vmul.f32 %v4549_v48, %v4425_v47  ;;  %v3434_v47 = vld [vmem:[%s5529_s6 + $0x88] sm:$0xff] }
  0xd8   : > { %3174 = vmatmul.msk.bf16.gmra.mxu0 %vm1088_vm10, %v1070_v12  ;;  %v3665_v11 = vunpack.i.h.bf16 %v3663_v17  ;;  %v1545_v12 = vmul.f32 %v4549_v48, %v4340_v34  ;;  %1803 = vmatpush.bf16.msrb.mxu1 %v3434_v47 }
  0xd9   : > { %v1004_v21 = vsel %vm521_vm0, %v4431_v50, %v3615_v13  ;;  %v1003_v23 = vsel %vm521_vm0, %v4416_v33, %v3614_v15  ;;  %3177 = vmatmul.msk.bf16.vlgmr.msra.gmra.mxu1 %vm521_vm0, %v1570_v10  ;;  %v1561_v5 = vadd.f32 %v4554_v49, %v1550_v3  ;;  %v4702_v3 = vld [vmem:[#allocation3 + $0x1] sm:$0xff] }
  0xda   : > { %v3623_v20 = vpop.permute.xlu0 %3622  ;;  %v1012_v27 = vsel %vm1007_vm4, %v1003_v23, %v3619_v19  ;;  %v1013_v28 = vsel %vm1007_vm4, %v1004_v21, %v3620_v18  ;;  %v3664_v19 = vunpack.i.l.bf16 %v3663_v17 }
  0xdb   : > { %v3625_v24 = vunpack.i.h.bf16 %v3623_v20  ;;  %v3624_v25 = vunpack.i.l.bf16 %v3623_v20  ;;  %v1546_v20 = vmul.f32 %v4549_v48, %v4346_v38 }
  0xdd   : > { %v1022_v30 = vsel %vm1016_vm5, %v1013_v28, %v3625_v24  ;;  %v1021_v31 = vsel %vm1016_vm5, %v1012_v27, %v3624_v25  ;;  %v1556_v25 = vadd.f32 %v4554_v49, %v1545_v12  ;;  %v1557_v27 = vadd.f32 %v4554_v49, %v1546_v20 }
  0xde   : > { %v3628_v29 = vpop.permute.xlu1 %3627 }
  0xdf   : > { %v3630_v32 = vunpack.i.h.bf16 %v3628_v29  ;;  %v3629_v35 = vunpack.i.l.bf16 %v3628_v29 }
  0xe1   : > { %v1030_v50 = vsel %vm1025_vm6, %v1021_v31, %v3629_v35  ;;  %v1031_v33 = vsel %vm1025_vm6, %v1022_v30, %v3630_v32  ;;  %v3678_v30 = vpop.permute.xlu2 %3677 }
  0xe2   : > { %v3638_v40 = vpop.permute.xlu0 %3637  ;;  %v1039_v16 = vsel %vm1034_vm7, %v1030_v50, %v3634_v37  ;;  %v1040_v51 = vsel %vm1034_vm7, %v1031_v33, %v3635_v39  ;;  %v3680_v35 = vunpack.i.h.bf16 %v3678_v30  ;;  %v3679_v36 = vunpack.i.l.bf16 %v3678_v30 }
  0xe3   : > { %v3640_v41 = vunpack.i.h.bf16 %v3638_v40  ;;  %v3639_v42 = vunpack.i.l.bf16 %v3638_v40  ;;  %v1564_v39 = vmax.f32 %v1556_v25, 0.0  ;;  %v1565_v37 = vmax.f32 %v1557_v27, 0.0 }
  0xe5   : > { %v1048_v1 = vsel %vm1043_vm8, %v1039_v16, %v3639_v42  ;;  %v1049_v53 = vsel %vm1043_vm8, %v1040_v51, %v3640_v41  ;;  %v1571_v46 = vpack.c.bf16 %v1565_v37, %v1564_v39 }
  0xe6   : > { %v3643_v54 = vpop.permute.xlu1 %3642 }
  0xe7   : > { %v3645_v57 = vunpack.i.h.bf16 %v3643_v54  ;;  %v3644_v14 = vunpack.i.l.bf16 %v3643_v54 }
  0xe9   : > { %v1057_v61 = vsel %vm1052_vm9, %v1048_v1, %v3644_v14  ;;  %v1058_v62 = vsel %vm1052_vm9, %v1049_v53, %v3645_v57  ;;  %3178 = vmatmul.msk.bf16.gmra.mxu1 %vm521_vm0, %v1571_v46 }
  0xea   : > { %v3653_v22 = vpop.permute.xlu0 %3652  ;;  %v1065_v59 = vsel %vm543_vm3, %v1057_v61, %v3649_v45  ;;  %v1066_v2 = vsel %vm543_vm3, %v1058_v62, %v3650_v43  ;;  %v1558_v61 = vadd.f32 %v4554_v49, %v1547_v58  ;;  %v1559_v62 = vadd.f32 %v4554_v49, %v1548_v60 }
  0xeb   : > { %v3655_v6 = vunpack.i.h.bf16 %v3653_v22  ;;  %v3654_v8 = vunpack.i.l.bf16 %v3653_v22  ;;  %v1071_v9 = vpack.c.bf16 %v1066_v2, %v1065_v59  ;;  %v1549_v2 = vmul.f32 %v4549_v48, %v4405_v26  ;;  %v4056_v26 = vld [vmem:[%s5528_s5] ss:$0 sm:$0xff]  ;;  %s512_s5 = sand.u32 1, %s4115_s22  }
  0xec   : > { %v1566_v17 = vmax.f32 %v1558_v61, 0.0  ;;  %v1567_v22 = vmax.f32 %v1559_v62, 0.0  ;;  %s3057_s25 = scalar_lea.sflag [#allocation5], %s512_s5 }
  0xed   : > { %3175 = vmatmul.msk.bf16.gmra.mxu0 %vm1088_vm10, %v1071_v9  ;;  %v1006_v13 = vsel %vm521_vm0, %v4448_v63, %v3655_v6  ;;  %v1005_v15 = vsel %vm521_vm0, %v4441_v4, %v3654_v8  ;;  %v1560_v44 = vadd.f32 %v4554_v49, %v1549_v2  ;;  %v1569_v6 = vmax.f32 %v1561_v5, 0.0  ;;  %v4055_v9 = vld [vmem:[%s5527_s4] ss:$0 sm:$0xff] }
  0xee   : > { %v3658_v18 = vpop.permute.xlu1 %3657  ;;  %v1572_v59 = vpack.c.bf16 %v1567_v22, %v1566_v17 }
  0xef   : > { %v3660_v34 = vunpack.i.h.bf16 %v3658_v18  ;;  %v3659_v21 = vunpack.i.l.bf16 %v3658_v18  ;;  %v1568_v7 = vmax.f32 %v1560_v44, 0.0 }
  0xf1   : > { %v1014_v4 = vsel %vm1007_vm4, %v1005_v15, %v3659_v21  ;;  %v1015_v63 = vsel %vm1007_vm4, %v1006_v13, %v3660_v34  ;;  %v1573_v8 = vpack.c.bf16 %v1569_v6, %v1568_v7 }
  0xf2   : > { %v1023_v23 = vsel %vm1016_vm5, %v1014_v4, %v3664_v19  ;;  %v1024_v24 = vsel %vm1016_vm5, %v1015_v63, %v3665_v11  ;;  %v3668_v38 = vpop.permute.xlu0 %3667  ;;  %v3433_v11 = vld [vmem:[%s5529_s6 + $0x80] sm:$0xff] }
  0xf3   : > { %v3670_v28 = vunpack.i.h.bf16 %v3668_v38  ;;  %v3669_v29 = vunpack.i.l.bf16 %v3668_v38  ;;  %1804 = vmatpush.bf16.msrb.mxu1 %v3433_v11 }
  0xf5   : > { %v1032_v31 = vsel %vm1025_vm6, %v1023_v23, %v3669_v29  ;;  %v1033_v0 = vsel %vm1025_vm6, %v1024_v24, %v3670_v28 }
  0xf6   : > { %v3673_v32 = vpop.permute.xlu1 %3672 }
  0xf7   : > { %v3675_v50 = vunpack.i.h.bf16 %v3673_v32  ;;  %v3674_v33 = vunpack.i.l.bf16 %v3673_v32 }
  0xf9   : > { %v1041_v40 = vsel %vm1034_vm7, %v1032_v31, %v3674_v33  ;;  %v1042_v41 = vsel %vm1034_vm7, %v1033_v0, %v3675_v50  ;;  %3179 = vmatmul.msk.bf16.gmra.mxu1 %vm521_vm0, %v1572_v59  ;;  %v4700_v59 = vld [vmem:[#allocation3 + $0x2] sm:$0xff] }
  0xfa   : > { %v1050_v42 = vsel %vm1043_vm8, %v1041_v40, %v3679_v36  ;;  %v1051_v43 = vsel %vm1043_vm8, %v1042_v41, %v3680_v35  ;;  %v3683_v45 = vpop.permute.xlu0 %3682 }
  0xfb   : > { %v3685_v16 = vunpack.i.h.bf16 %v3683_v45  ;;  %v3684_v51 = vunpack.i.l.bf16 %v3683_v45 }
  0xfd   : > { %v1059_v52 = vsel %vm1052_vm9, %v1050_v42, %v3684_v51  ;;  %v1060_v1 = vsel %vm1052_vm9, %v1051_v43, %v3685_v16 }
  0xfe   : > { %v3688_v53 = vpop.permute.xlu1 %3687 }
  0xff   : > { %v3690_v54 = vunpack.i.h.bf16 %v3688_v53  ;;  %v3689_v55 = vunpack.i.l.bf16 %v3688_v53 }
 0x101   : > { %v1067_v56 = vsel %vm543_vm3, %v1059_v52, %v3689_v55  ;;  %v1068_v57 = vsel %vm543_vm3, %v1060_v1, %v3690_v54 }
 0x102   : > { %v1072_v14 = vpack.c.bf16 %v1068_v57, %v1067_v56 }
 0x104   : > { %3176 = vmatmul.msk.bf16.gmra.mxu0 %vm1088_vm10, %v1072_v14 }
 0x109   : > { %3180 = vmatmul.msk.bf16.gmra.mxu1 %vm521_vm0, %v1573_v8 }
 0x141   : > { %v1114_v48 = vpop.f32.mrf.mxu0 }
 0x142   : > { %v1139_v10 = vmul.f32 %v4055_v9, %v1114_v48  ;;  %v4717_v48 = vld [vmem:[#allocation3 + $0x92] sm:$0xff] }
 0x144   : > { %v1150_v49 = vadd.f32 %v4056_v26, %v1139_v10 }
 0x146   : > { %v1158_v12 = vmax.f32 %v1150_v49, 0.0 }
 0x148   : > { %1203 = vst.msk [vmem:[#allocation3 + $0x11] sm:$0xff] %vm543_vm3, %v1158_v12 }
 0x149   : > { %v1116_v13 = vpop.f32.mrf.mxu0 }
 0x14a   : > { %v1140_v15 = vmul.f32 %v4055_v9, %v1116_v13 }
 0x14c   : > { %v1151_v18 = vadd.f32 %v4056_v26, %v1140_v15 }
 0x14e   : > { %v1159_v19 = vmax.f32 %v1151_v18, 0.0 }
 0x14f   : > { %v1228_v2 = vld [vmem:[#allocation3 + $0x12] sm:$0xff] }
 0x150   : > { %1204 = vst.msk [vmem:[#allocation3 + $0x21] sm:$0xff] %vm543_vm3, %v1159_v19  ;;  %v4704_v44 = vld [vmem:[#allocation3 + $0x11] sm:$0xff]  ;;  %v3721_v6 = vpack.i.bf16 %v1228_v2, %v4700_v59 }
 0x151   : > { %v4724_v12 = vld [vmem:[#allocation3 + $0x10] sm:$0xff] }
 0x155   : > { %v1119_v20 = vpop.f32.mrf.mxu0 }
 0x156   : > { %v1141_v34 = vmul.f32 %v4055_v9, %v1119_v20 }
 0x157   : > { %v4648_v25 = vld [vmem:[#allocation3 + $0x22] sm:$0xff] }
 0x158   : > { %v1152_v21 = vadd.f32 %v4056_v26, %v1141_v34  ;;  %v4719_v10 = vld [vmem:[#allocation3 + $0x20] sm:$0xff]  ;;  %v3736_v13 = vpack.i.bf16 %v4648_v25, %v1228_v2  ;;  %v3427_v2 = vld [vmem:[%s5529_s6 + $0x50] sm:$0xff] }
 0x159   : > { %v3731_v15 = vpack.i.bf16 %v4719_v10, %v4724_v12  ;;  %v4737_v20 = vld [vmem:[#allocation3 + $0x21] sm:$0xff] }
 0x15a   : > { %v1160_v4 = vmax.f32 %v1152_v21, 0.0 }
 0x15c   : > { %1205 = vst.msk [vmem:[#allocation3 + $0x31] sm:$0xff] %vm543_vm3, %v1160_v4 }
 0x15d   : > { %v1121_v63 = vpop.f32.mrf.mxu0 }
 0x15e   : > { %v1142_v23 = vmul.f32 %v4055_v9, %v1121_v63 }
 0x160   : > { %v1153_v24 = vadd.f32 %v4056_v26, %v1142_v23 }
 0x162   : > { %v1161_v38 = vmax.f32 %v1153_v24, 0.0 }
 0x163   : > { %v4650_v27 = vld [vmem:[#allocation3 + $0x32] sm:$0xff] }
 0x164   : > { %1206 = vst.msk [vmem:[#allocation3 + $0x41] sm:$0xff] %vm543_vm3, %v1161_v38  ;;  %v1528_v28 = vpack.c.bf16 %v4650_v27, %v4648_v25  ;;  %v4733_v18 = vld [vmem:[#allocation3 + $0x31] sm:$0xff]  ;;  %v3756_v19 = vpack.i.bf16 %v4650_v27, %v4648_v25 }
 0x165   : > { %v3751_v34 = vpack.i.bf16 %v4733_v18, %v4737_v20  ;;  %v3424_v25 = vld [vmem:[%s5529_s6 + $0x38] sm:$0xff] }
 0x166   : > { %3253 = vmatmul.msk.bf16.vlgmr.msrb.gmra.mxu1 %vm543_vm3, %v1528_v28  ;;  %3472 = vmatpush.bf16.msra.mxu3 %v3424_v25  ;;  %v4768_v28 = vld [vmem:[#allocation3 + $0x90] sm:$0xff] }
 0x167   : > { %1739 = vmatpush.bf16.msra.mxu2 %v3424_v25 }
 0x16a   : > { %v1124_v29 = vpop.f32.mrf.mxu0 }
 0x16b   : > { %v1143_v30 = vmul.f32 %v4055_v9, %v1124_v29  ;;  %v4657_v37 = vld [vmem:[#allocation3 + $0x42] sm:$0xff] }
 0x16c   : > { %v4661_v33 = vld [vmem:[#allocation3 + $0x41] sm:$0xff]  ;;  %v3766_v63 = vpack.i.bf16 %v4657_v37, %v4650_v27  ;;  %v3423_v27 = vld [vmem:[%s5529_s6 + $0x30] sm:$0xff] }
 0x16d   : > { %v1154_v31 = vadd.f32 %v4056_v26, %v1143_v30  ;;  %v4744_v21 = vld [vmem:[#allocation3 + $0x40] sm:$0xff]  ;;  %3473 = vmatpush.bf16.msra.mxu3 %v3423_v27  ;;  %v3422_v30 = vld [vmem:[%s5529_s6 + $0x28] sm:$0xff]  ;;  %1740 = vmatpush.bf16.msra.mxu2 %v3423_v27 }
 0x16f   : > { %v1162_v0 = vmax.f32 %v1154_v31, 0.0 }
 0x171   : > { %1207 = vst.msk [vmem:[#allocation3 + $0x51] sm:$0xff] %vm543_vm3, %v1162_v0  ;;  %3474 = vmatpush.bf16.msra.mxu3 %v3422_v30  ;;  %v3421_v0 = vld [vmem:[%s5529_s6 + $0x20] sm:$0xff]  ;;  %1741 = vmatpush.bf16.msra.mxu2 %v3422_v30 }
 0x172   : > { %v1126_v32 = vpop.f32.mrf.mxu0 }
 0x173   : > { %v1144_v35 = vmul.f32 %v4055_v9, %v1126_v32 }
 0x175   : > { %v1155_v36 = vadd.f32 %v4056_v26, %v1144_v35  ;;  %v4783_v35 = vld [vmem:[#allocation3 + $0x91] sm:$0xff]  ;;  %3475 = vmatpush.bf16.msra.mxu3 %v3421_v0  ;;  %1742 = vmatpush.bf16.msra.mxu2 %v3421_v0 }
 0x177   : > { %v1163_v39 = vmax.f32 %v1155_v36, 0.0  ;;  %v3420_v36 = vld [vmem:[%s5529_s6 + $0x18] sm:$0xff] }
 0x178   : > { %v4659_v50 = vld [vmem:[#allocation3 + $0x52] sm:$0xff] }
 0x179   : > { %v4663_v40 = vld [vmem:[#allocation3 + $0x51] sm:$0xff]  ;;  %1208 = vst.msk [vmem:[#allocation3 + $0x61] sm:$0xff] %vm543_vm3, %v1163_v39  ;;  %v1531_v41 = vpack.c.bf16 %v4659_v50, %v4657_v37  ;;  %v3696_v42 = vpack.i.bf16 %v4659_v50, %v4657_v37  ;;  %3476 = vmatpush.bf16.msra.mxu3 %v3420_v36  ;;  %1743 = vmatpush.bf16.msra.mxu2 %v3420_v36 }
 0x17a   : > { %v4672_v43 = vpack.i.bf16 %v4663_v40, %v4661_v33  ;;  %v4678_v45 = vld [vmem:[#allocation3 + $0x50] sm:$0xff] }
 0x17b   : > { %3254 = vmatmul.msk.bf16.gmra.mxu1 %vm543_vm3, %v1531_v41  ;;  %3697 = vrot.lane.b32.xlu0 %v3696_v42, %s5505_s18  ;;  %v3771_v4 = vpack.i.bf16 %v4678_v45, %v4744_v21  ;;  %v3419_v37 = vld [vmem:[%s5529_s6 + $0x10] sm:$0xff]  ;;  %v3417_v41 = vld [vmem:[%s5529_s6] sm:$0xff]  ;;  %v3432_v42 = vld [vmem:[%s5529_s6 + $0x78] sm:$0xff] }
 0x17c   : > { %3692 = vrot.lane.b32.xlu2 %v4672_v43, %s5530_s30 }
 0x17d   : > { %3477 = vmatpush.bf16.msra.mxu3 %v3419_v37  ;;  %1744 = vmatpush.bf16.msra.mxu2 %v3419_v37 }
 0x180   : > { %v4680_v46 = vld [vmem:[#allocation3 + $0x60] sm:$0xff] }
 0x181   : > { %v1129_v16 = vpop.f32.mrf.mxu0  ;;  %v3701_v51 = vpack.i.bf16 %v4680_v46, %v4678_v45  ;;  %v1280_v14 = vld [vmem:[#allocation3 + $0x62] sm:$0xff] }
 0x182   : > { %v1145_v52 = vmul.f32 %v4055_v9, %v1129_v16  ;;  %v4688_v60 = vld [vmem:[#allocation3 + $0x61] sm:$0xff]  ;;  %v3781_v38 = vpack.i.bf16 %v1280_v14, %v4659_v50 }
 0x183   : > { %3702 = vrot.lane.b32.xlu1 %v3701_v51, %s5507_s26  ;;  %v3418_v50 = vld [vmem:[%s5529_s6 + $0x8] sm:$0xff]  ;;  %v3429_v51 = vld [vmem:[%s5529_s6 + $0x60] sm:$0xff] }
 0x184   : > { %v1156_v1 = vadd.f32 %v4056_v26, %v1145_v52  ;;  %3478 = vmatpush.bf16.msra.mxu3 %v3418_v50  ;;  %1745 = vmatpush.bf16.msra.mxu2 %v3418_v50  ;;  %v3430_v16 = vld [vmem:[%s5529_s6 + $0x68] sm:$0xff]  ;;  %v4840_v50 = vld [vmem:[#allocation3] sm:$0xff] }
 0x186   : > { %v1164_v53 = vmax.f32 %v1156_v1, 0.0 }
 0x188   : > { %1209 = vst.msk [vmem:[#allocation3 + $0x71] sm:$0xff] %vm543_vm3, %v1164_v53  ;;  %3479 = vmatpush.bf16.msra.mxu3 %v3417_v41  ;;  %1746 = vmatpush.bf16.msra.mxu2 %v3417_v41 }
 0x189   : > { %v1131_v54 = vpop.f32.mrf.mxu0 }
 0x18a   : > { %v1146_v55 = vmul.f32 %v4055_v9, %v1131_v54  ;;  %v3711_v9 = vpack.i.bf16 %v4704_v44, %v4702_v3 }
 0x18c   : > { %v1157_v56 = vadd.f32 %v4056_v26, %v1146_v55  ;;  %v4715_v26 = vld [vmem:[#allocation3 + $0x30] sm:$0xff]  ;;  %1768 = vmatpush.bf16.msrb.mxu3 %v3432_v42  ;;  %v3428_v55 = vld [vmem:[%s5529_s6 + $0x58] sm:$0xff] }
 0x18d   : > { %v3741_v49 = vpack.i.bf16 %v4715_v26, %v4719_v10  ;;  %v3761_v23 = vpack.i.bf16 %v4744_v21, %v4715_v26 }
 0x18e   : > { %v1165_v57 = vmax.f32 %v1157_v56, 0.0 }
 0x18f   : > { %v4686_v58 = vld [vmem:[#allocation3 + $0x72] sm:$0xff] }
 0x190   : > { %v4690_v61 = vld [vmem:[#allocation3 + $0x71] sm:$0xff]  ;;  %1210 = vst.msk [vmem:[#allocation3 + $0x81] sm:$0xff] %vm543_vm3, %v1165_v57  ;;  %v1534_v62 = vpack.c.bf16 %v4686_v58, %v1280_v14  ;;  %v3716_v17 = vpack.i.bf16 %v4686_v58, %v1280_v14 }
 0x191   : > { %v3706_v22 = vpack.i.bf16 %v4690_v61, %v4688_v60  ;;  %v4706_v5 = vld [vmem:[#allocation3 + $0x70] sm:$0xff] }
 0x192   : > { %3255 = vmatmul.msk.bf16.gmra.mxu1 %vm543_vm3, %v1534_v62  ;;  %3717 = vrot.lane.b32.xlu0 %v3716_v17, %s5505_s18  ;;  %v3786_v24 = vpack.i.bf16 %v4706_v5, %v4680_v46 }
 0x193   : > { %3707 = vrot.lane.b32.xlu2 %v3706_v22, %s5530_s30 }
 0x197   : > { %v1242_v7 = vld [vmem:[#allocation3 + $0x80] sm:$0xff] }
 0x198   : > { %v3726_v8 = vpack.i.bf16 %v1242_v7, %v4706_v5  ;;  %v1282_v47 = vld [vmem:[#allocation3 + $0x82] sm:$0xff]  ;;  %v3801_v29 = vpack.i.bf16 %v4768_v28, %v1242_v7 }
 0x199   : > { %v1537_v11 = vpack.c.bf16 %v4717_v48, %v1282_v47  ;;  %v3796_v31 = vpack.i.bf16 %v1282_v47, %v4686_v58  ;;  %v4781_v32 = vld [vmem:[#allocation3 + $0x81] sm:$0xff] }
 0x19a   : > { %3722 = vrot.lane.b32.xlu0 %v3721_v6, %s5505_s18  ;;  %3727 = vrot.lane.b32.xlu1 %v3726_v8, %s5507_s26  ;;  %v3806_v39 = vpack.i.bf16 %v4783_v35, %v4781_v32 }
 0x19b   : > { %3712 = vrot.lane.b32.xlu2 %v3711_v9, %s5530_s30 }
 0x1a2   : > { %3742 = vrot.lane.b32.xlu0 %v3741_v49, %s5505_s18  ;;  %3256 = vmatmul.msk.bf16.gmra.mxu1 %vm543_vm3, %v1537_v11  ;;  %v3425_v49 = vld [vmem:[%s5529_s6 + $0x40] sm:$0xff] }
 0x1a3   : > { %3737 = vrot.lane.b32.xlu2 %v3736_v13, %s5530_s30  ;;  %3732 = vrot.lane.b32.xlu1 %v3731_v15, %s5507_s26 }
 0x1aa   : > { %3757 = vrot.lane.b32.xlu0 %v3756_v19, %s5505_s18 }
 0x1ab   : > { %3752 = vrot.lane.b32.xlu2 %v3751_v34, %s5530_s30  ;;  %3747 = vrot.lane.b32.xlu1 %v3751_v34, %s5507_s26 }
 0x1b2   : > { %3772 = vrot.lane.b32.xlu0 %v3771_v4, %s5505_s18 }
 0x1b3   : > { %3767 = vrot.lane.b32.xlu2 %v3766_v63, %s5530_s30  ;;  %3762 = vrot.lane.b32.xlu1 %v3761_v23, %s5507_s26 }
 0x1ba   : > { %3787 = vrot.lane.b32.xlu0 %v3786_v24, %s5505_s18 }
 0x1bb   : > { %3782 = vrot.lane.b32.xlu2 %v3781_v38, %s5530_s30  ;;  %3777 = vrot.lane.b32.xlu1 %v4672_v43, %s5507_s26  ;;  %v3431_v43 = vld [vmem:[%s5529_s6 + $0x70] sm:$0xff] }
 0x1bc   : > { %1769 = vmatpush.bf16.msrb.mxu3 %v3431_v43 }
 0x1c0   : > { %1770 = vmatpush.bf16.msrb.mxu3 %v3430_v16 }
 0x1c2   : > { %3802 = vrot.lane.b32.xlu0 %v3801_v29, %s5505_s18 }
 0x1c3   : > { %3797 = vrot.lane.b32.xlu2 %v3796_v31, %s5530_s30  ;;  %3792 = vrot.lane.b32.xlu1 %v3706_v22, %s5507_s26 }
 0x1c4   : > { %1771 = vmatpush.bf16.msrb.mxu3 %v3429_v51 }
 0x1c8   : > { %1772 = vmatpush.bf16.msrb.mxu3 %v3428_v55 }
 0x1cb   : > { %3807 = vrot.lane.b32.xlu1 %v3806_v39, %s5507_s26 }
 0x1cc   : > { %1773 = vmatpush.bf16.msrb.mxu3 %v3427_v2 }
 0x1d6   : > { %v3693_v52 = vpop.permute.xlu2 %3692 }
 0x1d7   : > { %v3695_v53 = vunpack.i.h.bf16 %v3693_v52  ;;  %v3694_v54 = vunpack.i.l.bf16 %v3693_v52 }
 0x1d9   : > { %v1480_v58 = vsel %vm543_vm3, %v4744_v21, %v3694_v54  ;;  %v1481_v62 = vsel %vm543_vm3, %v4678_v45, %v3695_v53  ;;  %v3426_v45 = vld [vmem:[%s5529_s6 + $0x48] sm:$0xff]  ;;  %s3138_s6 = sshll.u32 %s512_s5, 6 }
 0x1da   : > { %1774 = vmatpush.bf16.msrb.mxu3 %v3426_v45  ;;  %s5417_s19 = scalar_lea.vmem [#allocation4], %s3138_s6  ;;  %s4081_s6 = scalar_lea.hbm %s5493_s16, 128 }
 0x1db   : > { %s3069_s26 = sshll.u32 %s5417_s19, 4  ;;  %s3070_s26 = int_to_ptr.vmem [resolvable:$true] %s3069_s26 }
 0x1de   : > { %1775 = vmatpush.bf16.msrb.mxu3 %v3425_v49 }
 0x1ed   : > { %v3698_v1 = vpop.permute.xlu0 %3697  ;;  %v3708_v11 = vpop.permute.xlu2 %3707 }
 0x1ee   : > { %v3700_v56 = vunpack.i.h.bf16 %v3698_v1  ;;  %v3699_v57 = vunpack.i.l.bf16 %v3698_v1  ;;  %v3710_v15 = vunpack.i.h.bf16 %v3708_v11  ;;  %v3709_v19 = vunpack.i.l.bf16 %v3708_v11 }
 0x1f0   : > { %v1489_v7 = vsel %vm1484_vm12, %v1480_v58, %v3699_v57  ;;  %v1490_v6 = vsel %vm1484_vm12, %v1481_v62, %v3700_v56  ;;  %v1482_v24 = vsel %vm543_vm3, %v4680_v46, %v3709_v19  ;;  %v1483_v38 = vsel %vm543_vm3, %v4706_v5, %v3710_v15 }
 0x1f5   : > { %v3703_v14 = vpop.permute.xlu1 %3702  ;;  %v3713_v34 = vpop.permute.xlu2 %3712 }
 0x1f6   : > { %v3705_v17 = vunpack.i.h.bf16 %v3703_v14  ;;  %v3704_v22 = vunpack.i.l.bf16 %v3703_v14  ;;  %v3715_v39 = vunpack.i.h.bf16 %v3713_v34  ;;  %v3714_v37 = vunpack.i.l.bf16 %v3713_v34 }
 0x1f8   : > { %v1498_v8 = vsel %vm1493_vm13, %v1489_v7, %v3704_v22  ;;  %v1499_v9 = vsel %vm1493_vm13, %v1490_v6, %v3705_v17  ;;  %v1477_v16 = vsel %vm543_vm3, %v4724_v12, %v3715_v39  ;;  %v1476_v51 = vsel %vm543_vm3, %v4840_v50, %v3714_v37 }
 0x1f9   : > { %v1532_v47 = vpack.c.bf16 %v1499_v9, %v1498_v8 }
 0x1fb   : > { %1757 = vmatmul.bf16.vlgmr.msra.gmra.mxu3 %v1532_v47 }
 0x1fd   : > { %v3738_v46 = vpop.permute.xlu2 %3737 }
 0x1fe   : > { %v3740_v14 = vunpack.i.h.bf16 %v3738_v46  ;;  %v3739_v58 = vunpack.i.l.bf16 %v3738_v46 }
 0x200   : > { %v1503_v2 = vsel %vm543_vm3, %v4737_v20, %v3740_v14  ;;  %v1502_v7 = vsel %vm543_vm3, %v4704_v44, %v3739_v58 }
 0x204   : > { %v3718_v13 = vpop.permute.xlu0 %3717 }
 0x205   : > { %v3720_v21 = vunpack.i.h.bf16 %v3718_v13  ;;  %v3719_v4 = vunpack.i.l.bf16 %v3718_v13  ;;  %v3753_v12 = vpop.permute.xlu2 %3752 }
 0x206   : > { %v3755_v15 = vunpack.i.h.bf16 %v3753_v12  ;;  %v3754_v19 = vunpack.i.l.bf16 %v3753_v12 }
 0x207   : > { %v1491_v29 = vsel %vm1484_vm12, %v1482_v24, %v3719_v4  ;;  %v1492_v30 = vsel %vm1484_vm12, %v1483_v38, %v3720_v21 }
 0x208   : > { %v1479_v44 = vsel %vm543_vm3, %v4715_v26, %v3755_v15  ;;  %v1478_v4 = vsel %vm543_vm3, %v4719_v10, %v3754_v19 }
 0x20c   : > { %v3723_v63 = vpop.permute.xlu0 %3722  ;;  %v3728_v23 = vpop.permute.xlu1 %3727 }
 0x20d   : > { %v3730_v25 = vunpack.i.h.bf16 %v3728_v23  ;;  %v3729_v27 = vunpack.i.l.bf16 %v3728_v23  ;;  %v3725_v41 = vunpack.i.h.bf16 %v3723_v63  ;;  %v3724_v42 = vunpack.i.l.bf16 %v3723_v63  ;;  %v3768_v24 = vpop.permute.xlu2 %3767 }
 0x20f   : > { %v1500_v31 = vsel %vm1493_vm13, %v1491_v29, %v3729_v27  ;;  %v1501_v0 = vsel %vm1493_vm13, %v1492_v30, %v3730_v25  ;;  %v1485_v53 = vsel %vm1484_vm12, %v1476_v51, %v3724_v42  ;;  %v1486_v54 = vsel %vm1484_vm12, %v1477_v16, %v3725_v41 }
 0x210   : > { %v1535_v36 = vpack.c.bf16 %v1501_v0, %v1500_v31  ;;  %v3770_v0 = vunpack.i.h.bf16 %v3768_v24 }
 0x212   : > { %1762 = vmatmul.bf16.gmra.mxu3 %v1535_v36  ;;  %v3769_v36 = vunpack.i.l.bf16 %v3768_v24  ;;  %v1505_v10 = vsel %vm543_vm3, %v4661_v33, %v3770_v0 }
 0x214   : > { %v3743_v5 = vpop.permute.xlu0 %3742  ;;  %v1504_v46 = vsel %vm543_vm3, %v4733_v18, %v3769_v36 }
 0x215   : > { %v3733_v43 = vpop.permute.xlu1 %3732  ;;  %v3745_v62 = vunpack.i.h.bf16 %v3743_v5  ;;  %v3744_v17 = vunpack.i.l.bf16 %v3743_v5 }
 0x216   : > { %v3735_v52 = vunpack.i.h.bf16 %v3733_v43  ;;  %v3734_v1 = vunpack.i.l.bf16 %v3733_v43 }
 0x217   : > { %v1510_v47 = vsel %vm1484_vm12, %v1502_v7, %v3744_v17  ;;  %v1511_v45 = vsel %vm1484_vm12, %v1503_v2, %v3745_v62 }
 0x218   : > { %v1494_v55 = vsel %vm1493_vm13, %v1485_v53, %v3734_v1  ;;  %v1495_v56 = vsel %vm1493_vm13, %v1486_v54, %v3735_v52  ;;  %v3783_v1 = vpop.permute.xlu2 %3782 }
 0x219   : > { %v1526_v57 = vpack.c.bf16 %v1495_v56, %v1494_v55  ;;  %v3785_v55 = vunpack.i.h.bf16 %v3783_v1  ;;  %v3784_v33 = vunpack.i.l.bf16 %v3783_v1 }
 0x21b   : > { %1747 = vmatmul.bf16.vlgmr.msra.gmra.mxu2 %v1526_v57  ;;  %v1507_v58 = vsel %vm543_vm3, %v4688_v60, %v3785_v55  ;;  %v1506_v62 = vsel %vm543_vm3, %v4663_v40, %v3784_v33 }
 0x21c   : > { %v3758_v6 = vpop.permute.xlu0 %3757 }
 0x21d   : > { %v3748_v22 = vpop.permute.xlu1 %3747  ;;  %v3760_v34 = vunpack.i.h.bf16 %v3758_v6  ;;  %v3759_v21 = vunpack.i.l.bf16 %v3758_v6 }
 0x21e   : > { %v3750_v8 = vunpack.i.h.bf16 %v3748_v22  ;;  %v3749_v9 = vunpack.i.l.bf16 %v3748_v22 }
 0x21f   : > { %v1487_v38 = vsel %vm1484_vm12, %v1478_v4, %v3759_v21  ;;  %v1488_v25 = vsel %vm1484_vm12, %v1479_v44, %v3760_v34  ;;  %v1599_v21 = vpop.f32.mrf.mxu1 }
 0x220   : > { %v1518_v49 = vsel %vm1493_vm13, %v1510_v47, %v3749_v9  ;;  %v1519_v11 = vsel %vm1493_vm13, %v1511_v45, %v3750_v8  ;;  %v3798_v6 = vpop.permute.xlu2 %3797 }
 0x221   : > { %v1527_v13 = vpack.c.bf16 %v1519_v11, %v1518_v49  ;;  %v3800_v47 = vunpack.i.h.bf16 %v3798_v6  ;;  %v3799_v45 = vunpack.i.l.bf16 %v3798_v6 }
 0x223   : > { %1776 = vmatmul.bf16.vlgmr.msrb.gmra.mxu3 %v1527_v13  ;;  %v1508_v40 = vsel %vm543_vm3, %v4690_v61, %v3799_v45  ;;  %v1509_v15 = vsel %vm543_vm3, %v4781_v32, %v3800_v47 }
 0x224   : > { %v3773_v27 = vpop.permute.xlu0 %3772 }
 0x225   : > { %v3763_v20 = vpop.permute.xlu1 %3762  ;;  %v3775_v39 = vunpack.i.h.bf16 %v3773_v27  ;;  %v3774_v26 = vunpack.i.l.bf16 %v3773_v27 }
 0x226   : > { %v3765_v63 = vunpack.i.h.bf16 %v3763_v20  ;;  %v3764_v23 = vunpack.i.l.bf16 %v3763_v20 }
 0x227   : > { %v1512_v5 = vsel %vm1484_vm12, %v1504_v46, %v3774_v26  ;;  %v1513_v43 = vsel %vm1484_vm12, %v1505_v10, %v3775_v39  ;;  %v3452_v39 = vld [vmem:[%s5489_s12 + $0x88] sm:$0xff]  ;;  %v3451_v46 = vld [vmem:[%s5489_s12 + $0x80] sm:$0xff] }
 0x228   : > { %v1496_v29 = vsel %vm1493_vm13, %v1487_v38, %v3764_v23  ;;  %v1497_v30 = vsel %vm1493_vm13, %v1488_v25, %v3765_v63  ;;  %v1601_v63 = vpop.f32.mrf.mxu1  ;;  %2410 = vmatpush.bf16.msra.mxu3 %v3452_v39 }
 0x229   : > { %v1529_v31 = vpack.c.bf16 %v1497_v30, %v1496_v29 }
 0x22b   : > { %1752 = vmatmul.bf16.gmra.mxu2 %v1529_v31 }
 0x22c   : > { %v3788_v53 = vpop.permute.xlu0 %3787  ;;  %2411 = vmatpush.bf16.msra.mxu3 %v3451_v46 }
 0x22d   : > { %v3778_v37 = vpop.permute.xlu1 %3777  ;;  %v3790_v56 = vunpack.i.h.bf16 %v3788_v53  ;;  %v3789_v57 = vunpack.i.l.bf16 %v3788_v53 }
 0x22e   : > { %v3780_v41 = vunpack.i.h.bf16 %v3778_v37  ;;  %v3779_v42 = vunpack.i.l.bf16 %v3778_v37 }
 0x22f   : > { %v1514_v17 = vsel %vm1484_vm12, %v1506_v62, %v3789_v57  ;;  %v1515_v12 = vsel %vm1484_vm12, %v1507_v58, %v3790_v56 }
 0x230   : > { %v1520_v16 = vsel %vm1493_vm13, %v1512_v5, %v3779_v42  ;;  %v1521_v51 = vsel %vm1493_vm13, %v1513_v43, %v3780_v41  ;;  %v1604_v23 = vpop.f32.mrf.mxu1  ;;  %v4911_v42 = vld [vmem:[%s5487_s10] ss:$0 sm:$0xff] }
 0x231   : > { %v1530_v52 = vpack.c.bf16 %v1521_v51, %v1520_v16  ;;  %v4918_v16 = vld [vmem:[%s5488_s11] ss:$0 sm:$0xff] }
 0x233   : > { %1781 = vmatmul.bf16.gmra.mxu3 %v1530_v52 }
 0x234   : > { %v3803_v8 = vpop.permute.xlu0 %3802 }
 0x235   : > { %v3793_v54 = vpop.permute.xlu1 %3792  ;;  %v3805_v49 = vunpack.i.h.bf16 %v3803_v8  ;;  %v3804_v60 = vunpack.i.l.bf16 %v3803_v8 }
 0x236   : > { %v3795_v18 = vunpack.i.h.bf16 %v3793_v54  ;;  %v3794_v14 = vunpack.i.l.bf16 %v3793_v54 }
 0x237   : > { %v1516_v19 = vsel %vm1484_vm12, %v1508_v40, %v3804_v60  ;;  %v1517_v34 = vsel %vm1484_vm12, %v1509_v15, %v3805_v49 }
 0x238   : > { %v1522_v22 = vsel %vm1493_vm13, %v1514_v17, %v3794_v14  ;;  %v1523_v2 = vsel %vm1493_vm13, %v1515_v12, %v3795_v18  ;;  %v1606_v24 = vpop.f32.mrf.mxu1 }
 0x239   : > { %v1533_v7 = vpack.c.bf16 %v1523_v2, %v1522_v22 }
 0x23d   : > { %v3808_v9 = vpop.permute.xlu1 %3807 }
 0x23e   : > { %v3810_v11 = vunpack.i.h.bf16 %v3808_v9  ;;  %v3809_v13 = vunpack.i.l.bf16 %v3808_v9 }
 0x240   : > { %v1524_v20 = vsel %vm1493_vm13, %v1516_v19, %v3809_v13  ;;  %v1525_v44 = vsel %vm1493_vm13, %v1517_v34, %v3810_v11  ;;  %v1609_v38 = vpop.f32.mrf.mxu1 }
 0x241   : > { %v1536_v4 = vpack.c.bf16 %v1525_v44, %v1524_v20 }
 0x243   : > { %1786 = vmatmul.bf16.gmra.mxu3 %v1533_v7 }
 0x248   : > { %v4890_v25 = vpop.f32.mrf.mxu1 }
 0x250   : > { %v4892_v27 = vpop.f32.mrf.mxu1 }
 0x253   : > { %1791 = vmatmul.bf16.gmra.mxu3 %v1536_v4 }
 0x258   : > { %v4896_v29 = vpop.f32.mrf.mxu1 }
 0x260   : > { %v1806_v0 = vpop.f32.mrf.mxu1 }
 0x268   : > { %v1808_v5 = vpop.f32.mrf.mxu1 }
 0x270   : > { %v1811_v33 = vpop.f32.mrf.mxu1 }
 0x278   : > { %v1813_v2 = vpop.f32.mrf.mxu1 }
 0x27e   : > { %v1758_v61 = vpop.f32.mrf.mxu3 }
 0x27f   : > { %v1759_v34 = vadd.f32 %v1758_v61, %v1609_v38 }
 0x280   : > { %v1816_v15 = vpop.f32.mrf.mxu1 }
 0x286   : > { %v4894_v32 = vpop.f32.mrf.mxu3 }
 0x295   : > { %v4898_v30 = vpop.f32.mrf.mxu3 }
 0x29d   : > { %v4900_v31 = vpop.f32.mrf.mxu3 }
 0x29e   : > { %v1748_v36 = vpop.f32.mrf.mxu2 }
 0x29f   : > { %v1749_v26 = vadd.f32 %v1748_v36, %v1599_v21 }
 0x2a6   : > { %v1750_v37 = vpop.f32.mrf.mxu2  ;;  %v1777_v10 = vpop.f32.mrf.mxu3 }
 0x2a7   : > { %v1778_v41 = vadd.f32 %v1777_v10, %v1749_v26  ;;  %v1751_v52 = vadd.f32 %v1750_v37, %v1601_v63 }
 0x2a9   : > { %v4913_v43 = vadd.f32 %v1806_v0, %v1778_v41  ;;  %v1818_v41 = vpop.f32.mrf.mxu1 }
 0x2ab   : > { %v1831_v51 = vmul.f32 %v4911_v42, %v4913_v43 }
 0x2ad   : > { %v1842_v1 = vadd.f32 %v4918_v16, %v1831_v51 }
 0x2ae   : > { %v1779_v53 = vpop.f32.mrf.mxu3  ;;  %v1753_v56 = vpop.f32.mrf.mxu2 }
 0x2af   : > { %v1850_v54 = vmax.f32 %v1842_v1, 0.0  ;;  %v1780_v55 = vadd.f32 %v1779_v53, %v1751_v52  ;;  %v1754_v14 = vadd.f32 %v1753_v56, %v1604_v23 }
 0x2b1   : > { %1894 = vst.msk [vmem:[#allocation3 + $0x11] sm:$0xff] %vm543_vm3, %v1850_v54  ;;  %v4924_v57 = vadd.f32 %v1808_v5, %v1780_v55  ;;  %v1761_v5 = vadd.f32 %v4894_v32, %v4890_v25 }
 0x2b3   : > { %v1832_v18 = vmul.f32 %v4911_v42, %v4924_v57 }
 0x2b5   : > { %v1843_v58 = vadd.f32 %v4918_v16, %v1832_v18  ;;  %v1764_v18 = vadd.f32 %v4898_v30, %v4892_v27 }
 0x2b6   : > { %v1782_v62 = vpop.f32.mrf.mxu3  ;;  %v1755_v7 = vpop.f32.mrf.mxu2 }
 0x2b7   : > { %v1851_v17 = vmax.f32 %v1843_v58, 0.0  ;;  %v1783_v12 = vadd.f32 %v1782_v62, %v1754_v14  ;;  %v1756_v8 = vadd.f32 %v1755_v7, %v1606_v24  ;;  %v1821_v58 = vpop.f32.mrf.mxu1 }
 0x2b8   : > { %v1942_v60 = vld [vmem:[#allocation3 + $0x12] sm:$0xff] }
 0x2b9   : > { %1895 = vst.msk [vmem:[#allocation3 + $0x21] sm:$0xff] %vm543_vm3, %v1851_v17  ;;  %v4930_v22 = vadd.f32 %v1811_v33, %v1783_v12  ;;  %v4949_v24 = vld [vmem:[#allocation3 + $0x11] sm:$0xff]  ;;  %v3826_v25 = vpack.i.bf16 %v1942_v60, %v4700_v59 }
 0x2ba   : > { %v3816_v10 = vpack.i.bf16 %v4949_v24, %v4702_v3  ;;  %v4977_v53 = vld [vmem:[#allocation3 + $0x10] sm:$0xff] }
 0x2bb   : > { %v1833_v6 = vmul.f32 %v4911_v42, %v4930_v22 }
 0x2bd   : > { %v1844_v9 = vadd.f32 %v4918_v16, %v1833_v6 }
 0x2be   : > { %v1784_v47 = vpop.f32.mrf.mxu3 }
 0x2bf   : > { %v1852_v45 = vmax.f32 %v1844_v9, 0.0  ;;  %v1785_v49 = vadd.f32 %v1784_v47, %v1756_v8 }
 0x2c0   : > { %v4935_v11 = vld [vmem:[#allocation3 + $0x22] sm:$0xff] }
 0x2c1   : > { %1896 = vst.msk [vmem:[#allocation3 + $0x31] sm:$0xff] %vm543_vm3, %v1852_v45  ;;  %v4938_v13 = vadd.f32 %v1813_v2, %v1785_v49  ;;  %v3811_v40 = vpack.i.bf16 %v4935_v11, %v1942_v60  ;;  %v4945_v63 = vld [vmem:[#allocation3 + $0x21] sm:$0xff]  ;;  %v1766_v49 = vadd.f32 %v4900_v31, %v4896_v29  ;;  %v3442_v31 = vld [vmem:[%s5489_s12 + $0x38] sm:$0xff] }
 0x2c2   : > { %v4947_v23 = vld [vmem:[#allocation3 + $0x20] sm:$0xff]  ;;  %2346 = vmatpush.bf16.msrb.mxu0 %v3442_v31 }
 0x2c3   : > { %v1834_v19 = vmul.f32 %v4911_v42, %v4938_v13  ;;  %3812 = vrot.lane.b32.xlu2 %v3811_v40, %s5530_s30  ;;  %v3836_v33 = vpack.i.bf16 %v4947_v23, %v4977_v53 }
 0x2c5   : > { %v1845_v21 = vadd.f32 %v4918_v16, %v1834_v19 }
 0x2c6   : > { %v1787_v20 = vpop.f32.mrf.mxu3 }
 0x2c7   : > { %v1853_v44 = vmax.f32 %v1845_v21, 0.0  ;;  %v1788_v4 = vadd.f32 %v1787_v20, %v1759_v34  ;;  %v1823_v34 = vpop.f32.mrf.mxu1 }
 0x2c8   : > { %v4951_v0 = vld [vmem:[#allocation3 + $0x32] sm:$0xff] }
 0x2c9   : > { %v4953_v36 = vld [vmem:[#allocation3 + $0x31] sm:$0xff]  ;;  %1897 = vst.msk [vmem:[#allocation3 + $0x41] sm:$0xff] %vm543_vm3, %v1853_v44  ;;  %v4958_v38 = vadd.f32 %v1816_v15, %v1788_v4  ;;  %v2216_v61 = vpack.c.bf16 %v4951_v0, %v4935_v11 }
 0x2ca   : > { %v4955_v39 = vld [vmem:[#allocation3 + $0x30] sm:$0xff]  ;;  %v3831_v26 = vpack.i.bf16 %v4953_v36, %v4945_v63 }
 0x2cb   : > { %v3821_v37 = vpack.i.bf16 %v4955_v39, %v4947_v23  ;;  %v1835_v46 = vmul.f32 %v4911_v42, %v4958_v38  ;;  %3329 = vmatmul.msk.bf16.vlgmr.msra.gmra.mxu3 %vm543_vm3, %v2216_v61  ;;  %3817 = vrot.lane.b32.xlu2 %v3816_v10, %s5530_s30  ;;  %v3856_v61 = vpack.i.bf16 %v4951_v0, %v4935_v11  ;;  %v3441_v11 = vld [vmem:[%s5489_s12 + $0x30] sm:$0xff] }
 0x2cc   : > { %3832 = vrot.lane.b32.xlu1 %v3831_v26, %s5531_s29  ;;  %2347 = vmatpush.bf16.msrb.mxu0 %v3441_v11 }
 0x2cd   : > { %3822 = vrot.lane.b32.xlu0 %v3821_v37, %s5532_s28  ;;  %v1846_v51 = vadd.f32 %v4918_v16, %v1835_v46 }
 0x2ce   : > { %v1789_v52 = vpop.f32.mrf.mxu3 }
 0x2cf   : > { %v1854_v1 = vmax.f32 %v1846_v51, 0.0  ;;  %v1790_v3 = vadd.f32 %v1789_v52, %v1761_v5  ;;  %v3440_v52 = vld [vmem:[%s5489_s12 + $0x28] sm:$0xff] }
 0x2d0   : > { %v4979_v54 = vld [vmem:[#allocation3 + $0x42] sm:$0xff]  ;;  %2348 = vmatpush.bf16.msrb.mxu0 %v3440_v52 }
 0x2d1   : > { %1898 = vst.msk [vmem:[#allocation3 + $0x51] sm:$0xff] %vm543_vm3, %v1854_v1  ;;  %v4982_v55 = vadd.f32 %v1818_v41, %v1790_v3  ;;  %v3841_v56 = vpack.i.bf16 %v4979_v54, %v4951_v0  ;;  %v4997_v2 = vld [vmem:[#allocation3 + $0x41] sm:$0xff] }
 0x2d2   : > { %v4999_v59 = vld [vmem:[#allocation3 + $0x40] sm:$0xff] }
 0x2d3   : > { %v1836_v32 = vmul.f32 %v4911_v42, %v4982_v55  ;;  %3842 = vrot.lane.b32.xlu2 %v3841_v56, %s5530_s30  ;;  %v3866_v44 = vpack.i.bf16 %v4999_v59, %v4955_v39 }
 0x2d4   : > { %3837 = vrot.lane.b32.xlu1 %v3836_v33, %s5531_s29 }
 0x2d5   : > { %3827 = vrot.lane.b32.xlu0 %v3826_v25, %s5532_s28  ;;  %v1847_v14 = vadd.f32 %v4918_v16, %v1836_v32 }
 0x2d6   : > { %v1792_v62 = vpop.f32.mrf.mxu3 }
 0x2d7   : > { %v1855_v17 = vmax.f32 %v1847_v14, 0.0  ;;  %v1793_v12 = vadd.f32 %v1792_v62, %v1764_v18 }
 0x2d8   : > { %v1969_v7 = vld [vmem:[#allocation3 + $0x52] sm:$0xff] }
 0x2d9   : > { %v5001_v6 = vld [vmem:[#allocation3 + $0x51] sm:$0xff]  ;;  %1899 = vst.msk [vmem:[#allocation3 + $0x61] sm:$0xff] %vm543_vm3, %v1855_v17  ;;  %v5006_v9 = vadd.f32 %v1821_v58, %v1793_v12  ;;  %v2219_v27 = vpack.c.bf16 %v1969_v7, %v4979_v54  ;;  %v3886_v56 = vpack.i.bf16 %v1969_v7, %v4979_v54  ;;  %v3439_v54 = vld [vmem:[%s5489_s12 + $0x20] sm:$0xff]  ;;  %v3448_v12 = vld [vmem:[%s5489_s12 + $0x68] sm:$0xff] }
 0x2da   : > { %v5003_v8 = vld [vmem:[#allocation3 + $0x50] sm:$0xff]  ;;  %v3861_v30 = vpack.i.bf16 %v5001_v6, %v4997_v2  ;;  %2349 = vmatpush.bf16.msrb.mxu0 %v3439_v54  ;;  %v3438_v17 = vld [vmem:[%s5489_s12 + $0x18] sm:$0xff] }
 0x2db   : > { %v3851_v47 = vpack.i.bf16 %v5003_v8, %v4999_v59  ;;  %v1837_v45 = vmul.f32 %v4911_v42, %v5006_v9  ;;  %3330 = vmatmul.msk.bf16.gmra.mxu3 %vm543_vm3, %v2219_v27  ;;  %3847 = vrot.lane.b32.xlu2 %v3831_v26, %s5530_s30  ;;  %v3437_v27 = vld [vmem:[%s5489_s12 + $0x10] sm:$0xff] }
 0x2dc   : > { %3862 = vrot.lane.b32.xlu1 %v3861_v30, %s5531_s29 }
 0x2dd   : > { %3852 = vrot.lane.b32.xlu0 %v3851_v47, %s5532_s28  ;;  %v1848_v60 = vadd.f32 %v4918_v16, %v1837_v45  ;;  %v3445_v47 = vld [vmem:[%s5489_s12 + $0x50] sm:$0xff]  ;;  %v3436_v45 = vld [vmem:[%s5489_s12 + $0x8] sm:$0xff] }
 0x2de   : > { %v1794_v40 = vpop.f32.mrf.mxu3  ;;  %2350 = vmatpush.bf16.msrb.mxu0 %v3438_v17 }
 0x2df   : > { %v1856_v15 = vmax.f32 %v1848_v60, 0.0  ;;  %v1795_v19 = vadd.f32 %v1794_v40, %v1766_v49  ;;  %v3444_v49 = vld [vmem:[%s5489_s12 + $0x48] sm:$0xff]  ;;  %v3443_v60 = vld [vmem:[%s5489_s12 + $0x40] sm:$0xff] }
 0x2e0   : > { %v1947_v21 = vld [vmem:[#allocation3 + $0x62] sm:$0xff] }
 0x2e1   : > { %1900 = vst.msk [vmem:[#allocation3 + $0x71] sm:$0xff] %vm543_vm3, %v1856_v15  ;;  %v5023_v20 = vadd.f32 %v1823_v34, %v1795_v19  ;;  %v3871_v4 = vpack.i.bf16 %v1947_v21, %v1969_v7  ;;  %v5041_v37 = vld [vmem:[#allocation3 + $0x61] sm:$0xff] }
 0x2e2   : > { %v3447_v7 = vld [vmem:[%s5489_s12 + $0x60] sm:$0xff]  ;;  %2351 = vmatpush.bf16.msrb.mxu0 %v3437_v27 }
 0x2e3   : > { %v1838_v29 = vmul.f32 %v4911_v42, %v5023_v20  ;;  %3872 = vrot.lane.b32.xlu2 %v3871_v4, %s5530_s30  ;;  %v5043_v42 = vld [vmem:[#allocation3 + $0x60] sm:$0xff] }
 0x2e4   : > { %3867 = vrot.lane.b32.xlu1 %v3866_v44, %s5531_s29  ;;  %v3896_v3 = vpack.i.bf16 %v5043_v42, %v5003_v8  ;;  %v3435_v40 = vld [vmem:[%s5489_s12] sm:$0xff] }
 0x2e5   : > { %3857 = vrot.lane.b32.xlu0 %v3856_v61, %s5532_s28  ;;  %v1849_v26 = vadd.f32 %v4918_v16, %v1838_v29 }
 0x2e6   : > { %2352 = vmatpush.bf16.msrb.mxu0 %v3436_v45 }
 0x2e7   : > { %v1857_v0 = vmax.f32 %v1849_v26, 0.0 }
 0x2e8   : > { %v1971_v10 = vld [vmem:[#allocation3 + $0x72] sm:$0xff] }
 0x2e9   : > { %v5045_v46 = vld [vmem:[#allocation3 + $0x71] sm:$0xff]  ;;  %1901 = vst.msk [vmem:[#allocation3 + $0x81] sm:$0xff] %vm543_vm3, %v1857_v0  ;;  %v2222_v5 = vpack.c.bf16 %v1971_v10, %v1947_v21  ;;  %v3916_v62 = vpack.i.bf16 %v1971_v10, %v1947_v21 }
 0x2ea   : > { %v5047_v41 = vld [vmem:[#allocation3 + $0x70] sm:$0xff]  ;;  %v3891_v16 = vpack.i.bf16 %v5045_v46, %v5041_v37  ;;  %2353 = vmatpush.bf16.msrb.mxu0 %v3435_v40 }
 0x2eb   : > { %v3881_v51 = vpack.i.bf16 %v5047_v41, %v5043_v42  ;;  %3331 = vmatmul.msk.bf16.gmra.mxu3 %vm543_vm3, %v2222_v5  ;;  %3877 = vrot.lane.b32.xlu2 %v3861_v30, %s5530_s30  ;;  %v3446_v30 = vld [vmem:[%s5489_s12 + $0x58] sm:$0xff] }
 0x2ec   : > { %3892 = vrot.lane.b32.xlu1 %v3891_v16, %s5531_s29 }
 0x2ed   : > { %3882 = vrot.lane.b32.xlu0 %v3881_v51, %s5532_s28 }
 0x2f0   : > { %v1949_v1 = vld [vmem:[#allocation3 + $0x82] sm:$0xff] }
 0x2f1   : > { %v3901_v33 = vpack.i.bf16 %v1949_v1, %v1971_v10  ;;  %v5067_v25 = vld [vmem:[#allocation3 + $0x81] sm:$0xff]  ;;  %v2225_v18 = vpack.c.bf16 %v4717_v48, %v1949_v1  ;;  %v3450_v48 = vld [vmem:[%s5489_s12 + $0x78] sm:$0xff] }
 0x2f2   : > { %v1956_v32 = vld [vmem:[#allocation3 + $0x80] sm:$0xff]  ;;  %v3921_v14 = vpack.i.bf16 %v4783_v35, %v5067_v25  ;;  %2375 = vmatpush.bf16.msrb.mxu2 %v3450_v48 }
 0x2f3   : > { %3902 = vrot.lane.b32.xlu2 %v3901_v33, %s5530_s30  ;;  %v3911_v58 = vpack.i.bf16 %v4768_v28, %v1956_v32  ;;  %v3926_v35 = vpack.i.bf16 %v1956_v32, %v5047_v41  ;;  %v3449_v28 = vld [vmem:[%s5489_s12 + $0x70] sm:$0xff] }
 0x2f4   : > { %3897 = vrot.lane.b32.xlu1 %v3896_v3, %s5531_s29 }
 0x2f5   : > { %3887 = vrot.lane.b32.xlu0 %v3886_v56, %s5532_s28 }
 0x2f6   : > { %2376 = vmatpush.bf16.msrb.mxu2 %v3449_v28 }
 0x2fa   : > { %2377 = vmatpush.bf16.msrb.mxu2 %v3448_v12 }
 0x2fb   : > { %3332 = vmatmul.msk.bf16.gmra.mxu3 %vm543_vm3, %v2225_v18  ;;  %3907 = vrot.lane.b32.xlu2 %v3891_v16, %s5530_s30 }
 0x2fc   : > { %3922 = vrot.lane.b32.xlu1 %v3921_v14, %s5531_s29 }
 0x2fd   : > { %3912 = vrot.lane.b32.xlu0 %v3911_v58, %s5532_s28 }
 0x2fe   : > { %2378 = vmatpush.bf16.msrb.mxu2 %v3447_v7 }
 0x302   : > { %2379 = vmatpush.bf16.msrb.mxu2 %v3446_v30 }
 0x304   : > { %3927 = vrot.lane.b32.xlu1 %v3926_v35, %s5531_s29 }
 0x305   : > { %3917 = vrot.lane.b32.xlu0 %v3916_v62, %s5532_s28 }
 0x306   : > { %2380 = vmatpush.bf16.msrb.mxu2 %v3445_v47 }
 0x30a   : > { %2381 = vmatpush.bf16.msrb.mxu2 %v3444_v49 }
 0x30e   : > { %2382 = vmatpush.bf16.msrb.mxu2 %v3443_v60 }
 0x31d   : > { %v3813_v15 = vpop.permute.xlu2 %3812 }
 0x31e   : > { %v3815_v34 = vunpack.i.h.bf16 %v3813_v15  ;;  %v3814_v21 = vunpack.i.l.bf16 %v3813_v15 }
 0x320   : > { %v2191_v0 = vsel %vm543_vm3, %v4945_v63, %v3815_v34  ;;  %v2190_v10 = vsel %vm543_vm3, %v4949_v24, %v3814_v21 }
 0x325   : > { %v3818_v19 = vpop.permute.xlu2 %3817 }
 0x326   : > { %v3820_v3 = vunpack.i.h.bf16 %v3818_v19  ;;  %v3819_v33 = vunpack.i.l.bf16 %v3818_v19 }
 0x328   : > { %v2166_v24 = vsel %vm543_vm3, %v4840_v50, %v3819_v33  ;;  %v2167_v54 = vsel %vm543_vm3, %v4977_v53, %v3820_v3 }
 0x32d   : > { %v3843_v31 = vpop.permute.xlu2 %3842 }
 0x32e   : > { %v3845_v7 = vunpack.i.h.bf16 %v3843_v31  ;;  %v3844_v27 = vunpack.i.l.bf16 %v3843_v31 }
 0x330   : > { %v2193_v53 = vsel %vm543_vm3, %v4997_v2, %v3845_v7  ;;  %v2192_v40 = vsel %vm543_vm3, %v4953_v36, %v3844_v27 }
 0x335   : > { %v3848_v48 = vpop.permute.xlu2 %3847 }
 0x33e   : > { %v3833_v44 = vpop.permute.xlu1 %3832 }
 0x33f   : > { %v3835_v4 = vunpack.i.h.bf16 %v3833_v44  ;;  %v3834_v61 = vunpack.i.l.bf16 %v3833_v44  ;;  %v3823_v29 = vpop.permute.xlu0 %3822  ;;  %v3873_v44 = vpop.permute.xlu2 %3872 }
 0x340   : > { %v3825_v26 = vunpack.i.h.bf16 %v3823_v29  ;;  %v3824_v11 = vunpack.i.l.bf16 %v3823_v29  ;;  %v3849_v29 = vunpack.i.l.bf16 %v3848_v48  ;;  %v3875_v33 = vunpack.i.h.bf16 %v3873_v44 }
 0x342   : > { %v2198_v5 = vsel %vm1484_vm12, %v2190_v10, %v3824_v11  ;;  %v2199_v16 = vsel %vm1484_vm12, %v2191_v0, %v3825_v26 }
 0x343   : > { %v2206_v51 = vsel %vm1493_vm13, %v2198_v5, %v3834_v61  ;;  %v2207_v52 = vsel %vm1493_vm13, %v2199_v16, %v3835_v4  ;;  %v3850_v61 = vunpack.i.h.bf16 %v3848_v48  ;;  %v2168_v5 = vsel %vm543_vm3, %v4947_v23, %v3849_v29 }
 0x344   : > { %v2215_v1 = vpack.c.bf16 %v2207_v52, %v2206_v51  ;;  %v2195_v23 = vsel %vm543_vm3, %v5041_v37, %v3875_v33 }
 0x345   : > { %v2169_v36 = vsel %vm543_vm3, %v4955_v39, %v3850_v61 }
 0x346   : > { %2383 = vmatmul.bf16.vlgmr.msrb.gmra.mxu2 %v2215_v1  ;;  %v3838_v56 = vpop.permute.xlu1 %3837 }
 0x347   : > { %v3840_v32 = vunpack.i.h.bf16 %v3838_v56  ;;  %v3839_v18 = vunpack.i.l.bf16 %v3838_v56  ;;  %v3828_v14 = vpop.permute.xlu0 %3827  ;;  %v3874_v56 = vunpack.i.l.bf16 %v3873_v44 }
 0x348   : > { %v3830_v63 = vunpack.i.h.bf16 %v3828_v14  ;;  %v3829_v58 = vunpack.i.l.bf16 %v3828_v14 }
 0x34a   : > { %v2174_v35 = vsel %vm1484_vm12, %v2166_v24, %v3829_v58  ;;  %v2175_v62 = vsel %vm1484_vm12, %v2167_v54, %v3830_v63  ;;  %v2194_v54 = vsel %vm543_vm3, %v5001_v6, %v3874_v56 }
 0x34b   : > { %v2182_v28 = vsel %vm1493_vm13, %v2174_v35, %v3839_v18  ;;  %v2183_v17 = vsel %vm1493_vm13, %v2175_v62, %v3840_v32  ;;  %v3878_v32 = vpop.permute.xlu2 %3877 }
 0x34c   : > { %v2214_v12 = vpack.c.bf16 %v2183_v17, %v2182_v28  ;;  %v3879_v7 = vunpack.i.l.bf16 %v3878_v32 }
 0x34e   : > { %2354 = vmatmul.bf16.vlgmr.msrb.gmra.mxu0 %v2214_v12  ;;  %v3863_v30 = vpop.permute.xlu1 %3862  ;;  %v3880_v12 = vunpack.i.h.bf16 %v3878_v32 }
 0x34f   : > { %v3865_v47 = vunpack.i.h.bf16 %v3863_v30  ;;  %v3864_v45 = vunpack.i.l.bf16 %v3863_v30  ;;  %v3853_v50 = vpop.permute.xlu0 %3852 }
 0x350   : > { %v3855_v49 = vunpack.i.h.bf16 %v3853_v50  ;;  %v3854_v60 = vunpack.i.l.bf16 %v3853_v50  ;;  %v2171_v6 = vsel %vm543_vm3, %v5003_v8, %v3880_v12  ;;  %v5197_v12 = vld [vmem:[%s5491_s14] ss:$0 sm:$0xff] }
 0x352   : > { %v2200_v15 = vsel %vm1484_vm12, %v2192_v40, %v3854_v60  ;;  %v2201_v19 = vsel %vm1484_vm12, %v2193_v53, %v3855_v49  ;;  %v2170_v60 = vsel %vm543_vm3, %v4999_v59, %v3879_v7 }
 0x353   : > { %v2208_v34 = vsel %vm1493_vm13, %v2200_v15, %v3864_v45  ;;  %v2209_v21 = vsel %vm1493_vm13, %v2201_v19, %v3865_v47  ;;  %v3903_v37 = vpop.permute.xlu2 %3902 }
 0x354   : > { %v2218_v4 = vpack.c.bf16 %v2209_v21, %v2208_v34  ;;  %v3905_v21 = vunpack.i.h.bf16 %v3903_v37  ;;  %v3904_v44 = vunpack.i.l.bf16 %v3903_v37 }
 0x356   : > { %2388 = vmatmul.bf16.gmra.mxu2 %v2218_v4  ;;  %v3868_v31 = vpop.permute.xlu1 %3867  ;;  %v2197_v59 = vsel %vm543_vm3, %v5067_v25, %v3905_v21 }
 0x357   : > { %v3870_v26 = vunpack.i.h.bf16 %v3868_v31  ;;  %v3869_v11 = vunpack.i.l.bf16 %v3868_v31  ;;  %v3858_v2 = vpop.permute.xlu0 %3857 }
 0x358   : > { %v3860_v0 = vunpack.i.h.bf16 %v3858_v2  ;;  %v3859_v10 = vunpack.i.l.bf16 %v3858_v2 }
 0x35a   : > { %v2176_v16 = vsel %vm1484_vm12, %v2168_v5, %v3859_v10  ;;  %v2177_v51 = vsel %vm1484_vm12, %v2169_v36, %v3860_v0 }
 0x35b   : > { %v2184_v52 = vsel %vm1493_vm13, %v2176_v16, %v3869_v11  ;;  %v2185_v1 = vsel %vm1493_vm13, %v2177_v51, %v3870_v26  ;;  %v2196_v11 = vsel %vm543_vm3, %v5045_v46, %v3904_v44  ;;  %v3908_v2 = vpop.permute.xlu2 %3907 }
 0x35c   : > { %v2217_v3 = vpack.c.bf16 %v2185_v1, %v2184_v52  ;;  %v3910_v51 = vunpack.i.h.bf16 %v3908_v2  ;;  %v3909_v52 = vunpack.i.l.bf16 %v3908_v2 }
 0x35e   : > { %2359 = vmatmul.bf16.gmra.mxu0 %v2217_v3  ;;  %v3893_v18 = vpop.permute.xlu1 %3892  ;;  %v2172_v46 = vsel %vm543_vm3, %v5043_v42, %v3909_v52 }
 0x35f   : > { %v3895_v14 = vunpack.i.h.bf16 %v3893_v18  ;;  %v3894_v63 = vunpack.i.l.bf16 %v3893_v18  ;;  %v3883_v39 = vpop.permute.xlu0 %3882  ;;  %v2173_v18 = vsel %vm543_vm3, %v5047_v41, %v3910_v51  ;;  %v3469_v41 = vld [vmem:[%s5492_s15 + $0x80] sm:$0xff] }
 0x360   : > { %v3885_v58 = vunpack.i.h.bf16 %v3883_v39  ;;  %v3884_v24 = vunpack.i.l.bf16 %v3883_v39 }
 0x362   : > { %v2202_v48 = vsel %vm1484_vm12, %v2194_v54, %v3884_v24  ;;  %v2203_v35 = vsel %vm1484_vm12, %v2195_v23, %v3885_v58  ;;  %v2413_v23 = vpop.f32.mrf.mxu3  ;;  %v3470_v54 = vld [vmem:[%s5492_s15 + $0x88] sm:$0xff] }
 0x363   : > { %v2210_v62 = vsel %vm1493_vm13, %v2202_v48, %v3894_v63  ;;  %v2211_v28 = vsel %vm1493_vm13, %v2203_v35, %v3895_v14  ;;  %3017 = vmatpush.bf16.msra.mxu2 %v3470_v54 }
 0x364   : > { %v2221_v17 = vpack.c.bf16 %v2211_v28, %v2210_v62  ;;  %v5192_v28 = vld [vmem:[%s5490_s13] ss:$0 sm:$0xff] }
 0x366   : > { %2393 = vmatmul.bf16.gmra.mxu2 %v2221_v17  ;;  %v3898_v27 = vpop.permute.xlu1 %3897 }
 0x367   : > { %v3900_v30 = vunpack.i.h.bf16 %v3898_v27  ;;  %v3899_v47 = vunpack.i.l.bf16 %v3898_v27  ;;  %v3888_v45 = vpop.permute.xlu0 %3887  ;;  %3018 = vmatpush.bf16.msra.mxu2 %v3469_v41 }
 0x368   : > { %v3890_v50 = vunpack.i.h.bf16 %v3888_v45  ;;  %v3889_v49 = vunpack.i.l.bf16 %v3888_v45 }
 0x36a   : > { %v2178_v53 = vsel %vm1484_vm12, %v2170_v60, %v3889_v49  ;;  %v2179_v40 = vsel %vm1484_vm12, %v2171_v6, %v3890_v50  ;;  %v2415_v48 = vpop.f32.mrf.mxu3 }
 0x36b   : > { %v2186_v15 = vsel %vm1493_vm13, %v2178_v53, %v3899_v47  ;;  %v2187_v19 = vsel %vm1493_vm13, %v2179_v40, %v3900_v30 }
 0x36c   : > { %v2220_v34 = vpack.c.bf16 %v2187_v19, %v2186_v15  ;;  %v2525_v15 = vld [vmem:[#allocation3 + $0x2] sm:$0xff] }
 0x36d   : > { %v2517_v19 = vld [vmem:[#allocation3 + $0x1] sm:$0xff] }
 0x36e   : > { %2364 = vmatmul.bf16.gmra.mxu0 %v2220_v34  ;;  %v3923_v4 = vpop.permute.xlu1 %3922 }
 0x36f   : > { %v3925_v61 = vunpack.i.h.bf16 %v3923_v4  ;;  %v3924_v29 = vunpack.i.l.bf16 %v3923_v4  ;;  %v3913_v31 = vpop.permute.xlu0 %3912 }
 0x370   : > { %v3915_v8 = vunpack.i.h.bf16 %v3913_v31  ;;  %v3914_v26 = vunpack.i.l.bf16 %v3913_v31 }
 0x372   : > { %v2204_v0 = vsel %vm1484_vm12, %v2196_v11, %v3914_v26  ;;  %v2205_v10 = vsel %vm1484_vm12, %v2197_v59, %v3915_v8  ;;  %v2418_v47 = vpop.f32.mrf.mxu3 }
 0x373   : > { %v2212_v36 = vsel %vm1493_vm13, %v2204_v0, %v3924_v29  ;;  %v2213_v5 = vsel %vm1493_vm13, %v2205_v10, %v3925_v61 }
 0x374   : > { %v2224_v16 = vpack.c.bf16 %v2213_v5, %v2212_v36 }
 0x376   : > { %2398 = vmatmul.bf16.gmra.mxu2 %v2224_v16  ;;  %v3928_v1 = vpop.permute.xlu1 %3927 }
 0x377   : > { %v3930_v3 = vunpack.i.h.bf16 %v3928_v1  ;;  %v3929_v33 = vunpack.i.l.bf16 %v3928_v1  ;;  %v3918_v25 = vpop.permute.xlu0 %3917 }
 0x378   : > { %v3920_v56 = vunpack.i.h.bf16 %v3918_v25  ;;  %v3919_v32 = vunpack.i.l.bf16 %v3918_v25 }
 0x37a   : > { %v2180_v14 = vsel %vm1484_vm12, %v2172_v46, %v3919_v32  ;;  %v2181_v63 = vsel %vm1484_vm12, %v2173_v18, %v3920_v56  ;;  %v2420_v44 = vpop.f32.mrf.mxu3 }
 0x37b   : > { %v2188_v39 = vsel %vm1493_vm13, %v2180_v14, %v3929_v33  ;;  %v2189_v58 = vsel %vm1493_vm13, %v2181_v63, %v3930_v3 }
 0x37c   : > { %v2223_v24 = vpack.c.bf16 %v2189_v58, %v2188_v39 }
 0x37e   : > { %2369 = vmatmul.bf16.gmra.mxu0 %v2223_v24 }
 0x382   : > { %v2423_v51 = vpop.f32.mrf.mxu3 }
 0x3c9   : > { %v2384_v42 = vpop.f32.mrf.mxu2 }
 0x3cb   : > { %v2355_v35 = vpop.f32.mrf.mxu0 }
 0x3cc   : > { %v2385_v62 = vadd.f32 %v2384_v42, %v2355_v35  ;;  %v2425_v35 = vpop.f32.mrf.mxu3 }
 0x3ce   : > { %v2414_v17 = vadd.f32 %v2413_v23, %v2385_v62 }
 0x3d0   : > { %v2438_v7 = vmul.f32 %v5192_v28, %v2414_v17 }
 0x3d1   : > { %v2386_v27 = vpop.f32.mrf.mxu2 }
 0x3d2   : > { %v2449_v30 = vadd.f32 %v5197_v12, %v2438_v7 }
 0x3d3   : > { %v2357_v45 = vpop.f32.mrf.mxu0 }
 0x3d4   : > { %v2457_v37 = vmax.f32 %v2449_v30, 0.0  ;;  %v2387_v50 = vadd.f32 %v2386_v27, %v2357_v45 }
 0x3d6   : > { %2501 = vst.msk [vmem:[#allocation3 + $0x11] sm:$0xff] %vm543_vm3, %v2457_v37  ;;  %v2416_v49 = vadd.f32 %v2415_v48, %v2387_v50 }
 0x3d8   : > { %v2439_v6 = vmul.f32 %v5192_v28, %v2416_v49 }
 0x3d9   : > { %v2389_v60 = vpop.f32.mrf.mxu2 }
 0x3da   : > { %v2450_v53 = vadd.f32 %v5197_v12, %v2439_v6 }
 0x3db   : > { %v2360_v40 = vpop.f32.mrf.mxu0 }
 0x3dc   : > { %v2458_v34 = vmax.f32 %v2450_v53, 0.0  ;;  %v2390_v21 = vadd.f32 %v2389_v60, %v2360_v40  ;;  %v2428_v60 = vpop.f32.mrf.mxu3 }
 0x3dd   : > { %v2526_v4 = vld [vmem:[#allocation3 + $0x12] sm:$0xff] }
 0x3de   : > { %v5204_v61 = vld [vmem:[#allocation3 + $0x11] sm:$0xff]  ;;  %2502 = vst.msk [vmem:[#allocation3 + $0x21] sm:$0xff] %vm543_vm3, %v2458_v34  ;;  %v2419_v29 = vadd.f32 %v2418_v47, %v2390_v21  ;;  %v3936_v31 = vpack.i.bf16 %v2526_v4, %v2525_v15 }
 0x3df   : > { %v3931_v8 = vpack.i.bf16 %v5204_v61, %v2517_v19  ;;  %v5227_v23 = vld [vmem:[#allocation3 + $0x10] sm:$0xff] }
 0x3e0   : > { %v2440_v26 = vmul.f32 %v5192_v28, %v2419_v29  ;;  %3937 = vrot.lane.b32.xlu1 %v3936_v31, %s5532_s28 }
 0x3e1   : > { %3932 = vrot.lane.b32.xlu2 %v3931_v8, %s5530_s30  ;;  %v2391_v59 = vpop.f32.mrf.mxu2 }
 0x3e2   : > { %v2451_v11 = vadd.f32 %v5197_v12, %v2440_v26 }
 0x3e3   : > { %v2362_v2 = vpop.f32.mrf.mxu0 }
 0x3e4   : > { %v2459_v0 = vmax.f32 %v2451_v11, 0.0  ;;  %v2392_v10 = vadd.f32 %v2391_v59, %v2362_v2  ;;  %v3460_v2 = vld [vmem:[%s5492_s15 + $0x38] sm:$0xff] }
 0x3e5   : > { %v2550_v36 = vld [vmem:[#allocation3 + $0x22] sm:$0xff]  ;;  %2953 = vmatpush.bf16.msra.mxu1 %v3460_v2 }
 0x3e6   : > { %2503 = vst.msk [vmem:[#allocation3 + $0x31] sm:$0xff] %vm543_vm3, %v2459_v0  ;;  %v2421_v5 = vadd.f32 %v2420_v44, %v2392_v10  ;;  %v3941_v16 = vpack.i.bf16 %v2550_v36, %v2526_v4  ;;  %v5216_v32 = vld [vmem:[#allocation3 + $0x21] sm:$0xff]  ;;  %v3468_v0 = vld [vmem:[%s5492_s15 + $0x78] sm:$0xff] }
 0x3e7   : > { %v5218_v46 = vld [vmem:[#allocation3 + $0x20] sm:$0xff]  ;;  %2982 = vmatpush.bf16.msra.mxu0 %v3468_v0  ;;  %v3454_v2 = vld [vmem:[%s5492_s15 + $0x8] sm:$0xff] }
 0x3e8   : > { %v2441_v52 = vmul.f32 %v5192_v28, %v2421_v5  ;;  %3942 = vrot.lane.b32.xlu0 %v3941_v16, %s5530_s30  ;;  %v3946_v48 = vpack.i.bf16 %v5218_v46, %v5227_v23  ;;  %v3459_v16 = vld [vmem:[%s5492_s15 + $0x30] sm:$0xff]  ;;  %v3462_v0 = vld [vmem:[%s5492_s15 + $0x48] sm:$0xff] }
 0x3e9   : > { %v2394_v1 = vpop.f32.mrf.mxu2  ;;  %2954 = vmatpush.bf16.msra.mxu1 %v3459_v16 }
 0x3ea   : > { %v2452_v3 = vadd.f32 %v5197_v12, %v2441_v52 }
 0x3eb   : > { %v2365_v33 = vpop.f32.mrf.mxu0 }
 0x3ec   : > { %v2460_v25 = vmax.f32 %v2452_v3, 0.0  ;;  %v2395_v56 = vadd.f32 %v2394_v1, %v2365_v33  ;;  %v2430_v3 = vpop.f32.mrf.mxu3 }
 0x3ed   : > { %v2574_v18 = vld [vmem:[#allocation3 + $0x32] sm:$0xff] }
 0x3ee   : > { %v5220_v14 = vld [vmem:[#allocation3 + $0x31] sm:$0xff]  ;;  %2504 = vst.msk [vmem:[#allocation3 + $0x41] sm:$0xff] %vm543_vm3, %v2460_v25  ;;  %v2424_v39 = vadd.f32 %v2423_v51, %v2395_v56  ;;  %v2823_v58 = vpack.c.bf16 %v2574_v18, %v2550_v36  ;;  %v3966_v45 = vpack.i.bf16 %v2574_v18, %v2550_v36 }
 0x3ef   : > { %v5222_v63 = vld [vmem:[#allocation3 + $0x30] sm:$0xff]  ;;  %v3956_v24 = vpack.i.bf16 %v5220_v14, %v5216_v32 }
 0x3f0   : > { %v3951_v54 = vpack.i.bf16 %v5222_v63, %v5218_v46  ;;  %v2442_v42 = vmul.f32 %v5192_v28, %v2424_v39  ;;  %3405 = vmatmul.msk.bf16.vlgmr.msra.gmra.mxu2 %vm543_vm3, %v2823_v58  ;;  %3947 = vrot.lane.b32.xlu0 %v3946_v48, %s5531_s29  ;;  %v3467_v51 = vld [vmem:[%s5492_s15 + $0x70] sm:$0xff]  ;;  %v3458_v39 = vld [vmem:[%s5492_s15 + $0x28] sm:$0xff] }
 0x3f1   : > { %3957 = vrot.lane.b32.xlu1 %v3956_v24, %s5531_s29  ;;  %v2396_v41 = vpop.f32.mrf.mxu2  ;;  %2983 = vmatpush.bf16.msra.mxu0 %v3467_v51  ;;  %v3466_v58 = vld [vmem:[%s5492_s15 + $0x68] sm:$0xff] }
 0x3f2   : > { %3952 = vrot.lane.b32.xlu2 %v3951_v54, %s5532_s28  ;;  %v2453_v62 = vadd.f32 %v5197_v12, %v2442_v42  ;;  %2955 = vmatpush.bf16.msra.mxu1 %v3458_v39 }
 0x3f3   : > { %v2367_v17 = vpop.f32.mrf.mxu0 }
 0x3f4   : > { %v2461_v7 = vmax.f32 %v2453_v62, 0.0  ;;  %v2397_v27 = vadd.f32 %v2396_v41, %v2367_v17 }
 0x3f5   : > { %v2552_v30 = vld [vmem:[#allocation3 + $0x42] sm:$0xff]  ;;  %2984 = vmatpush.bf16.msra.mxu0 %v3466_v58 }
 0x3f6   : > { %2505 = vst.msk [vmem:[#allocation3 + $0x51] sm:$0xff] %vm543_vm3, %v2461_v7  ;;  %v2426_v47 = vadd.f32 %v2425_v35, %v2397_v27  ;;  %v3971_v37 = vpack.i.bf16 %v2552_v30, %v2574_v18  ;;  %v5245_v19 = vld [vmem:[#allocation3 + $0x41] sm:$0xff] }
 0x3f7   : > { %v5247_v34 = vld [vmem:[#allocation3 + $0x40] sm:$0xff] }
 0x3f8   : > { %v2443_v50 = vmul.f32 %v5192_v28, %v2426_v47  ;;  %3972 = vrot.lane.b32.xlu0 %v3971_v37, %s5530_s30  ;;  %v3976_v59 = vpack.i.bf16 %v5247_v34, %v5222_v63  ;;  %v2580_v37 = vld [vmem:[#allocation3 + $0x92] sm:$0xff] }
 0x3f9   : > { %3967 = vrot.lane.b32.xlu1 %v3966_v45, %s5532_s28  ;;  %v2399_v49 = vpop.f32.mrf.mxu2 }
 0x3fa   : > { %3962 = vrot.lane.b32.xlu2 %v3956_v24, %s5530_s30  ;;  %v2454_v6 = vadd.f32 %v5197_v12, %v2443_v50 }
 0x3fb   : > { %v2370_v53 = vpop.f32.mrf.mxu0 }
 0x3fc   : > { %v2462_v40 = vmax.f32 %v2454_v6, 0.0  ;;  %v2400_v15 = vadd.f32 %v2399_v49, %v2370_v53  ;;  %v2572_v49 = vld [vmem:[#allocation3 + $0x91] sm:$0xff]  ;;  %v3457_v53 = vld [vmem:[%s5492_s15 + $0x20] sm:$0xff] }
 0x3fd   : > { %v2576_v21 = vld [vmem:[#allocation3 + $0x52] sm:$0xff]  ;;  %2956 = vmatpush.bf16.msra.mxu1 %v3457_v53 }
 0x3fe   : > { %v5249_v44 = vld [vmem:[#allocation3 + $0x51] sm:$0xff]  ;;  %2506 = vst.msk [vmem:[#allocation3 + $0x61] sm:$0xff] %vm543_vm3, %v2462_v40  ;;  %v2429_v29 = vadd.f32 %v2428_v60, %v2400_v15  ;;  %v2826_v31 = vpack.c.bf16 %v2576_v21, %v2552_v30  ;;  %v3996_v56 = vpack.i.bf16 %v2576_v21, %v2552_v30  ;;  %v3465_v40 = vld [vmem:[%s5492_s15 + $0x60] sm:$0xff] }
 0x3ff   : > { %v5251_v4 = vld [vmem:[#allocation3 + $0x50] sm:$0xff]  ;;  %v3986_v8 = vpack.i.bf16 %v5249_v44, %v5245_v19  ;;  %2985 = vmatpush.bf16.msra.mxu0 %v3465_v40 }
 0x400   : > { %v3981_v26 = vpack.i.bf16 %v5251_v4, %v5247_v34  ;;  %v2444_v11 = vmul.f32 %v5192_v28, %v2429_v29  ;;  %3406 = vmatmul.msk.bf16.gmra.mxu2 %vm543_vm3, %v2826_v31  ;;  %3977 = vrot.lane.b32.xlu0 %v3976_v59, %s5531_s29  ;;  %v2564_v60 = vld [vmem:[#allocation3 + $0x90] sm:$0xff] }
 0x401   : > { %3987 = vrot.lane.b32.xlu1 %v3986_v8, %s5531_s29  ;;  %v2401_v36 = vpop.f32.mrf.mxu2  ;;  %v3455_v59 = vld [vmem:[%s5492_s15 + $0x10] sm:$0xff] }
 0x402   : > { %3982 = vrot.lane.b32.xlu2 %v3981_v26, %s5532_s28  ;;  %v2455_v10 = vadd.f32 %v5197_v12, %v2444_v11  ;;  %v3464_v26 = vld [vmem:[%s5492_s15 + $0x58] sm:$0xff]  ;;  %v3463_v11 = vld [vmem:[%s5492_s15 + $0x50] sm:$0xff] }
 0x403   : > { %v2372_v5 = vpop.f32.mrf.mxu0  ;;  %2986 = vmatpush.bf16.msra.mxu0 %v3464_v26 }
 0x404   : > { %v2463_v52 = vmax.f32 %v2455_v10, 0.0  ;;  %v2402_v1 = vadd.f32 %v2401_v36, %v2372_v5  ;;  %v3453_v10 = vld [vmem:[%s5492_s15] sm:$0xff] }
 0x405   : > { %v2554_v33 = vld [vmem:[#allocation3 + $0x62] sm:$0xff] }
 0x406   : > { %2507 = vst.msk [vmem:[#allocation3 + $0x71] sm:$0xff] %vm543_vm3, %v2463_v52  ;;  %v2431_v25 = vadd.f32 %v2430_v3, %v2402_v1  ;;  %v4001_v18 = vpack.i.bf16 %v2554_v33, %v2576_v21  ;;  %v5290_v42 = vld [vmem:[#allocation3 + $0x60] sm:$0xff] }
 0x407   : > { %v5292_v35 = vld [vmem:[#allocation3 + $0x61] sm:$0xff]  ;;  %v4006_v27 = vpack.i.bf16 %v5290_v42, %v5251_v4  ;;  %2987 = vmatpush.bf16.msra.mxu0 %v3463_v11 }
 0x408   : > { %v2445_v24 = vmul.f32 %v5192_v28, %v2431_v25  ;;  %4002 = vrot.lane.b32.xlu0 %v4001_v18, %s5530_s30  ;;  %v3461_v36 = vld [vmem:[%s5492_s15 + $0x40] sm:$0xff] }
 0x409   : > { %3997 = vrot.lane.b32.xlu1 %v3996_v56, %s5532_s28  ;;  %v2509_v18 = vld [vmem:[#allocation3] sm:$0xff] }
 0x40a   : > { %3992 = vrot.lane.b32.xlu2 %v3986_v8, %s5530_s30  ;;  %v2456_v54 = vadd.f32 %v5197_v12, %v2445_v24  ;;  %v3456_v8 = vld [vmem:[%s5492_s15 + $0x18] sm:$0xff] }
 0x40b   : > { %2957 = vmatpush.bf16.msra.mxu1 %v3456_v8  ;;  %2988 = vmatpush.bf16.msra.mxu0 %v3462_v0 }
 0x40c   : > { %v2464_v48 = vmax.f32 %v2456_v54, 0.0 }
 0x40d   : > { %v2578_v41 = vld [vmem:[#allocation3 + $0x72] sm:$0xff] }
 0x40e   : > { %v5294_v62 = vld [vmem:[#allocation3 + $0x71] sm:$0xff]  ;;  %2508 = vst.msk [vmem:[#allocation3 + $0x81] sm:$0xff] %vm543_vm3, %v2464_v48  ;;  %v2829_v28 = vpack.c.bf16 %v2578_v41, %v2554_v33  ;;  %v4026_v47 = vpack.i.bf16 %v2578_v41, %v2554_v33 }
 0x40f   : > { %v5296_v17 = vld [vmem:[#allocation3 + $0x70] sm:$0xff]  ;;  %v4016_v7 = vpack.i.bf16 %v5294_v62, %v5292_v35  ;;  %2958 = vmatpush.bf16.msra.mxu1 %v3455_v59  ;;  %2989 = vmatpush.bf16.msra.mxu0 %v3461_v36 }
 0x410   : > { %v4011_v12 = vpack.i.bf16 %v5296_v17, %v5290_v42  ;;  %3407 = vmatmul.msk.bf16.gmra.mxu2 %vm543_vm3, %v2829_v28  ;;  %4007 = vrot.lane.b32.xlu0 %v4006_v27, %s5531_s29 }
 0x411   : > { %4017 = vrot.lane.b32.xlu1 %v4016_v7, %s5531_s29 }
 0x412   : > { %4012 = vrot.lane.b32.xlu2 %v4011_v12, %s5532_s28 }
 0x413   : > { %2959 = vmatpush.bf16.msra.mxu1 %v3454_v2 }
 0x415   : > { %v2556_v30 = vld [vmem:[#allocation3 + $0x82] sm:$0xff] }
 0x416   : > { %v4031_v45 = vpack.i.bf16 %v2556_v30, %v2578_v41  ;;  %v5312_v50 = vld [vmem:[#allocation3 + $0x81] sm:$0xff]  ;;  %v2832_v15 = vpack.c.bf16 %v2580_v37, %v2556_v30 }
 0x417   : > { %v2563_v6 = vld [vmem:[#allocation3 + $0x80] sm:$0xff]  ;;  %v4046_v21 = vpack.i.bf16 %v2572_v49, %v5312_v50  ;;  %2960 = vmatpush.bf16.msra.mxu1 %v3453_v10 }
 0x418   : > { %4032 = vrot.lane.b32.xlu0 %v4031_v45, %s5530_s30  ;;  %v4036_v29 = vpack.i.bf16 %v2564_v60, %v2563_v6  ;;  %v4041_v31 = vpack.i.bf16 %v2563_v6, %v5296_v17 }
 0x419   : > { %4027 = vrot.lane.b32.xlu1 %v4026_v47, %s5532_s28 }
 0x41a   : > { %4022 = vrot.lane.b32.xlu2 %v4016_v7, %s5530_s30 }
 0x420   : > { %3408 = vmatmul.msk.bf16.gmra.mxu2 %vm543_vm3, %v2832_v15  ;;  %4042 = vrot.lane.b32.xlu0 %v4041_v31, %s5531_s29 }
 0x421   : > { %4047 = vrot.lane.b32.xlu1 %v4046_v21, %s5531_s29 }
 0x422   : > { %4037 = vrot.lane.b32.xlu2 %v4036_v29, %s5532_s28  ;;  %s3071_s28 = sshll.u32 %s3068_s2, 4  ;;  %s3072_s28 = int_to_ptr.hbm [resolvable:$true] %s3071_s28 }
 0x423   : > { %s4075_s29 = sshra.s32 %s3072_s28, 4  ;;  %s4076_s29 = int_to_ptr.hbm [resolvable:$true] %s4075_s29 }
 0x424   : > { %s4077_s30 = scalar_lea.hbm %s4076_s29, 64  ;;  %p4082_p0 = scmp.lt.s32.totalorder %s4076_s29, %s5493_s16 }
 0x425   : > { %p4078_p11 = scmp.ne.s32.totalorder %s4076_s29, %s4077_s30  ;;  %p4083_p1 = scmp.lt.s32.totalorder %s4081_s6, %s4077_s30 }
 0x427   : > { %p4079_p12 = pnand %p4078_p11, %p4260_p5  ;;  %p4084_p2 = por %p4083_p1, %p4082_p0 }
 0x429   : > { %p4080_p13 = pneg %p4079_p12 }
 0x42b   : > { %p4085_p3 = pnand %p4084_p2, %p4080_p13 }
 0x43b   : > { %v3933_v5 = vpop.permute.xlu2 %3932 }
 0x43c   : > { %v3935_v25 = vunpack.i.h.bf16 %v3933_v5  ;;  %v3934_v56 = vunpack.i.l.bf16 %v3933_v5 }
 0x43e   : > { %v2774_v7 = vsel %vm543_vm3, %v5227_v23, %v3935_v25  ;;  %v2773_v12 = vsel %vm543_vm3, %v2509_v18, %v3934_v56 }
 0x44c   : > { %v3953_v16 = vpop.permute.xlu2 %3952 }
 0x44d   : > { %v3955_v48 = vunpack.i.h.bf16 %v3953_v16  ;;  %v3954_v41 = vunpack.i.l.bf16 %v3953_v16 }
 0x452   : > { %v3938_v51 = vpop.permute.xlu1 %3937 }
 0x453   : > { %v3940_v39 = vunpack.i.h.bf16 %v3938_v51  ;;  %v3939_v58 = vunpack.i.l.bf16 %v3938_v51 }
 0x454   : > { %v3963_v1 = vpop.permute.xlu2 %3962 }
 0x455   : > { %v2781_v6 = vsel %vm1484_vm12, %v2773_v12, %v3939_v58  ;;  %v3965_v11 = vunpack.i.h.bf16 %v3963_v1  ;;  %v3964_v2 = vunpack.i.l.bf16 %v3963_v1 }
 0x457   : > { %v2775_v25 = vsel %vm543_vm3, %v5218_v46, %v3964_v2 }
 0x45a   : > { %v3943_v52 = vpop.permute.xlu0 %3942 }
 0x45b   : > { %v3945_v3 = vunpack.i.h.bf16 %v3943_v52  ;;  %v3944_v33 = vunpack.i.l.bf16 %v3943_v52 }
 0x45c   : > { %v3983_v21 = vpop.permute.xlu2 %3982 }
 0x45d   : > { %v2798_v24 = vsel %vm543_vm3, %v5216_v32, %v3945_v3  ;;  %v2797_v54 = vsel %vm543_vm3, %v5204_v61, %v3944_v33  ;;  %v2782_v61 = vsel %vm1484_vm12, %v2774_v7, %v3940_v39  ;;  %v3985_v51 = vunpack.i.h.bf16 %v3983_v21 }
 0x45e   : > { %v2805_v45 = vsel %vm1484_vm12, %v2797_v54, %v3954_v41  ;;  %v2806_v37 = vsel %vm1484_vm12, %v2798_v24, %v3955_v48  ;;  %v3984_v52 = vunpack.i.l.bf16 %v3983_v21  ;;  %v2776_v33 = vsel %vm543_vm3, %v5222_v63, %v3965_v11 }
 0x462   : > { %v3948_v47 = vpop.permute.xlu0 %3947 }
 0x463   : > { %v3958_v28 = vpop.permute.xlu1 %3957  ;;  %v3950_v49 = vunpack.i.h.bf16 %v3948_v47  ;;  %v3949_v32 = vunpack.i.l.bf16 %v3948_v47 }
 0x464   : > { %v3960_v27 = vunpack.i.h.bf16 %v3958_v28  ;;  %v3959_v30 = vunpack.i.l.bf16 %v3958_v28  ;;  %v3993_v0 = vpop.permute.xlu2 %3992 }
 0x465   : > { %v2789_v40 = vsel %vm1493_vm13, %v2781_v6, %v3949_v32  ;;  %v2790_v15 = vsel %vm1493_vm13, %v2782_v61, %v3950_v49  ;;  %v3994_v49 = vunpack.i.l.bf16 %v3993_v0 }
 0x466   : > { %v2813_v60 = vsel %vm1493_vm13, %v2805_v45, %v3959_v30  ;;  %v2814_v53 = vsel %vm1493_vm13, %v2806_v37, %v3960_v27  ;;  %v2821_v29 = vpack.c.bf16 %v2790_v15, %v2789_v40  ;;  %v3995_v37 = vunpack.i.h.bf16 %v3993_v0 }
 0x467   : > { %v2822_v23 = vpack.c.bf16 %v2814_v53, %v2813_v60  ;;  %v2777_v21 = vsel %vm543_vm3, %v5247_v34, %v3994_v49 }
 0x468   : > { %2961 = vmatmul.bf16.vlgmr.msra.gmra.mxu1 %v2821_v29  ;;  %v2778_v15 = vsel %vm543_vm3, %v5251_v4, %v3995_v37 }
 0x469   : > { %2990 = vmatmul.bf16.vlgmr.msra.gmra.mxu0 %v2822_v23 }
 0x46a   : > { %v3973_v8 = vpop.permute.xlu0 %3972 }
 0x46b   : > { %v3968_v31 = vpop.permute.xlu1 %3967  ;;  %v3975_v26 = vunpack.i.h.bf16 %v3973_v8  ;;  %v3974_v59 = vunpack.i.l.bf16 %v3973_v8 }
 0x46c   : > { %v3970_v10 = vunpack.i.h.bf16 %v3968_v31  ;;  %v3969_v36 = vunpack.i.l.bf16 %v3968_v31  ;;  %v4013_v27 = vpop.permute.xlu2 %4012 }
 0x46d   : > { %v2800_v5 = vsel %vm543_vm3, %v5245_v19, %v3975_v26  ;;  %v2799_v16 = vsel %vm543_vm3, %v5220_v14, %v3974_v59  ;;  %v4015_v53 = vunpack.i.h.bf16 %v4013_v27  ;;  %v4014_v23 = vunpack.i.l.bf16 %v4013_v27 }
 0x46e   : > { %v2807_v24 = vsel %vm1484_vm12, %v2799_v16, %v3984_v52  ;;  %v2808_v19 = vsel %vm1484_vm12, %v2800_v5, %v3985_v51  ;;  %v2783_v14 = vsel %vm1484_vm12, %v2775_v25, %v3969_v36  ;;  %v2784_v54 = vsel %vm1484_vm12, %v2776_v33, %v3970_v10 }
 0x472   : > { %v3978_v18 = vpop.permute.xlu0 %3977 }
 0x473   : > { %v3988_v3 = vpop.permute.xlu1 %3987  ;;  %v3980_v39 = vunpack.i.h.bf16 %v3978_v18  ;;  %v3979_v58 = vunpack.i.l.bf16 %v3978_v18 }
 0x474   : > { %v3990_v56 = vunpack.i.h.bf16 %v3988_v3  ;;  %v3989_v1 = vunpack.i.l.bf16 %v3988_v3  ;;  %v4023_v2 = vpop.permute.xlu2 %4022 }
 0x475   : > { %v2791_v41 = vsel %vm1493_vm13, %v2783_v14, %v3979_v58  ;;  %v2792_v46 = vsel %vm1493_vm13, %v2784_v54, %v3980_v39  ;;  %v4025_v25 = vunpack.i.h.bf16 %v4023_v2 }
 0x476   : > { %v2815_v48 = vsel %vm1493_vm13, %v2807_v24, %v3989_v1  ;;  %v2816_v63 = vsel %vm1493_vm13, %v2808_v19, %v3990_v56  ;;  %v2824_v28 = vpack.c.bf16 %v2792_v46, %v2791_v41  ;;  %v4024_v56 = vunpack.i.l.bf16 %v4023_v2 }
 0x477   : > { %v2825_v7 = vpack.c.bf16 %v2816_v63, %v2815_v48  ;;  %v2780_v63 = vsel %vm543_vm3, %v5296_v17, %v4025_v25 }
 0x478   : > { %2966 = vmatmul.bf16.gmra.mxu1 %v2824_v28  ;;  %v2779_v48 = vsel %vm543_vm3, %v5290_v42, %v4024_v56 }
 0x479   : > { %2995 = vmatmul.bf16.gmra.mxu0 %v2825_v7 }
 0x47a   : > { %v4003_v30 = vpop.permute.xlu0 %4002 }
 0x47b   : > { %v3998_v12 = vpop.permute.xlu1 %3997  ;;  %v4005_v47 = vunpack.i.h.bf16 %v4003_v30  ;;  %v4004_v45 = vunpack.i.l.bf16 %v4003_v30 }
 0x47c   : > { %v4000_v32 = vunpack.i.h.bf16 %v3998_v12  ;;  %v3999_v6 = vunpack.i.l.bf16 %v3998_v12  ;;  %v4038_v1 = vpop.permute.xlu2 %4037 }
 0x47d   : > { %v2802_v61 = vsel %vm543_vm3, %v5292_v35, %v4005_v47  ;;  %v2801_v60 = vsel %vm543_vm3, %v5249_v44, %v4004_v45  ;;  %v4040_v19 = vunpack.i.h.bf16 %v4038_v1  ;;  %v4039_v14 = vunpack.i.l.bf16 %v4038_v1 }
 0x47e   : > { %v2809_v11 = vsel %vm1484_vm12, %v2801_v60, %v4014_v23  ;;  %v2810_v35 = vsel %vm1484_vm12, %v2802_v61, %v4015_v53  ;;  %v2785_v44 = vsel %vm1484_vm12, %v2777_v21, %v3999_v6  ;;  %v2786_v0 = vsel %vm1484_vm12, %v2778_v15, %v4000_v32  ;;  %v3020_v32 = vpop.f32.mrf.mxu2 }
 0x482   : > { %v4008_v29 = vpop.permute.xlu0 %4007 }
 0x483   : > { %v4018_v40 = vpop.permute.xlu1 %4017  ;;  %v4010_v26 = vunpack.i.h.bf16 %v4008_v29  ;;  %v4009_v59 = vunpack.i.l.bf16 %v4008_v29 }
 0x484   : > { %v4020_v31 = vunpack.i.h.bf16 %v4018_v40  ;;  %v4019_v8 = vunpack.i.l.bf16 %v4018_v40 }
 0x485   : > { %v2793_v34 = vsel %vm1493_vm13, %v2785_v44, %v4009_v59  ;;  %v2794_v36 = vsel %vm1493_vm13, %v2786_v0, %v4010_v26 }
 0x486   : > { %v2817_v10 = vsel %vm1493_vm13, %v2809_v11, %v4019_v8  ;;  %v2818_v4 = vsel %vm1493_vm13, %v2810_v35, %v4020_v31  ;;  %v2827_v16 = vpack.c.bf16 %v2794_v36, %v2793_v34  ;;  %v3022_v6 = vpop.f32.mrf.mxu2 }
 0x487   : > { %v2828_v5 = vpack.c.bf16 %v2818_v4, %v2817_v10 }
 0x488   : > { %2971 = vmatmul.bf16.gmra.mxu1 %v2827_v16 }
 0x489   : > { %3000 = vmatmul.bf16.gmra.mxu0 %v2828_v5 }
 0x48a   : > { %v4033_v52 = vpop.permute.xlu0 %4032 }
 0x48b   : > { %v4028_v51 = vpop.permute.xlu1 %4027  ;;  %v4035_v3 = vunpack.i.h.bf16 %v4033_v52  ;;  %v4034_v33 = vunpack.i.l.bf16 %v4033_v52 }
 0x48c   : > { %v4030_v18 = vunpack.i.h.bf16 %v4028_v51  ;;  %v4029_v39 = vunpack.i.l.bf16 %v4028_v51 }
 0x48d   : > { %v2803_v58 = vsel %vm543_vm3, %v5294_v62, %v4034_v33  ;;  %v2804_v24 = vsel %vm543_vm3, %v5312_v50, %v4035_v3 }
 0x48e   : > { %v2811_v62 = vsel %vm1484_vm12, %v2803_v58, %v4039_v14  ;;  %v2812_v27 = vsel %vm1484_vm12, %v2804_v24, %v4040_v19  ;;  %v2787_v50 = vsel %vm1484_vm12, %v2779_v48, %v4029_v39  ;;  %v2788_v30 = vsel %vm1484_vm12, %v2780_v63, %v4030_v18  ;;  %v3025_v15 = vpop.f32.mrf.mxu2 }
 0x492   : > { %v4043_v28 = vpop.permute.xlu0 %4042 }
 0x493   : > { %v4048_v54 = vpop.permute.xlu1 %4047  ;;  %v4045_v7 = vunpack.i.h.bf16 %v4043_v28  ;;  %v4044_v12 = vunpack.i.l.bf16 %v4043_v28 }
 0x494   : > { %v4050_v41 = vunpack.i.h.bf16 %v4048_v54  ;;  %v4049_v46 = vunpack.i.l.bf16 %v4048_v54 }
 0x495   : > { %v2795_v17 = vsel %vm1493_vm13, %v2787_v50, %v4044_v12  ;;  %v2796_v45 = vsel %vm1493_vm13, %v2788_v30, %v4045_v7 }
 0x496   : > { %v2819_v42 = vsel %vm1493_vm13, %v2811_v62, %v4049_v46  ;;  %v2820_v47 = vsel %vm1493_vm13, %v2812_v27, %v4050_v41  ;;  %v2830_v49 = vpack.c.bf16 %v2796_v45, %v2795_v17 }
 0x497   : > { %v2831_v37 = vpack.c.bf16 %v2820_v47, %v2819_v42 }
 0x498   : > { %2976 = vmatmul.bf16.gmra.mxu1 %v2830_v49 }
 0x499   : > { %3005 = vmatmul.bf16.gmra.mxu0 %v2831_v37 }
 0x4e5   : > { %v2962_v60 = vpop.f32.mrf.mxu1 }
 0x4e6   : > { %v2991_v61 = vpop.f32.mrf.mxu0 }
 0x4e7   : > { %v2992_v53 = vadd.f32 %v2991_v61, %v2962_v60 }
 0x4e9   : > { %v3021_v23 = vadd.f32 %v3020_v32, %v2992_v53 }
 0x4eb   : > { %v3040_v40 = vadd.f32 %v3021_v23, %v4913_v43  ;;  %v3027_v43 = vpop.f32.mrf.mxu2 }
 0x4ed   : > { %3048 = vst.msk [vmem:[%s5417_s19] sm:$0xff] %vm543_vm3, %v3040_v40  ;;  %v2964_v29 = vpop.f32.mrf.mxu1 }
 0x4ee   : > { %v2993_v21 = vpop.f32.mrf.mxu0 }
 0x4ef   : > { %v2994_v31 = vadd.f32 %v2993_v21, %v2964_v29 }
 0x4f1   : > { %v3023_v8 = vadd.f32 %v3022_v6, %v2994_v31 }
 0x4f3   : > { %v3041_v26 = vadd.f32 %v3023_v8, %v4924_v57  ;;  %v3030_v34 = vpop.f32.mrf.mxu2 }
 0x4f5   : > { %3049 = vst.msk [vmem:[%s5417_s19 + $0x8] sm:$0xff] %vm543_vm3, %v3041_v26  ;;  %v2967_v59 = vpop.f32.mrf.mxu1 }
 0x4f6   : > { %v2996_v11 = vpop.f32.mrf.mxu0 }
 0x4f7   : > { %v2997_v35 = vadd.f32 %v2996_v11, %v2967_v59 }
 0x4f9   : > { %v3026_v2 = vadd.f32 %v3025_v15, %v2997_v35 }
 0x4fb   : > { %v3042_v44 = vadd.f32 %v3026_v2, %v4930_v22  ;;  %v3032_v3 = vpop.f32.mrf.mxu2 }
 0x4fd   : > { %3050 = vst.msk [vmem:[%s5417_s19 + $0x10] sm:$0xff] %vm543_vm3, %v3042_v44  ;;  %v2969_v0 = vpop.f32.mrf.mxu1 }
 0x4fe   : > { %v2998_v10 = vpop.f32.mrf.mxu0 }
 0x4ff   : > { %v2999_v4 = vadd.f32 %v2998_v10, %v2969_v0 }
 0x501   : > { %v3028_v36 = vadd.f32 %v3027_v43, %v2999_v4 }
 0x503   : > { %v3043_v57 = vadd.f32 %v3028_v36, %v4938_v13  ;;  %v3035_v18 = vpop.f32.mrf.mxu2 }
 0x505   : > { %3051 = vst.msk [vmem:[%s5417_s19 + $0x18] sm:$0xff] %vm543_vm3, %v3043_v57  ;;  %v2972_v5 = vpop.f32.mrf.mxu1 }
 0x506   : > { %v3001_v16 = vpop.f32.mrf.mxu0 }
 0x507   : > { %v3002_v51 = vadd.f32 %v3001_v16, %v2972_v5 }
 0x509   : > { %v3031_v52 = vadd.f32 %v3030_v34, %v3002_v51 }
 0x50b   : > { %v3044_v22 = vadd.f32 %v3031_v52, %v4958_v38  ;;  %v3037_v48 = vpop.f32.mrf.mxu2 }
 0x50d   : > { %3052 = vst.msk [vmem:[%s5417_s19 + $0x20] sm:$0xff] %vm543_vm3, %v3044_v22  ;;  %v2974_v33 = vpop.f32.mrf.mxu1 }
 0x50e   : > { %v3003_v25 = vpop.f32.mrf.mxu0 }
 0x50f   : > { %v3004_v56 = vadd.f32 %v3003_v25, %v2974_v33 }
 0x511   : > { %v3033_v1 = vadd.f32 %v3032_v3, %v3004_v56 }
 0x513   : > { %v3045_v13 = vadd.f32 %v3033_v1, %v4982_v55 }
 0x515   : > { %3053 = vst.msk [vmem:[%s5417_s19 + $0x28] sm:$0xff] %vm543_vm3, %v3045_v13  ;;  %v2977_v39 = vpop.f32.mrf.mxu1 }
 0x516   : > { %v3006_v58 = vpop.f32.mrf.mxu0 }
 0x517   : > { %v3007_v24 = vadd.f32 %v3006_v58, %v2977_v39 }
 0x519   : > { %v3036_v19 = vadd.f32 %v3035_v18, %v3007_v24 }
 0x51b   : > { %v3046_v38 = vadd.f32 %v3036_v19, %v5006_v9 }
 0x51d   : > { %3054 = vst.msk [vmem:[%s5417_s19 + $0x30] sm:$0xff] %vm543_vm3, %v3046_v38  ;;  %v2979_v14 = vpop.f32.mrf.mxu1 }
 0x51e   : > { %v3008_v55 = vpop.f32.mrf.mxu0 }
 0x51f   : > { %v3009_v54 = vadd.f32 %v3008_v55, %v2979_v14 }
 0x521   : > { %v3038_v63 = vadd.f32 %v3037_v48, %v3009_v54 }
 0x523   : > { %v3047_v41 = vadd.f32 %v3038_v63, %v5023_v20 }
 0x525   : > { %3055 = vst.msk [vmem:[%s5417_s19 + $0x38] sm:$0xff] %vm543_vm3, %v3047_v41 }
 0x526   : > { %4088 = shalt.err (!%p4085_p3)
}
 0x527   : > { %s4136_s5 = smov 128   ;;  %s5533_s19 = smov 8  }
 0x528   : > { %3480 = dma.vmem_to_hbm [thread:$0]  (%p4260_p5), %s3070_s26, 1024, %s3072_s28, %s3057_s25, %s4136_s5, %s4136_s5, %s5533_s19  }
 0x529 PF: > { %p3486_p4 = scmp.ge.s32.totalorder %s4123_s24, 2  ;;  %s3086_s18 = sand.u32 1, %s4111_s21  }
 0x52a   : > { %s3087_s2 = scalar_lea.sflag [#allocation5], %s3086_s18 }
 0x52b   : > { %p3483_p7 = pnand %p3486_p4, %p4264_p6 }
 0x52d   : > { %p3484_p8 = pneg %p3483_p7 }
 0x52f   : > { %4106 = dma.done.wait (%p3484_p8), %s3087_s2, 1024  }
 0x530   : > { %4108 = vsyncadd (%p3484_p8), %s3087_s2, 4294966272  ;;  %s5534_s29 = sld [smem:[#allocation7_spill]]  ;;  %p26_p9 = scmp.ge.s32.totalorder %s4247_s27, 4  }
 0x531   : > { %s5535_s21 = smov %s4115_s22  ;;  %s5536_s22 = smov %s4119_s23 }
 0x532   : > { %s5538_s24 = smov %s4247_s27  ;;  %28 = sbr.rel (!%p26_p9) target bundleno = 11 (0xb), region = 126 }
 0x536   : > { %s5537_s23 = smov %s5534_s29 }
 0x537   :  { %3093 = vsyncpa [#allocation5], 1 }
 0x538   :  { %3095 = vsyncpa [#allocation5 + $0x1], 1 }

</bundles_post_ra>
